<compile_context>
chip_gen: v7x
topology: tpu7x:2x2x1
jax: 0.10.0
libtpu: 0.0.40
codegen_flags: <defaults>
</compile_context>

<pallas_src>
import functools

import jax
import jax.numpy as jnp
from jax import lax
from jax.experimental import pallas as pl
from jax.experimental.pallas import tpu as pltpu

# ----- scaled-down bert-base-uncased config (synthetic weights) -----
VOCAB = 100
TYPE_VOCAB = 2
MAX_POS = 64
HIDDEN = 256
HEADS = 2
HEAD_DIM = HIDDEN // HEADS          # 128: head slices are whole-vreg aligned
LAYERS = 2
INTERMEDIATE = 4 * HIDDEN
HEAD_PAD = 128                      # lane-padded width of the 2-logit head
EPS = 1e-12


# ---------------- in-kernel helpers ----------------
def _layernorm(x, g, b):
    mu = jnp.mean(x, axis=-1, keepdims=True)
    xc = x - mu
    var = jnp.mean(xc * xc, axis=-1, keepdims=True)
    return xc * lax.rsqrt(var + EPS) * g + b


def _gelu(y):
    # TODO(synk): HF BERT uses exact erf-GELU; tanh approximation used here.
    c = 0.7978845608028654  # sqrt(2/pi)
    return 0.5 * y * (1.0 + jnp.tanh(c * (y + 0.044715 * y * y * y)))


# ---------------- Pallas kernels ----------------
def _ln_kernel(x_ref, g_ref, b_ref, o_ref):
    o_ref[...] = _layernorm(x_ref[...], g_ref[...], b_ref[...])


def layernorm(x, gamma, beta, tile_m=256):
    """Row-wise LayerNorm over the last dim; token-tiled grid."""
    M, H = x.shape
    tm = min(tile_m, M)
    return pl.pallas_call(
        _ln_kernel,
        out_shape=jax.ShapeDtypeStruct((M, H), jnp.float32),
        grid=(pl.cdiv(M, tm),),
        in_specs=[
            pl.BlockSpec((tm, H), lambda i: (i, 0)),
            pl.BlockSpec((1, H), lambda i: (0, 0)),
            pl.BlockSpec((1, H), lambda i: (0, 0)),
        ],
        out_specs=pl.BlockSpec((tm, H), lambda i: (i, 0)),
        compiler_params=pltpu.CompilerParams(
            dimension_semantics=("parallel",)),
    )(x, gamma, beta)


def _encoder_layer_kernel(x_ref, m_ref, wqkv_ref, bqkv_ref, wo_ref, bo_ref,
                          ln1_g_ref, ln1_b_ref, wi_ref, bi_ref, wo2_ref,
                          bo2_ref, ln2_g_ref, ln2_b_ref, o_ref, *, scale):
    x = x_ref[0]                       # (S, H) f32 activations
    addm = m_ref[0]                    # (1, S) f32 additive mask
    xb = x.astype(jnp.bfloat16)

    # Fused QKV projection: single bf16 MXU matmul, lane-dense N = 3H.
    qkv = jnp.dot(xb, wqkv_ref[...], preferred_element_type=jnp.float32)
    qkv = qkv + bqkv_ref[...]

    # Multi-head self-attention.  Heads are 128-lane-aligned slices of qkv, so
    # slicing is whole-register selection.  The output projection is folded in
    # per head, avoiding a merged-head intermediate.
    acc = None
    for h in range(HEADS):
        lo = h * HEAD_DIM
        qh = qkv[:, lo:lo + HEAD_DIM].astype(jnp.bfloat16)
        kh = qkv[:, HIDDEN + lo:HIDDEN + lo + HEAD_DIM].astype(jnp.bfloat16)
        vh = qkv[:, 2 * HIDDEN + lo:2 * HIDDEN + lo + HEAD_DIM].astype(
            jnp.bfloat16)
        s = lax.dot_general(
            qh, kh, dimension_numbers=(((1,), (1,)), ((), ())),
            preferred_element_type=jnp.float32) * scale          # (S, S)
        s = s + addm                                             # mask bcast
        s = s - jnp.max(s, axis=-1, keepdims=True)
        p = jnp.exp(s)
        p = p * pl.reciprocal(jnp.sum(p, axis=-1, keepdims=True), approx=True)
        ctx = jnp.dot(p.astype(jnp.bfloat16), vh,
                      preferred_element_type=jnp.float32)        # (S, Dh)
        part = jnp.dot(ctx.astype(jnp.bfloat16),
                       wo_ref[lo:lo + HEAD_DIM, :],
                       preferred_element_type=jnp.float32)       # (S, H)
        acc = part if acc is None else acc + part
    attn_out = acc + bo_ref[...]

    # Add & LayerNorm 1.
    x1 = _layernorm(attn_out + x, ln1_g_ref[...], ln1_b_ref[...])

    # Feed-forward (GELU) + output projection.
    h1 = jnp.dot(x1.astype(jnp.bfloat16), wi_ref[...],
                 preferred_element_type=jnp.float32) + bi_ref[...]
    h1 = _gelu(h1)
    ffn = jnp.dot(h1.astype(jnp.bfloat16), wo2_ref[...],
                  preferred_element_type=jnp.float32) + bo2_ref[...]

    # Add & LayerNorm 2.
    o_ref[0] = _layernorm(ffn + x1, ln2_g_ref[...], ln2_b_ref[...])


def encoder_layer(x, add_mask, lyr):
    """One fused BERT encoder layer.  x: [B, S, H]; add_mask: [B, 1, S]."""
    B, S, H = x.shape

    def full(shape):
        return pl.BlockSpec(shape, lambda b: (0,) * len(shape))

    return pl.pallas_call(
        functools.partial(_encoder_layer_kernel, scale=1.0 / (HEAD_DIM ** 0.5)),
        out_shape=jax.ShapeDtypeStruct((B, S, H), jnp.float32),
        grid=(B,),
        in_specs=[
            pl.BlockSpec((1, S, H), lambda b: (b, 0, 0)),
            pl.BlockSpec((1, 1, S), lambda b: (b, 0, 0)),
            full(lyr["wqkv"].shape), full(lyr["bqkv"].shape),
            full(lyr["wo"].shape), full(lyr["bo"].shape),
            full(lyr["ln1_g"].shape), full(lyr["ln1_b"].shape),
            full(lyr["wi"].shape), full(lyr["bi"].shape),
            full(lyr["wo2"].shape), full(lyr["bo2"].shape),
            full(lyr["ln2_g"].shape), full(lyr["ln2_b"].shape),
        ],
        out_specs=pl.BlockSpec((1, S, H), lambda b: (b, 0, 0)),
        compiler_params=pltpu.CompilerParams(
            dimension_semantics=("parallel",),
            # Toy weights (~1.6 MiB bf16) fit easily; leaves headroom on v7x's
            # 64 MiB VMEM.  At real BERT-base sizes keep weights bf16 or
            # stream the FFN weights (pl.Buffered) and raise this further on
            # v5e/v6e only.
            vmem_limit_bytes=32 * 1024 * 1024),
    )(x, add_mask, lyr["wqkv"], lyr["bqkv"], lyr["wo"], lyr["bo"],
      lyr["ln1_g"], lyr["ln1_b"], lyr["wi"], lyr["bi"], lyr["wo2"],
      lyr["bo2"], lyr["ln2_g"], lyr["ln2_b"])


def _head_kernel(x_ref, w_ref, b_ref, o_ref):
    o_ref[...] = jnp.dot(x_ref[...].astype(jnp.bfloat16), w_ref[...],
                         preferred_element_type=jnp.float32) + b_ref[...]


def qa_head(x, w_pad, b_pad, tile_m=256):
    """x @ w_pad + b_pad with a lane-dense (128-wide) padded output."""
    M, H = x.shape
    N = w_pad.shape[1]
    tm = min(tile_m, M)
    return pl.pallas_call(
        _head_kernel,
        out_shape=jax.ShapeDtypeStruct((M, N), jnp.float32),
        grid=(pl.cdiv(M, tm),),
        in_specs=[
            pl.BlockSpec((tm, H), lambda i: (i, 0)),
            pl.BlockSpec((H, N), lambda i: (0, 0)),
            pl.BlockSpec((1, N), lambda i: (0, 0)),
        ],
        out_specs=pl.BlockSpec((tm, N), lambda i: (i, 0)),
        compiler_params=pltpu.CompilerParams(
            dimension_semantics=("parallel",)),
    )(x, w_pad, b_pad)


# ---------------- parameter init (deterministic, synthetic) ----------------
def init_params(key):
    def nrm(k, shape, dtype=jnp.float32):
        return (0.02 * jax.random.normal(k, shape, jnp.float32)).astype(dtype)

    keys = iter(jax.random.split(key, 64))
    params = {
        "word_emb": nrm(next(keys), (VOCAB, HIDDEN)),
        "pos_emb": nrm(next(keys), (MAX_POS, HIDDEN)),
        "type_emb": nrm(next(keys), (TYPE_VOCAB, HIDDEN)),
        "emb_ln_g": jnp.ones((1, HIDDEN), jnp.float32),
        "emb_ln_b": jnp.zeros((1, HIDDEN), jnp.float32),
        "layers": [],
    }
    # l0: Linear(hidden -> 2), lane-padded to 128 output columns.
    w_l0 = nrm(next(keys), (HIDDEN, 2))
    params["l0_w_pad"] = (jnp.zeros((HIDDEN, HEAD_PAD), jnp.float32)
                          .at[:, :2].set(w_l0).astype(jnp.bfloat16))
    params["l0_b_pad"] = jnp.zeros((1, HEAD_PAD), jnp.float32)

    for _ in range(LAYERS):
        wq = nrm(next(keys), (HIDDEN, HIDDEN))
        wk = nrm(next(keys), (HIDDEN, HIDDEN))
        wv = nrm(next(keys), (HIDDEN, HIDDEN))
        params["layers"].append(dict(
            wqkv=jnp.concatenate([wq, wk, wv], axis=1).astype(jnp.bfloat16),
            bqkv=jnp.zeros((1, 3 * HIDDEN), jnp.float32),
            wo=nrm(next(keys), (HIDDEN, HIDDEN), jnp.bfloat16),
            bo=jnp.zeros((1, HIDDEN), jnp.float32),
            ln1_g=jnp.ones((1, HIDDEN), jnp.float32),
            ln1_b=jnp.zeros((1, HIDDEN), jnp.float32),
            wi=nrm(next(keys), (HIDDEN, INTERMEDIATE), jnp.bfloat16),
            bi=jnp.zeros((1, INTERMEDIATE), jnp.float32),
            wo2=nrm(next(keys), (INTERMEDIATE, HIDDEN), jnp.bfloat16),
            bo2=jnp.zeros((1, HIDDEN), jnp.float32),
            ln2_g=jnp.ones((1, HIDDEN), jnp.float32),
            ln2_b=jnp.zeros((1, HIDDEN), jnp.float32),
        ))
    return params


# ---------------- forward (glue in JAX, hot path in Pallas) ----------------
def bert_qa_forward(params, ids, attention_mask, token_type_ids):
    B, S = ids.shape

    # Embedding lookups are gather glue; LayerNorm runs in Pallas.
    x = (params["word_emb"][ids]
         + params["pos_emb"][jnp.arange(S)][None, :, :]
         + params["type_emb"][token_type_ids]).astype(jnp.float32)
    x = layernorm(x.reshape(B * S, HIDDEN),
                  params["emb_ln_g"], params["emb_ln_b"])
    x = x.reshape(B, S, HIDDEN)

    # Tiny additive mask [B, 1, S]; broadcast to [S, S] inside the kernel.
    add_mask = ((1.0 - attention_mask.astype(jnp.float32)) * -10000.0
                ).reshape(B, 1, S)

    for lyr in params["layers"]:
        x = encoder_layer(x, add_mask, lyr)

    # BertModel's pooled_output (tanh pooler on token 0) is never consumed by
    # the QA head, so it is skipped (dead value) per the performance review.

    logits = qa_head(x.reshape(B * S, HIDDEN),
                     params["l0_w_pad"], params["l0_b_pad"])
    logits = logits.reshape(B, S, HEAD_PAD)[..., :2]
    start_logits = logits[..., 0]
    end_logits = logits[..., 1]
    return start_logits, end_logits


if __name__ == "__main__":
    key = jax.random.PRNGKey(0)
    pkey, ikey = jax.random.split(key)
    params = init_params(pkey)

    B, S = 2, 8
    ids = jax.random.randint(ikey, (B, S), 0, VOCAB, dtype=jnp.int32)
    attention_mask = jnp.ones((B, S), jnp.int32).at[:, 6:].set(0)
    token_type_ids = jnp.zeros((B, S), jnp.int32).at[:, 4:].set(1)

    fwd = jax.jit(bert_qa_forward)
    start_logits, end_logits = fwd(params, ids, attention_mask, token_type_ids)
    jax.block_until_ready((start_logits, end_logits))
    assert start_logits.shape == (B, S) and end_logits.shape == (B, S)
    assert start_logits.dtype == jnp.float32 and end_logits.dtype == jnp.float32
    print("KERNEL_OK")
</pallas_src>

<mosaic_0001>
module attributes {stable_mosaic.version = 11 : i64} {
  func.func @_encoder_layer_kernel(%arg0: i32, %arg1: memref<1x8x256xf32, #tpu.memory_space<vmem>>, %arg2: memref<1x1x8xf32, #tpu.memory_space<vmem>>, %arg3: memref<256x768xbf16, #tpu.memory_space<vmem>>, %arg4: memref<1x768xf32, #tpu.memory_space<vmem>>, %arg5: memref<256x256xbf16, #tpu.memory_space<vmem>>, %arg6: memref<1x256xf32, #tpu.memory_space<vmem>>, %arg7: memref<1x256xf32, #tpu.memory_space<vmem>>, %arg8: memref<1x256xf32, #tpu.memory_space<vmem>>, %arg9: memref<256x1024xbf16, #tpu.memory_space<vmem>>, %arg10: memref<1x1024xf32, #tpu.memory_space<vmem>>, %arg11: memref<1024x256xbf16, #tpu.memory_space<vmem>>, %arg12: memref<1x256xf32, #tpu.memory_space<vmem>>, %arg13: memref<1x256xf32, #tpu.memory_space<vmem>>, %arg14: memref<1x256xf32, #tpu.memory_space<vmem>>, %arg15: memref<1x8x256xf32, #tpu.memory_space<vmem>>) attributes {dimension_semantics = [#tpu.dimension_semantics<parallel>], iteration_bounds = array<i64: 2>, scalar_prefetch = 0 : i64, scratch_operands = 0 : i64, tpu.core_type = #tpu.core_type<tc>, window_params = [{transform_indices = @transform_0, window_bounds = array<i64: 1, 8, 256>}, {transform_indices = @transform_1, window_bounds = array<i64: 1, 1, 8>}, {pipeline_mode = #tpu.pipeline_mode<synchronous>, transform_indices = @transform_2, window_bounds = array<i64: 256, 768>}, {pipeline_mode = #tpu.pipeline_mode<synchronous>, transform_indices = @transform_3, window_bounds = array<i64: 1, 768>}, {pipeline_mode = #tpu.pipeline_mode<synchronous>, transform_indices = @transform_4, window_bounds = array<i64: 256, 256>}, {pipeline_mode = #tpu.pipeline_mode<synchronous>, transform_indices = @transform_5, window_bounds = array<i64: 1, 256>}, {pipeline_mode = #tpu.pipeline_mode<synchronous>, transform_indices = @transform_6, window_bounds = array<i64: 1, 256>}, {pipeline_mode = #tpu.pipeline_mode<synchronous>, transform_indices = @transform_7, window_bounds = array<i64: 1, 256>}, {pipeline_mode = #tpu.pipeline_mode<synchronous>, transform_indices = @transform_8, window_bounds = array<i64: 256, 1024>}, {pipeline_mode = #tpu.pipeline_mode<synchronous>, transform_indices = @transform_9, window_bounds = array<i64: 1, 1024>}, {pipeline_mode = #tpu.pipeline_mode<synchronous>, transform_indices = @transform_10, window_bounds = array<i64: 1024, 256>}, {pipeline_mode = #tpu.pipeline_mode<synchronous>, transform_indices = @transform_11, window_bounds = array<i64: 1, 256>}, {pipeline_mode = #tpu.pipeline_mode<synchronous>, transform_indices = @transform_12, window_bounds = array<i64: 1, 256>}, {pipeline_mode = #tpu.pipeline_mode<synchronous>, transform_indices = @transform_13, window_bounds = array<i64: 1, 256>}, {transform_indices = @transform_14, window_bounds = array<i64: 1, 8, 256>}]} {
    %c0 = arith.constant 0 : index
    %c0_0 = arith.constant 0 : index
    %c0_1 = arith.constant 0 : index
    %0 = vector.load %arg1[%c0, %c0_0, %c0_1] : memref<1x8x256xf32, #tpu.memory_space<vmem>>, vector<1x8x256xf32>
    %1 = vector.shape_cast %0 : vector<1x8x256xf32> to vector<8x256xf32>
    %c0_2 = arith.constant 0 : index
    %c0_3 = arith.constant 0 : index
    %c0_4 = arith.constant 0 : index
    %2 = vector.load %arg2[%c0_2, %c0_3, %c0_4] : memref<1x1x8xf32, #tpu.memory_space<vmem>>, vector<1x1x8xf32>
    %3 = vector.shape_cast %2 : vector<1x1x8xf32> to vector<1x8xf32>
    %4 = arith.truncf %1 : vector<8x256xf32> to vector<8x256xbf16>
    %c0_5 = arith.constant 0 : index
    %c0_6 = arith.constant 0 : index
    %5 = vector.load %arg3[%c0_5, %c0_6] : memref<256x768xbf16, #tpu.memory_space<vmem>>, vector<256x768xbf16>
    %cst = arith.constant dense<0.000000e+00> : vector<8x768xf32>
    %6 = tpu.matmul %4, %5, %cst {dimension_numbers = #tpu.dot_dimension_numbers<[1], [0], [0], [1], [0, 0, 1, 1], [], []>} : vector<8x256xbf16>, vector<256x768xbf16>, vector<8x768xf32> -> vector<8x768xf32>
    %c0_7 = arith.constant 0 : index
    %c0_8 = arith.constant 0 : index
    %7 = vector.load %arg4[%c0_7, %c0_8] : memref<1x768xf32, #tpu.memory_space<vmem>>, vector<1x768xf32>
    %8 = vector.broadcast %7 : vector<1x768xf32> to vector<8x768xf32>
    %9 = arith.addf %6, %8 : vector<8x768xf32>
    %10 = vector.extract_strided_slice %9 {offsets = [0, 0], sizes = [8, 128], strides = [1, 1]} : vector<8x768xf32> to vector<8x128xf32>
    %11 = arith.truncf %10 : vector<8x128xf32> to vector<8x128xbf16>
    %12 = vector.extract_strided_slice %9 {offsets = [0, 256], sizes = [8, 128], strides = [1, 1]} : vector<8x768xf32> to vector<8x128xf32>
    %13 = arith.truncf %12 : vector<8x128xf32> to vector<8x128xbf16>
    %14 = vector.extract_strided_slice %9 {offsets = [0, 512], sizes = [8, 128], strides = [1, 1]} : vector<8x768xf32> to vector<8x128xf32>
    %15 = arith.truncf %14 : vector<8x128xf32> to vector<8x128xbf16>
    %cst_9 = arith.constant dense<0.000000e+00> : vector<8x8xf32>
    %16 = tpu.matmul %11, %13, %cst_9 {dimension_numbers = #tpu.dot_dimension_numbers<[1], [1], [0], [0], [0, 0, 1, 0], [], []>} : vector<8x128xbf16>, vector<8x128xbf16>, vector<8x8xf32> -> vector<8x8xf32>
    %cst_10 = arith.constant 0.0883883461 : f32
    %17 = vector.broadcast %cst_10 : f32 to vector<8x8xf32>
    %18 = arith.mulf %16, %17 : vector<8x8xf32>
    %19 = vector.broadcast %3 : vector<1x8xf32> to vector<8x8xf32>
    %20 = arith.addf %18, %19 : vector<8x8xf32>
    %cst_11 = arith.constant dense<0xFF800000> : vector<8xf32>
    %21 = vector.multi_reduction <maximumf>, %20, %cst_11 [1] : vector<8x8xf32> to vector<8xf32>
    %22 = vector.shape_cast %21 : vector<8xf32> to vector<8x1xf32>
    %23 = vector.broadcast %22 : vector<8x1xf32> to vector<8x8xf32>
    %24 = arith.subf %20, %23 : vector<8x8xf32>
    %25 = math.exp %24 : vector<8x8xf32>
    %cst_12 = arith.constant dense<0.000000e+00> : vector<8xf32>
    %26 = vector.multi_reduction <add>, %25, %cst_12 [1] : vector<8x8xf32> to vector<8xf32>
    %27 = vector.shape_cast %26 : vector<8xf32> to vector<8x1xf32>
    %28 = tpu.reciprocal %27 {approx = true} : vector<8x1xf32> -> vector<8x1xf32>
    %29 = vector.broadcast %28 : vector<8x1xf32> to vector<8x8xf32>
    %30 = arith.mulf %25, %29 : vector<8x8xf32>
    %31 = arith.truncf %30 : vector<8x8xf32> to vector<8x8xbf16>
    %cst_13 = arith.constant dense<0.000000e+00> : vector<8x128xf32>
    %32 = tpu.matmul %31, %15, %cst_13 {dimension_numbers = #tpu.dot_dimension_numbers<[1], [0], [0], [1], [0, 0, 1, 1], [], []>} : vector<8x8xbf16>, vector<8x128xbf16>, vector<8x128xf32> -> vector<8x128xf32>
    %33 = arith.truncf %32 : vector<8x128xf32> to vector<8x128xbf16>
    %c0_14 = arith.constant 0 : index
    %c0_15 = arith.constant 0 : index
    %34 = vector.load %arg5[%c0_14, %c0_15] : memref<256x256xbf16, #tpu.memory_space<vmem>>, vector<128x256xbf16>
    %cst_16 = arith.constant dense<0.000000e+00> : vector<8x256xf32>
    %35 = tpu.matmul %33, %34, %cst_16 {dimension_numbers = #tpu.dot_dimension_numbers<[1], [0], [0], [1], [0, 0, 1, 1], [], []>} : vector<8x128xbf16>, vector<128x256xbf16>, vector<8x256xf32> -> vector<8x256xf32>
    %36 = vector.extract_strided_slice %9 {offsets = [0, 128], sizes = [8, 128], strides = [1, 1]} : vector<8x768xf32> to vector<8x128xf32>
    %37 = arith.truncf %36 : vector<8x128xf32> to vector<8x128xbf16>
    %38 = vector.extract_strided_slice %9 {offsets = [0, 384], sizes = [8, 128], strides = [1, 1]} : vector<8x768xf32> to vector<8x128xf32>
    %39 = arith.truncf %38 : vector<8x128xf32> to vector<8x128xbf16>
    %40 = vector.extract_strided_slice %9 {offsets = [0, 640], sizes = [8, 128], strides = [1, 1]} : vector<8x768xf32> to vector<8x128xf32>
    %41 = arith.truncf %40 : vector<8x128xf32> to vector<8x128xbf16>
    %cst_17 = arith.constant dense<0.000000e+00> : vector<8x8xf32>
    %42 = tpu.matmul %37, %39, %cst_17 {dimension_numbers = #tpu.dot_dimension_numbers<[1], [1], [0], [0], [0, 0, 1, 0], [], []>} : vector<8x128xbf16>, vector<8x128xbf16>, vector<8x8xf32> -> vector<8x8xf32>
    %cst_18 = arith.constant 0.0883883461 : f32
    %43 = vector.broadcast %cst_18 : f32 to vector<8x8xf32>
    %44 = arith.mulf %42, %43 : vector<8x8xf32>
    %45 = vector.broadcast %3 : vector<1x8xf32> to vector<8x8xf32>
    %46 = arith.addf %44, %45 : vector<8x8xf32>
    %cst_19 = arith.constant dense<0xFF800000> : vector<8xf32>
    %47 = vector.multi_reduction <maximumf>, %46, %cst_19 [1] : vector<8x8xf32> to vector<8xf32>
    %48 = vector.shape_cast %47 : vector<8xf32> to vector<8x1xf32>
    %49 = vector.broadcast %48 : vector<8x1xf32> to vector<8x8xf32>
    %50 = arith.subf %46, %49 : vector<8x8xf32>
    %51 = math.exp %50 : vector<8x8xf32>
    %cst_20 = arith.constant dense<0.000000e+00> : vector<8xf32>
    %52 = vector.multi_reduction <add>, %51, %cst_20 [1] : vector<8x8xf32> to vector<8xf32>
    %53 = vector.shape_cast %52 : vector<8xf32> to vector<8x1xf32>
    %54 = tpu.reciprocal %53 {approx = true} : vector<8x1xf32> -> vector<8x1xf32>
    %55 = vector.broadcast %54 : vector<8x1xf32> to vector<8x8xf32>
    %56 = arith.mulf %51, %55 : vector<8x8xf32>
    %57 = arith.truncf %56 : vector<8x8xf32> to vector<8x8xbf16>
    %cst_21 = arith.constant dense<0.000000e+00> : vector<8x128xf32>
    %58 = tpu.matmul %57, %41, %cst_21 {dimension_numbers = #tpu.dot_dimension_numbers<[1], [0], [0], [1], [0, 0, 1, 1], [], []>} : vector<8x8xbf16>, vector<8x128xbf16>, vector<8x128xf32> -> vector<8x128xf32>
    %59 = arith.truncf %58 : vector<8x128xf32> to vector<8x128xbf16>
    %c128 = arith.constant 128 : index
    %c0_22 = arith.constant 0 : index
    %60 = vector.load %arg5[%c128, %c0_22] : memref<256x256xbf16, #tpu.memory_space<vmem>>, vector<128x256xbf16>
    %cst_23 = arith.constant dense<0.000000e+00> : vector<8x256xf32>
    %61 = tpu.matmul %59, %60, %cst_23 {dimension_numbers = #tpu.dot_dimension_numbers<[1], [0], [0], [1], [0, 0, 1, 1], [], []>} : vector<8x128xbf16>, vector<128x256xbf16>, vector<8x256xf32> -> vector<8x256xf32>
    %62 = arith.addf %35, %61 : vector<8x256xf32>
    %c0_24 = arith.constant 0 : index
    %c0_25 = arith.constant 0 : index
    %63 = vector.load %arg6[%c0_24, %c0_25] : memref<1x256xf32, #tpu.memory_space<vmem>>, vector<1x256xf32>
    %64 = vector.broadcast %63 : vector<1x256xf32> to vector<8x256xf32>
    %65 = arith.addf %62, %64 : vector<8x256xf32>
    %66 = arith.addf %65, %1 : vector<8x256xf32>
    %c0_26 = arith.constant 0 : index
    %c0_27 = arith.constant 0 : index
    %67 = vector.load %arg7[%c0_26, %c0_27] : memref<1x256xf32, #tpu.memory_space<vmem>>, vector<1x256xf32>
    %c0_28 = arith.constant 0 : index
    %c0_29 = arith.constant 0 : index
    %68 = vector.load %arg8[%c0_28, %c0_29] : memref<1x256xf32, #tpu.memory_space<vmem>>, vector<1x256xf32>
    %cst_30 = arith.constant dense<0.000000e+00> : vector<8xf32>
    %69 = vector.multi_reduction <add>, %66, %cst_30 [1] : vector<8x256xf32> to vector<8xf32>
    %70 = vector.shape_cast %69 : vector<8xf32> to vector<8x1xf32>
    %cst_31 = arith.constant 2.560000e+02 : f32
    %71 = vector.broadcast %cst_31 : f32 to vector<8x1xf32>
    %72 = arith.divf %70, %71 : vector<8x1xf32>
    %73 = vector.broadcast %72 : vector<8x1xf32> to vector<8x256xf32>
    %74 = arith.subf %66, %73 : vector<8x256xf32>
    %75 = arith.mulf %74, %74 : vector<8x256xf32>
    %cst_32 = arith.constant dense<0.000000e+00> : vector<8xf32>
    %76 = vector.multi_reduction <add>, %75, %cst_32 [1] : vector<8x256xf32> to vector<8xf32>
    %77 = vector.shape_cast %76 : vector<8xf32> to vector<8x1xf32>
    %cst_33 = arith.constant 2.560000e+02 : f32
    %78 = vector.broadcast %cst_33 : f32 to vector<8x1xf32>
    %79 = arith.divf %77, %78 : vector<8x1xf32>
    %cst_34 = arith.constant 9.99999996E-13 : f32
    %80 = vector.broadcast %cst_34 : f32 to vector<8x1xf32>
    %81 = arith.addf %79, %80 : vector<8x1xf32>
    %82 = math.rsqrt %81 : vector<8x1xf32>
    %83 = vector.broadcast %82 : vector<8x1xf32> to vector<8x256xf32>
    %84 = arith.mulf %74, %83 : vector<8x256xf32>
    %85 = vector.broadcast %67 : vector<1x256xf32> to vector<8x256xf32>
    %86 = arith.mulf %84, %85 : vector<8x256xf32>
    %87 = vector.broadcast %68 : vector<1x256xf32> to vector<8x256xf32>
    %88 = arith.addf %86, %87 : vector<8x256xf32>
    %89 = arith.truncf %88 : vector<8x256xf32> to vector<8x256xbf16>
    %c0_35 = arith.constant 0 : index
    %c0_36 = arith.constant 0 : index
    %90 = vector.load %arg9[%c0_35, %c0_36] : memref<256x1024xbf16, #tpu.memory_space<vmem>>, vector<256x1024xbf16>
    %cst_37 = arith.constant dense<0.000000e+00> : vector<8x1024xf32>
    %91 = tpu.matmul %89, %90, %cst_37 {dimension_numbers = #tpu.dot_dimension_numbers<[1], [0], [0], [1], [0, 0, 1, 1], [], []>} : vector<8x256xbf16>, vector<256x1024xbf16>, vector<8x1024xf32> -> vector<8x1024xf32>
    %c0_38 = arith.constant 0 : index
    %c0_39 = arith.constant 0 : index
    %92 = vector.load %arg10[%c0_38, %c0_39] : memref<1x1024xf32, #tpu.memory_space<vmem>>, vector<1x1024xf32>
    %93 = vector.broadcast %92 : vector<1x1024xf32> to vector<8x1024xf32>
    %94 = arith.addf %91, %93 : vector<8x1024xf32>
    %cst_40 = arith.constant 5.000000e-01 : f32
    %95 = vector.broadcast %cst_40 : f32 to vector<8x1024xf32>
    %96 = arith.mulf %95, %94 : vector<8x1024xf32>
    %cst_41 = arith.constant 4.471500e-02 : f32
    %97 = vector.broadcast %cst_41 : f32 to vector<8x1024xf32>
    %98 = arith.mulf %97, %94 : vector<8x1024xf32>
    %99 = arith.mulf %98, %94 : vector<8x1024xf32>
    %100 = arith.mulf %99, %94 : vector<8x1024xf32>
    %101 = arith.addf %94, %100 : vector<8x1024xf32>
    %cst_42 = arith.constant 0.797884583 : f32
    %102 = vector.broadcast %cst_42 : f32 to vector<8x1024xf32>
    %103 = arith.mulf %102, %101 : vector<8x1024xf32>
    %104 = math.tanh %103 : vector<8x1024xf32>
    %cst_43 = arith.constant 1.000000e+00 : f32
    %105 = vector.broadcast %cst_43 : f32 to vector<8x1024xf32>
    %106 = arith.addf %105, %104 : vector<8x1024xf32>
    %107 = arith.mulf %96, %106 : vector<8x1024xf32>
    %108 = arith.truncf %107 : vector<8x1024xf32> to vector<8x1024xbf16>
    %c0_44 = arith.constant 0 : index
    %c0_45 = arith.constant 0 : index
    %109 = vector.load %arg11[%c0_44, %c0_45] : memref<1024x256xbf16, #tpu.memory_space<vmem>>, vector<1024x256xbf16>
    %cst_46 = arith.constant dense<0.000000e+00> : vector<8x256xf32>
    %110 = tpu.matmul %108, %109, %cst_46 {dimension_numbers = #tpu.dot_dimension_numbers<[1], [0], [0], [1], [0, 0, 1, 1], [], []>} : vector<8x1024xbf16>, vector<1024x256xbf16>, vector<8x256xf32> -> vector<8x256xf32>
    %c0_47 = arith.constant 0 : index
    %c0_48 = arith.constant 0 : index
    %111 = vector.load %arg12[%c0_47, %c0_48] : memref<1x256xf32, #tpu.memory_space<vmem>>, vector<1x256xf32>
    %112 = vector.broadcast %111 : vector<1x256xf32> to vector<8x256xf32>
    %113 = arith.addf %110, %112 : vector<8x256xf32>
    %114 = arith.addf %113, %88 : vector<8x256xf32>
    %c0_49 = arith.constant 0 : index
    %c0_50 = arith.constant 0 : index
    %115 = vector.load %arg13[%c0_49, %c0_50] : memref<1x256xf32, #tpu.memory_space<vmem>>, vector<1x256xf32>
    %c0_51 = arith.constant 0 : index
    %c0_52 = arith.constant 0 : index
    %116 = vector.load %arg14[%c0_51, %c0_52] : memref<1x256xf32, #tpu.memory_space<vmem>>, vector<1x256xf32>
    %cst_53 = arith.constant dense<0.000000e+00> : vector<8xf32>
    %117 = vector.multi_reduction <add>, %114, %cst_53 [1] : vector<8x256xf32> to vector<8xf32>
    %118 = vector.shape_cast %117 : vector<8xf32> to vector<8x1xf32>
    %cst_54 = arith.constant 2.560000e+02 : f32
    %119 = vector.broadcast %cst_54 : f32 to vector<8x1xf32>
    %120 = arith.divf %118, %119 : vector<8x1xf32>
    %121 = vector.broadcast %120 : vector<8x1xf32> to vector<8x256xf32>
    %122 = arith.subf %114, %121 : vector<8x256xf32>
    %123 = arith.mulf %122, %122 : vector<8x256xf32>
    %cst_55 = arith.constant dense<0.000000e+00> : vector<8xf32>
    %124 = vector.multi_reduction <add>, %123, %cst_55 [1] : vector<8x256xf32> to vector<8xf32>
    %125 = vector.shape_cast %124 : vector<8xf32> to vector<8x1xf32>
    %cst_56 = arith.constant 2.560000e+02 : f32
    %126 = vector.broadcast %cst_56 : f32 to vector<8x1xf32>
    %127 = arith.divf %125, %126 : vector<8x1xf32>
    %cst_57 = arith.constant 9.99999996E-13 : f32
    %128 = vector.broadcast %cst_57 : f32 to vector<8x1xf32>
    %129 = arith.addf %127, %128 : vector<8x1xf32>
    %130 = math.rsqrt %129 : vector<8x1xf32>
    %131 = vector.broadcast %130 : vector<8x1xf32> to vector<8x256xf32>
    %132 = arith.mulf %122, %131 : vector<8x256xf32>
    %133 = vector.broadcast %115 : vector<1x256xf32> to vector<8x256xf32>
    %134 = arith.mulf %132, %133 : vector<8x256xf32>
    %135 = vector.broadcast %116 : vector<1x256xf32> to vector<8x256xf32>
    %136 = arith.addf %134, %135 : vector<8x256xf32>
    %c0_58 = arith.constant 0 : index
    %c0_59 = arith.constant 0 : index
    %c0_60 = arith.constant 0 : index
    %137 = vector.load %arg15[%c0_58, %c0_59, %c0_60] : memref<1x8x256xf32, #tpu.memory_space<vmem>>, vector<1x8x256xf32>
    %138 = vector.shape_cast %137 : vector<1x8x256xf32> to vector<8x256xf32>
    %139 = vector.shape_cast %136 : vector<8x256xf32> to vector<1x8x256xf32>
    tpu.vector_store %arg15[%c0_58, %c0_59, %c0_60], %139 {strides = array<i32>} : memref<1x8x256xf32, #tpu.memory_space<vmem>>, vector<1x8x256xf32>,
    return
  }
  func.func @transform_0(%arg0: i32) -> (i32, i32, i32) {
    %c0_i32 = arith.constant 0 : i32
    %c0_i32_0 = arith.constant 0 : i32
    %c0_i32_1 = arith.constant 0 : i32
    return %arg0, %c0_i32, %c0_i32_0 : i32, i32, i32
  }
  func.func @transform_1(%arg0: i32) -> (i32, i32, i32) {
    %c0_i32 = arith.constant 0 : i32
    %c0_i32_0 = arith.constant 0 : i32
    %c0_i32_1 = arith.constant 0 : i32
    return %arg0, %c0_i32, %c0_i32_0 : i32, i32, i32
  }
  func.func @transform_2(%arg0: i32) -> (i32, i32) {
    %c0_i32 = arith.constant 0 : i32
    %c0_i32_0 = arith.constant 0 : i32
    %c0_i32_1 = arith.constant 0 : i32
    return %c0_i32, %c0_i32_0 : i32, i32
  }
  func.func @transform_3(%arg0: i32) -> (i32, i32) {
    %c0_i32 = arith.constant 0 : i32
    %c0_i32_0 = arith.constant 0 : i32
    %c0_i32_1 = arith.constant 0 : i32
    return %c0_i32, %c0_i32_0 : i32, i32
  }
  func.func @transform_4(%arg0: i32) -> (i32, i32) {
    %c0_i32 = arith.constant 0 : i32
    %c0_i32_0 = arith.constant 0 : i32
    %c0_i32_1 = arith.constant 0 : i32
    return %c0_i32, %c0_i32_0 : i32, i32
  }
  func.func @transform_5(%arg0: i32) -> (i32, i32) {
    %c0_i32 = arith.constant 0 : i32
    %c0_i32_0 = arith.constant 0 : i32
    %c0_i32_1 = arith.constant 0 : i32
    return %c0_i32, %c0_i32_0 : i32, i32
  }
  func.func @transform_6(%arg0: i32) -> (i32, i32) {
    %c0_i32 = arith.constant 0 : i32
    %c0_i32_0 = arith.constant 0 : i32
    %c0_i32_1 = arith.constant 0 : i32
    return %c0_i32, %c0_i32_0 : i32, i32
  }
  func.func @transform_7(%arg0: i32) -> (i32, i32) {
    %c0_i32 = arith.constant 0 : i32
    %c0_i32_0 = arith.constant 0 : i32
    %c0_i32_1 = arith.constant 0 : i32
    return %c0_i32, %c0_i32_0 : i32, i32
  }
  func.func @transform_8(%arg0: i32) -> (i32, i32) {
    %c0_i32 = arith.constant 0 : i32
    %c0_i32_0 = arith.constant 0 : i32
    %c0_i32_1 = arith.constant 0 : i32
    return %c0_i32, %c0_i32_0 : i32, i32
  }
  func.func @transform_9(%arg0: i32) -> (i32, i32) {
    %c0_i32 = arith.constant 0 : i32
    %c0_i32_0 = arith.constant 0 : i32
    %c0_i32_1 = arith.constant 0 : i32
    return %c0_i32, %c0_i32_0 : i32, i32
  }
  func.func @transform_10(%arg0: i32) -> (i32, i32) {
    %c0_i32 = arith.constant 0 : i32
    %c0_i32_0 = arith.constant 0 : i32
    %c0_i32_1 = arith.constant 0 : i32
    return %c0_i32, %c0_i32_0 : i32, i32
  }
  func.func @transform_11(%arg0: i32) -> (i32, i32) {
    %c0_i32 = arith.constant 0 : i32
    %c0_i32_0 = arith.constant 0 : i32
    %c0_i32_1 = arith.constant 0 : i32
    return %c0_i32, %c0_i32_0 : i32, i32
  }
  func.func @transform_12(%arg0: i32) -> (i32, i32) {
    %c0_i32 = arith.constant 0 : i32
    %c0_i32_0 = arith.constant 0 : i32
    %c0_i32_1 = arith.constant 0 : i32
    return %c0_i32, %c0_i32_0 : i32, i32
  }
  func.func @transform_13(%arg0: i32) -> (i32, i32) {
    %c0_i32 = arith.constant 0 : i32
    %c0_i32_0 = arith.constant 0 : i32
    %c0_i32_1 = arith.constant 0 : i32
    return %c0_i32, %c0_i32_0 : i32, i32
  }
  func.func @transform_14(%arg0: i32) -> (i32, i32, i32) {
    %c0_i32 = arith.constant 0 : i32
    %c0_i32_0 = arith.constant 0 : i32
    %c0_i32_1 = arith.constant 0 : i32
    return %arg0, %c0_i32, %c0_i32_0 : i32, i32, i32
  }
}

module attributes {stable_mosaic.version = 11 : i64} {
  func.func @_ln_kernel(%arg0: i32, %arg1: memref<16x256xf32, #tpu.memory_space<vmem>>, %arg2: memref<1x256xf32, #tpu.memory_space<vmem>>, %arg3: memref<1x256xf32, #tpu.memory_space<vmem>>, %arg4: memref<16x256xf32, #tpu.memory_space<vmem>>) attributes {dimension_semantics = [#tpu.dimension_semantics<parallel>], iteration_bounds = array<i64: 1>, scalar_prefetch = 0 : i64, scratch_operands = 0 : i64, tpu.core_type = #tpu.core_type<tc>, window_params = [{transform_indices = @transform_0, window_bounds = array<i64: 16, 256>}, {pipeline_mode = #tpu.pipeline_mode<synchronous>, transform_indices = @transform_1, window_bounds = array<i64: 1, 256>}, {pipeline_mode = #tpu.pipeline_mode<synchronous>, transform_indices = @transform_2, window_bounds = array<i64: 1, 256>}, {transform_indices = @transform_3, window_bounds = array<i64: 16, 256>}]} {
    %c0 = arith.constant 0 : index
    %c0_0 = arith.constant 0 : index
    %0 = vector.load %arg1[%c0, %c0_0] : memref<16x256xf32, #tpu.memory_space<vmem>>, vector<16x256xf32>
    %c0_1 = arith.constant 0 : index
    %c0_2 = arith.constant 0 : index
    %1 = vector.load %arg2[%c0_1, %c0_2] : memref<1x256xf32, #tpu.memory_space<vmem>>, vector<1x256xf32>
    %c0_3 = arith.constant 0 : index
    %c0_4 = arith.constant 0 : index
    %2 = vector.load %arg3[%c0_3, %c0_4] : memref<1x256xf32, #tpu.memory_space<vmem>>, vector<1x256xf32>
    %cst = arith.constant dense<0.000000e+00> : vector<16xf32>
    %3 = vector.multi_reduction <add>, %0, %cst [1] : vector<16x256xf32> to vector<16xf32>
    %4 = vector.shape_cast %3 : vector<16xf32> to vector<16x1xf32>
    %cst_5 = arith.constant 2.560000e+02 : f32
    %5 = vector.broadcast %cst_5 : f32 to vector<16x1xf32>
    %6 = arith.divf %4, %5 : vector<16x1xf32>
    %7 = vector.broadcast %6 : vector<16x1xf32> to vector<16x256xf32>
    %8 = arith.subf %0, %7 : vector<16x256xf32>
    %9 = arith.mulf %8, %8 : vector<16x256xf32>
    %cst_6 = arith.constant dense<0.000000e+00> : vector<16xf32>
    %10 = vector.multi_reduction <add>, %9, %cst_6 [1] : vector<16x256xf32> to vector<16xf32>
    %11 = vector.shape_cast %10 : vector<16xf32> to vector<16x1xf32>
    %cst_7 = arith.constant 2.560000e+02 : f32
    %12 = vector.broadcast %cst_7 : f32 to vector<16x1xf32>
    %13 = arith.divf %11, %12 : vector<16x1xf32>
    %cst_8 = arith.constant 9.99999996E-13 : f32
    %14 = vector.broadcast %cst_8 : f32 to vector<16x1xf32>
    %15 = arith.addf %13, %14 : vector<16x1xf32>
    %16 = math.rsqrt %15 : vector<16x1xf32>
    %17 = vector.broadcast %16 : vector<16x1xf32> to vector<16x256xf32>
    %18 = arith.mulf %8, %17 : vector<16x256xf32>
    %19 = vector.broadcast %1 : vector<1x256xf32> to vector<16x256xf32>
    %20 = arith.mulf %18, %19 : vector<16x256xf32>
    %21 = vector.broadcast %2 : vector<1x256xf32> to vector<16x256xf32>
    %22 = arith.addf %20, %21 : vector<16x256xf32>
    %c0_9 = arith.constant 0 : index
    %c0_10 = arith.constant 0 : index
    %23 = vector.load %arg4[%c0_9, %c0_10] : memref<16x256xf32, #tpu.memory_space<vmem>>, vector<16x256xf32>
    tpu.vector_store %arg4[%c0_9, %c0_10], %22 {strides = array<i32>} : memref<16x256xf32, #tpu.memory_space<vmem>>, vector<16x256xf32>,
    return
  }
  func.func @transform_0(%arg0: i32) -> (i32, i32) {
    %c0_i32 = arith.constant 0 : i32
    %c0_i32_0 = arith.constant 0 : i32
    return %arg0, %c0_i32 : i32, i32
  }
  func.func @transform_1(%arg0: i32) -> (i32, i32) {
    %c0_i32 = arith.constant 0 : i32
    %c0_i32_0 = arith.constant 0 : i32
    %c0_i32_1 = arith.constant 0 : i32
    return %c0_i32, %c0_i32_0 : i32, i32
  }
  func.func @transform_2(%arg0: i32) -> (i32, i32) {
    %c0_i32 = arith.constant 0 : i32
    %c0_i32_0 = arith.constant 0 : i32
    %c0_i32_1 = arith.constant 0 : i32
    return %c0_i32, %c0_i32_0 : i32, i32
  }
  func.func @transform_3(%arg0: i32) -> (i32, i32) {
    %c0_i32 = arith.constant 0 : i32
    %c0_i32_0 = arith.constant 0 : i32
    return %arg0, %c0_i32 : i32, i32
  }
}

module attributes {stable_mosaic.version = 11 : i64} {
  func.func @_head_kernel(%arg0: i32, %arg1: memref<16x256xf32, #tpu.memory_space<vmem>>, %arg2: memref<256x128xbf16, #tpu.memory_space<vmem>>, %arg3: memref<1x128xf32, #tpu.memory_space<vmem>>, %arg4: memref<16x128xf32, #tpu.memory_space<vmem>>) attributes {dimension_semantics = [#tpu.dimension_semantics<parallel>], iteration_bounds = array<i64: 1>, scalar_prefetch = 0 : i64, scratch_operands = 0 : i64, tpu.core_type = #tpu.core_type<tc>, window_params = [{transform_indices = @transform_0, window_bounds = array<i64: 16, 256>}, {pipeline_mode = #tpu.pipeline_mode<synchronous>, transform_indices = @transform_1, window_bounds = array<i64: 256, 128>}, {pipeline_mode = #tpu.pipeline_mode<synchronous>, transform_indices = @transform_2, window_bounds = array<i64: 1, 128>}, {transform_indices = @transform_3, window_bounds = array<i64: 16, 128>}]} {
    %c0 = arith.constant 0 : index
    %c0_0 = arith.constant 0 : index
    %0 = vector.load %arg1[%c0, %c0_0] : memref<16x256xf32, #tpu.memory_space<vmem>>, vector<16x256xf32>
    %1 = arith.truncf %0 : vector<16x256xf32> to vector<16x256xbf16>
    %c0_1 = arith.constant 0 : index
    %c0_2 = arith.constant 0 : index
    %2 = vector.load %arg2[%c0_1, %c0_2] : memref<256x128xbf16, #tpu.memory_space<vmem>>, vector<256x128xbf16>
    %cst = arith.constant dense<0.000000e+00> : vector<16x128xf32>
    %3 = tpu.matmul %1, %2, %cst {dimension_numbers = #tpu.dot_dimension_numbers<[1], [0], [0], [1], [0, 0, 1, 1], [], []>} : vector<16x256xbf16>, vector<256x128xbf16>, vector<16x128xf32> -> vector<16x128xf32>
    %c0_3 = arith.constant 0 : index
    %c0_4 = arith.constant 0 : index
    %4 = vector.load %arg3[%c0_3, %c0_4] : memref<1x128xf32, #tpu.memory_space<vmem>>, vector<1x128xf32>
    %5 = vector.broadcast %4 : vector<1x128xf32> to vector<16x128xf32>
    %6 = arith.addf %3, %5 : vector<16x128xf32>
    %c0_5 = arith.constant 0 : index
    %c0_6 = arith.constant 0 : index
    %7 = vector.load %arg4[%c0_5, %c0_6] : memref<16x128xf32, #tpu.memory_space<vmem>>, vector<16x128xf32>
    tpu.vector_store %arg4[%c0_5, %c0_6], %6 {strides = array<i32>} : memref<16x128xf32, #tpu.memory_space<vmem>>, vector<16x128xf32>,
    return
  }
  func.func @transform_0(%arg0: i32) -> (i32, i32) {
    %c0_i32 = arith.constant 0 : i32
    %c0_i32_0 = arith.constant 0 : i32
    return %arg0, %c0_i32 : i32, i32
  }
  func.func @transform_1(%arg0: i32) -> (i32, i32) {
    %c0_i32 = arith.constant 0 : i32
    %c0_i32_0 = arith.constant 0 : i32
    %c0_i32_1 = arith.constant 0 : i32
    return %c0_i32, %c0_i32_0 : i32, i32
  }
  func.func @transform_2(%arg0: i32) -> (i32, i32) {
    %c0_i32 = arith.constant 0 : i32
    %c0_i32_0 = arith.constant 0 : i32
    %c0_i32_1 = arith.constant 0 : i32
    return %c0_i32, %c0_i32_0 : i32, i32
  }
  func.func @transform_3(%arg0: i32) -> (i32, i32) {
    %c0_i32 = arith.constant 0 : i32
    %c0_i32_0 = arith.constant 0 : i32
    return %arg0, %c0_i32 : i32, i32
  }
}

module attributes {stable_mosaic.version = 11 : i64} {
  func.func @_encoder_layer_kernel(%arg0: i32, %arg1: memref<1x8x256xf32, #tpu.memory_space<vmem>>, %arg2: memref<1x1x8xf32, #tpu.memory_space<vmem>>, %arg3: memref<256x768xbf16, #tpu.memory_space<vmem>>, %arg4: memref<1x768xf32, #tpu.memory_space<vmem>>, %arg5: memref<256x256xbf16, #tpu.memory_space<vmem>>, %arg6: memref<1x256xf32, #tpu.memory_space<vmem>>, %arg7: memref<1x256xf32, #tpu.memory_space<vmem>>, %arg8: memref<1x256xf32, #tpu.memory_space<vmem>>, %arg9: memref<256x1024xbf16, #tpu.memory_space<vmem>>, %arg10: memref<1x1024xf32, #tpu.memory_space<vmem>>, %arg11: memref<1024x256xbf16, #tpu.memory_space<vmem>>, %arg12: memref<1x256xf32, #tpu.memory_space<vmem>>, %arg13: memref<1x256xf32, #tpu.memory_space<vmem>>, %arg14: memref<1x256xf32, #tpu.memory_space<vmem>>, %arg15: memref<1x8x256xf32, #tpu.memory_space<vmem>>) attributes {dimension_semantics = [#tpu.dimension_semantics<parallel>], iteration_bounds = array<i64: 2>, scalar_prefetch = 0 : i64, scratch_operands = 0 : i64, tpu.core_type = #tpu.core_type<tc>, window_params = [{transform_indices = @transform_0, window_bounds = array<i64: 1, 8, 256>}, {transform_indices = @transform_1, window_bounds = array<i64: 1, 1, 8>}, {pipeline_mode = #tpu.pipeline_mode<synchronous>, transform_indices = @transform_2, window_bounds = array<i64: 256, 768>}, {pipeline_mode = #tpu.pipeline_mode<synchronous>, transform_indices = @transform_3, window_bounds = array<i64: 1, 768>}, {pipeline_mode = #tpu.pipeline_mode<synchronous>, transform_indices = @transform_4, window_bounds = array<i64: 256, 256>}, {pipeline_mode = #tpu.pipeline_mode<synchronous>, transform_indices = @transform_5, window_bounds = array<i64: 1, 256>}, {pipeline_mode = #tpu.pipeline_mode<synchronous>, transform_indices = @transform_6, window_bounds = array<i64: 1, 256>}, {pipeline_mode = #tpu.pipeline_mode<synchronous>, transform_indices = @transform_7, window_bounds = array<i64: 1, 256>}, {pipeline_mode = #tpu.pipeline_mode<synchronous>, transform_indices = @transform_8, window_bounds = array<i64: 256, 1024>}, {pipeline_mode = #tpu.pipeline_mode<synchronous>, transform_indices = @transform_9, window_bounds = array<i64: 1, 1024>}, {pipeline_mode = #tpu.pipeline_mode<synchronous>, transform_indices = @transform_10, window_bounds = array<i64: 1024, 256>}, {pipeline_mode = #tpu.pipeline_mode<synchronous>, transform_indices = @transform_11, window_bounds = array<i64: 1, 256>}, {pipeline_mode = #tpu.pipeline_mode<synchronous>, transform_indices = @transform_12, window_bounds = array<i64: 1, 256>}, {pipeline_mode = #tpu.pipeline_mode<synchronous>, transform_indices = @transform_13, window_bounds = array<i64: 1, 256>}, {transform_indices = @transform_14, window_bounds = array<i64: 1, 8, 256>}]} {
    %c0 = arith.constant 0 : index
    %c0_0 = arith.constant 0 : index
    %c0_1 = arith.constant 0 : index
    %0 = vector.load %arg1[%c0, %c0_0, %c0_1] : memref<1x8x256xf32, #tpu.memory_space<vmem>>, vector<1x8x256xf32>
    %1 = vector.shape_cast %0 : vector<1x8x256xf32> to vector<8x256xf32>
    %c0_2 = arith.constant 0 : index
    %c0_3 = arith.constant 0 : index
    %c0_4 = arith.constant 0 : index
    %2 = vector.load %arg2[%c0_2, %c0_3, %c0_4] : memref<1x1x8xf32, #tpu.memory_space<vmem>>, vector<1x1x8xf32>
    %3 = vector.shape_cast %2 : vector<1x1x8xf32> to vector<1x8xf32>
    %4 = arith.truncf %1 : vector<8x256xf32> to vector<8x256xbf16>
    %c0_5 = arith.constant 0 : index
    %c0_6 = arith.constant 0 : index
    %5 = vector.load %arg3[%c0_5, %c0_6] : memref<256x768xbf16, #tpu.memory_space<vmem>>, vector<256x768xbf16>
    %cst = arith.constant dense<0.000000e+00> : vector<8x768xf32>
    %6 = tpu.matmul %4, %5, %cst {dimension_numbers = #tpu.dot_dimension_numbers<[1], [0], [0], [1], [0, 0, 1, 1], [], []>} : vector<8x256xbf16>, vector<256x768xbf16>, vector<8x768xf32> -> vector<8x768xf32>
    %c0_7 = arith.constant 0 : index
    %c0_8 = arith.constant 0 : index
    %7 = vector.load %arg4[%c0_7, %c0_8] : memref<1x768xf32, #tpu.memory_space<vmem>>, vector<1x768xf32>
    %8 = vector.broadcast %7 : vector<1x768xf32> to vector<8x768xf32>
    %9 = arith.addf %6, %8 : vector<8x768xf32>
    %10 = vector.extract_strided_slice %9 {offsets = [0, 0], sizes = [8, 128], strides = [1, 1]} : vector<8x768xf32> to vector<8x128xf32>
    %11 = arith.truncf %10 : vector<8x128xf32> to vector<8x128xbf16>
    %12 = vector.extract_strided_slice %9 {offsets = [0, 256], sizes = [8, 128], strides = [1, 1]} : vector<8x768xf32> to vector<8x128xf32>
    %13 = arith.truncf %12 : vector<8x128xf32> to vector<8x128xbf16>
    %14 = vector.extract_strided_slice %9 {offsets = [0, 512], sizes = [8, 128], strides = [1, 1]} : vector<8x768xf32> to vector<8x128xf32>
    %15 = arith.truncf %14 : vector<8x128xf32> to vector<8x128xbf16>
    %cst_9 = arith.constant dense<0.000000e+00> : vector<8x8xf32>
    %16 = tpu.matmul %11, %13, %cst_9 {dimension_numbers = #tpu.dot_dimension_numbers<[1], [1], [0], [0], [0, 0, 1, 0], [], []>} : vector<8x128xbf16>, vector<8x128xbf16>, vector<8x8xf32> -> vector<8x8xf32>
    %cst_10 = arith.constant 0.0883883461 : f32
    %17 = vector.broadcast %cst_10 : f32 to vector<8x8xf32>
    %18 = arith.mulf %16, %17 : vector<8x8xf32>
    %19 = vector.broadcast %3 : vector<1x8xf32> to vector<8x8xf32>
    %20 = arith.addf %18, %19 : vector<8x8xf32>
    %cst_11 = arith.constant dense<0xFF800000> : vector<8xf32>
    %21 = vector.multi_reduction <maximumf>, %20, %cst_11 [1] : vector<8x8xf32> to vector<8xf32>
    %22 = vector.shape_cast %21 : vector<8xf32> to vector<8x1xf32>
    %23 = vector.broadcast %22 : vector<8x1xf32> to vector<8x8xf32>
    %24 = arith.subf %20, %23 : vector<8x8xf32>
    %25 = math.exp %24 : vector<8x8xf32>
    %cst_12 = arith.constant dense<0.000000e+00> : vector<8xf32>
    %26 = vector.multi_reduction <add>, %25, %cst_12 [1] : vector<8x8xf32> to vector<8xf32>
    %27 = vector.shape_cast %26 : vector<8xf32> to vector<8x1xf32>
    %28 = tpu.reciprocal %27 {approx = true} : vector<8x1xf32> -> vector<8x1xf32>
    %29 = vector.broadcast %28 : vector<8x1xf32> to vector<8x8xf32>
    %30 = arith.mulf %25, %29 : vector<8x8xf32>
    %31 = arith.truncf %30 : vector<8x8xf32> to vector<8x8xbf16>
    %cst_13 = arith.constant dense<0.000000e+00> : vector<8x128xf32>
    %32 = tpu.matmul %31, %15, %cst_13 {dimension_numbers = #tpu.dot_dimension_numbers<[1], [0], [0], [1], [0, 0, 1, 1], [], []>} : vector<8x8xbf16>, vector<8x128xbf16>, vector<8x128xf32> -> vector<8x128xf32>
    %33 = arith.truncf %32 : vector<8x128xf32> to vector<8x128xbf16>
    %c0_14 = arith.constant 0 : index
    %c0_15 = arith.constant 0 : index
    %34 = vector.load %arg5[%c0_14, %c0_15] : memref<256x256xbf16, #tpu.memory_space<vmem>>, vector<128x256xbf16>
    %cst_16 = arith.constant dense<0.000000e+00> : vector<8x256xf32>
    %35 = tpu.matmul %33, %34, %cst_16 {dimension_numbers = #tpu.dot_dimension_numbers<[1], [0], [0], [1], [0, 0, 1, 1], [], []>} : vector<8x128xbf16>, vector<128x256xbf16>, vector<8x256xf32> -> vector<8x256xf32>
    %36 = vector.extract_strided_slice %9 {offsets = [0, 128], sizes = [8, 128], strides = [1, 1]} : vector<8x768xf32> to vector<8x128xf32>
    %37 = arith.truncf %36 : vector<8x128xf32> to vector<8x128xbf16>
    %38 = vector.extract_strided_slice %9 {offsets = [0, 384], sizes = [8, 128], strides = [1, 1]} : vector<8x768xf32> to vector<8x128xf32>
    %39 = arith.truncf %38 : vector<8x128xf32> to vector<8x128xbf16>
    %40 = vector.extract_strided_slice %9 {offsets = [0, 640], sizes = [8, 128], strides = [1, 1]} : vector<8x768xf32> to vector<8x128xf32>
    %41 = arith.truncf %40 : vector<8x128xf32> to vector<8x128xbf16>
    %cst_17 = arith.constant dense<0.000000e+00> : vector<8x8xf32>
    %42 = tpu.matmul %37, %39, %cst_17 {dimension_numbers = #tpu.dot_dimension_numbers<[1], [1], [0], [0], [0, 0, 1, 0], [], []>} : vector<8x128xbf16>, vector<8x128xbf16>, vector<8x8xf32> -> vector<8x8xf32>
    %cst_18 = arith.constant 0.0883883461 : f32
    %43 = vector.broadcast %cst_18 : f32 to vector<8x8xf32>
    %44 = arith.mulf %42, %43 : vector<8x8xf32>
    %45 = vector.broadcast %3 : vector<1x8xf32> to vector<8x8xf32>
    %46 = arith.addf %44, %45 : vector<8x8xf32>
    %cst_19 = arith.constant dense<0xFF800000> : vector<8xf32>
    %47 = vector.multi_reduction <maximumf>, %46, %cst_19 [1] : vector<8x8xf32> to vector<8xf32>
    %48 = vector.shape_cast %47 : vector<8xf32> to vector<8x1xf32>
    %49 = vector.broadcast %48 : vector<8x1xf32> to vector<8x8xf32>
    %50 = arith.subf %46, %49 : vector<8x8xf32>
    %51 = math.exp %50 : vector<8x8xf32>
    %cst_20 = arith.constant dense<0.000000e+00> : vector<8xf32>
    %52 = vector.multi_reduction <add>, %51, %cst_20 [1] : vector<8x8xf32> to vector<8xf32>
    %53 = vector.shape_cast %52 : vector<8xf32> to vector<8x1xf32>
    %54 = tpu.reciprocal %53 {approx = true} : vector<8x1xf32> -> vector<8x1xf32>
    %55 = vector.broadcast %54 : vector<8x1xf32> to vector<8x8xf32>
    %56 = arith.mulf %51, %55 : vector<8x8xf32>
    %57 = arith.truncf %56 : vector<8x8xf32> to vector<8x8xbf16>
    %cst_21 = arith.constant dense<0.000000e+00> : vector<8x128xf32>
    %58 = tpu.matmul %57, %41, %cst_21 {dimension_numbers = #tpu.dot_dimension_numbers<[1], [0], [0], [1], [0, 0, 1, 1], [], []>} : vector<8x8xbf16>, vector<8x128xbf16>, vector<8x128xf32> -> vector<8x128xf32>
    %59 = arith.truncf %58 : vector<8x128xf32> to vector<8x128xbf16>
    %c128 = arith.constant 128 : index
    %c0_22 = arith.constant 0 : index
    %60 = vector.load %arg5[%c128, %c0_22] : memref<256x256xbf16, #tpu.memory_space<vmem>>, vector<128x256xbf16>
    %cst_23 = arith.constant dense<0.000000e+00> : vector<8x256xf32>
    %61 = tpu.matmul %59, %60, %cst_23 {dimension_numbers = #tpu.dot_dimension_numbers<[1], [0], [0], [1], [0, 0, 1, 1], [], []>} : vector<8x128xbf16>, vector<128x256xbf16>, vector<8x256xf32> -> vector<8x256xf32>
    %62 = arith.addf %35, %61 : vector<8x256xf32>
    %c0_24 = arith.constant 0 : index
    %c0_25 = arith.constant 0 : index
    %63 = vector.load %arg6[%c0_24, %c0_25] : memref<1x256xf32, #tpu.memory_space<vmem>>, vector<1x256xf32>
    %64 = vector.broadcast %63 : vector<1x256xf32> to vector<8x256xf32>
    %65 = arith.addf %62, %64 : vector<8x256xf32>
    %66 = arith.addf %65, %1 : vector<8x256xf32>
    %c0_26 = arith.constant 0 : index
    %c0_27 = arith.constant 0 : index
    %67 = vector.load %arg7[%c0_26, %c0_27] : memref<1x256xf32, #tpu.memory_space<vmem>>, vector<1x256xf32>
    %c0_28 = arith.constant 0 : index
    %c0_29 = arith.constant 0 : index
    %68 = vector.load %arg8[%c0_28, %c0_29] : memref<1x256xf32, #tpu.memory_space<vmem>>, vector<1x256xf32>
    %cst_30 = arith.constant dense<0.000000e+00> : vector<8xf32>
    %69 = vector.multi_reduction <add>, %66, %cst_30 [1] : vector<8x256xf32> to vector<8xf32>
    %70 = vector.shape_cast %69 : vector<8xf32> to vector<8x1xf32>
    %cst_31 = arith.constant 2.560000e+02 : f32
    %71 = vector.broadcast %cst_31 : f32 to vector<8x1xf32>
    %72 = arith.divf %70, %71 : vector<8x1xf32>
    %73 = vector.broadcast %72 : vector<8x1xf32> to vector<8x256xf32>
    %74 = arith.subf %66, %73 : vector<8x256xf32>
    %75 = arith.mulf %74, %74 : vector<8x256xf32>
    %cst_32 = arith.constant dense<0.000000e+00> : vector<8xf32>
    %76 = vector.multi_reduction <add>, %75, %cst_32 [1] : vector<8x256xf32> to vector<8xf32>
    %77 = vector.shape_cast %76 : vector<8xf32> to vector<8x1xf32>
    %cst_33 = arith.constant 2.560000e+02 : f32
    %78 = vector.broadcast %cst_33 : f32 to vector<8x1xf32>
    %79 = arith.divf %77, %78 : vector<8x1xf32>
    %cst_34 = arith.constant 9.99999996E-13 : f32
    %80 = vector.broadcast %cst_34 : f32 to vector<8x1xf32>
    %81 = arith.addf %79, %80 : vector<8x1xf32>
    %82 = math.rsqrt %81 : vector<8x1xf32>
    %83 = vector.broadcast %82 : vector<8x1xf32> to vector<8x256xf32>
    %84 = arith.mulf %74, %83 : vector<8x256xf32>
    %85 = vector.broadcast %67 : vector<1x256xf32> to vector<8x256xf32>
    %86 = arith.mulf %84, %85 : vector<8x256xf32>
    %87 = vector.broadcast %68 : vector<1x256xf32> to vector<8x256xf32>
    %88 = arith.addf %86, %87 : vector<8x256xf32>
    %89 = arith.truncf %88 : vector<8x256xf32> to vector<8x256xbf16>
    %c0_35 = arith.constant 0 : index
    %c0_36 = arith.constant 0 : index
    %90 = vector.load %arg9[%c0_35, %c0_36] : memref<256x1024xbf16, #tpu.memory_space<vmem>>, vector<256x1024xbf16>
    %cst_37 = arith.constant dense<0.000000e+00> : vector<8x1024xf32>
    %91 = tpu.matmul %89, %90, %cst_37 {dimension_numbers = #tpu.dot_dimension_numbers<[1], [0], [0], [1], [0, 0, 1, 1], [], []>} : vector<8x256xbf16>, vector<256x1024xbf16>, vector<8x1024xf32> -> vector<8x1024xf32>
    %c0_38 = arith.constant 0 : index
    %c0_39 = arith.constant 0 : index
    %92 = vector.load %arg10[%c0_38, %c0_39] : memref<1x1024xf32, #tpu.memory_space<vmem>>, vector<1x1024xf32>
    %93 = vector.broadcast %92 : vector<1x1024xf32> to vector<8x1024xf32>
    %94 = arith.addf %91, %93 : vector<8x1024xf32>
    %cst_40 = arith.constant 5.000000e-01 : f32
    %95 = vector.broadcast %cst_40 : f32 to vector<8x1024xf32>
    %96 = arith.mulf %95, %94 : vector<8x1024xf32>
    %cst_41 = arith.constant 4.471500e-02 : f32
    %97 = vector.broadcast %cst_41 : f32 to vector<8x1024xf32>
    %98 = arith.mulf %97, %94 : vector<8x1024xf32>
    %99 = arith.mulf %98, %94 : vector<8x1024xf32>
    %100 = arith.mulf %99, %94 : vector<8x1024xf32>
    %101 = arith.addf %94, %100 : vector<8x1024xf32>
    %cst_42 = arith.constant 0.797884583 : f32
    %102 = vector.broadcast %cst_42 : f32 to vector<8x1024xf32>
    %103 = arith.mulf %102, %101 : vector<8x1024xf32>
    %104 = math.tanh %103 : vector<8x1024xf32>
    %cst_43 = arith.constant 1.000000e+00 : f32
    %105 = vector.broadcast %cst_43 : f32 to vector<8x1024xf32>
    %106 = arith.addf %105, %104 : vector<8x1024xf32>
    %107 = arith.mulf %96, %106 : vector<8x1024xf32>
    %108 = arith.truncf %107 : vector<8x1024xf32> to vector<8x1024xbf16>
    %c0_44 = arith.constant 0 : index
    %c0_45 = arith.constant 0 : index
    %109 = vector.load %arg11[%c0_44, %c0_45] : memref<1024x256xbf16, #tpu.memory_space<vmem>>, vector<1024x256xbf16>
    %cst_46 = arith.constant dense<0.000000e+00> : vector<8x256xf32>
    %110 = tpu.matmul %108, %109, %cst_46 {dimension_numbers = #tpu.dot_dimension_numbers<[1], [0], [0], [1], [0, 0, 1, 1], [], []>} : vector<8x1024xbf16>, vector<1024x256xbf16>, vector<8x256xf32> -> vector<8x256xf32>
    %c0_47 = arith.constant 0 : index
    %c0_48 = arith.constant 0 : index
    %111 = vector.load %arg12[%c0_47, %c0_48] : memref<1x256xf32, #tpu.memory_space<vmem>>, vector<1x256xf32>
    %112 = vector.broadcast %111 : vector<1x256xf32> to vector<8x256xf32>
    %113 = arith.addf %110, %112 : vector<8x256xf32>
    %114 = arith.addf %113, %88 : vector<8x256xf32>
    %c0_49 = arith.constant 0 : index
    %c0_50 = arith.constant 0 : index
    %115 = vector.load %arg13[%c0_49, %c0_50] : memref<1x256xf32, #tpu.memory_space<vmem>>, vector<1x256xf32>
    %c0_51 = arith.constant 0 : index
    %c0_52 = arith.constant 0 : index
    %116 = vector.load %arg14[%c0_51, %c0_52] : memref<1x256xf32, #tpu.memory_space<vmem>>, vector<1x256xf32>
    %cst_53 = arith.constant dense<0.000000e+00> : vector<8xf32>
    %117 = vector.multi_reduction <add>, %114, %cst_53 [1] : vector<8x256xf32> to vector<8xf32>
    %118 = vector.shape_cast %117 : vector<8xf32> to vector<8x1xf32>
    %cst_54 = arith.constant 2.560000e+02 : f32
    %119 = vector.broadcast %cst_54 : f32 to vector<8x1xf32>
    %120 = arith.divf %118, %119 : vector<8x1xf32>
    %121 = vector.broadcast %120 : vector<8x1xf32> to vector<8x256xf32>
    %122 = arith.subf %114, %121 : vector<8x256xf32>
    %123 = arith.mulf %122, %122 : vector<8x256xf32>
    %cst_55 = arith.constant dense<0.000000e+00> : vector<8xf32>
    %124 = vector.multi_reduction <add>, %123, %cst_55 [1] : vector<8x256xf32> to vector<8xf32>
    %125 = vector.shape_cast %124 : vector<8xf32> to vector<8x1xf32>
    %cst_56 = arith.constant 2.560000e+02 : f32
    %126 = vector.broadcast %cst_56 : f32 to vector<8x1xf32>
    %127 = arith.divf %125, %126 : vector<8x1xf32>
    %cst_57 = arith.constant 9.99999996E-13 : f32
    %128 = vector.broadcast %cst_57 : f32 to vector<8x1xf32>
    %129 = arith.addf %127, %128 : vector<8x1xf32>
    %130 = math.rsqrt %129 : vector<8x1xf32>
    %131 = vector.broadcast %130 : vector<8x1xf32> to vector<8x256xf32>
    %132 = arith.mulf %122, %131 : vector<8x256xf32>
    %133 = vector.broadcast %115 : vector<1x256xf32> to vector<8x256xf32>
    %134 = arith.mulf %132, %133 : vector<8x256xf32>
    %135 = vector.broadcast %116 : vector<1x256xf32> to vector<8x256xf32>
    %136 = arith.addf %134, %135 : vector<8x256xf32>
    %c0_58 = arith.constant 0 : index
    %c0_59 = arith.constant 0 : index
    %c0_60 = arith.constant 0 : index
    %137 = vector.load %arg15[%c0_58, %c0_59, %c0_60] : memref<1x8x256xf32, #tpu.memory_space<vmem>>, vector<1x8x256xf32>
    %138 = vector.shape_cast %137 : vector<1x8x256xf32> to vector<8x256xf32>
    %139 = vector.shape_cast %136 : vector<8x256xf32> to vector<1x8x256xf32>
    tpu.vector_store %arg15[%c0_58, %c0_59, %c0_60], %139 {strides = array<i32>} : memref<1x8x256xf32, #tpu.memory_space<vmem>>, vector<1x8x256xf32>,
    return
  }
  func.func @transform_0(%arg0: i32) -> (i32, i32, i32) {
    %c0_i32 = arith.constant 0 : i32
    %c0_i32_0 = arith.constant 0 : i32
    %c0_i32_1 = arith.constant 0 : i32
    return %arg0, %c0_i32, %c0_i32_0 : i32, i32, i32
  }
  func.func @transform_1(%arg0: i32) -> (i32, i32, i32) {
    %c0_i32 = arith.constant 0 : i32
    %c0_i32_0 = arith.constant 0 : i32
    %c0_i32_1 = arith.constant 0 : i32
    return %arg0, %c0_i32, %c0_i32_0 : i32, i32, i32
  }
  func.func @transform_2(%arg0: i32) -> (i32, i32) {
    %c0_i32 = arith.constant 0 : i32
    %c0_i32_0 = arith.constant 0 : i32
    %c0_i32_1 = arith.constant 0 : i32
    return %c0_i32, %c0_i32_0 : i32, i32
  }
  func.func @transform_3(%arg0: i32) -> (i32, i32) {
    %c0_i32 = arith.constant 0 : i32
    %c0_i32_0 = arith.constant 0 : i32
    %c0_i32_1 = arith.constant 0 : i32
    return %c0_i32, %c0_i32_0 : i32, i32
  }
  func.func @transform_4(%arg0: i32) -> (i32, i32) {
    %c0_i32 = arith.constant 0 : i32
    %c0_i32_0 = arith.constant 0 : i32
    %c0_i32_1 = arith.constant 0 : i32
    return %c0_i32, %c0_i32_0 : i32, i32
  }
  func.func @transform_5(%arg0: i32) -> (i32, i32) {
    %c0_i32 = arith.constant 0 : i32
    %c0_i32_0 = arith.constant 0 : i32
    %c0_i32_1 = arith.constant 0 : i32
    return %c0_i32, %c0_i32_0 : i32, i32
  }
  func.func @transform_6(%arg0: i32) -> (i32, i32) {
    %c0_i32 = arith.constant 0 : i32
    %c0_i32_0 = arith.constant 0 : i32
    %c0_i32_1 = arith.constant 0 : i32
    return %c0_i32, %c0_i32_0 : i32, i32
  }
  func.func @transform_7(%arg0: i32) -> (i32, i32) {
    %c0_i32 = arith.constant 0 : i32
    %c0_i32_0 = arith.constant 0 : i32
    %c0_i32_1 = arith.constant 0 : i32
    return %c0_i32, %c0_i32_0 : i32, i32
  }
  func.func @transform_8(%arg0: i32) -> (i32, i32) {
    %c0_i32 = arith.constant 0 : i32
    %c0_i32_0 = arith.constant 0 : i32
    %c0_i32_1 = arith.constant 0 : i32
    return %c0_i32, %c0_i32_0 : i32, i32
  }
  func.func @transform_9(%arg0: i32) -> (i32, i32) {
    %c0_i32 = arith.constant 0 : i32
    %c0_i32_0 = arith.constant 0 : i32
    %c0_i32_1 = arith.constant 0 : i32
    return %c0_i32, %c0_i32_0 : i32, i32
  }
  func.func @transform_10(%arg0: i32) -> (i32, i32) {
    %c0_i32 = arith.constant 0 : i32
    %c0_i32_0 = arith.constant 0 : i32
    %c0_i32_1 = arith.constant 0 : i32
    return %c0_i32, %c0_i32_0 : i32, i32
  }
  func.func @transform_11(%arg0: i32) -> (i32, i32) {
    %c0_i32 = arith.constant 0 : i32
    %c0_i32_0 = arith.constant 0 : i32
    %c0_i32_1 = arith.constant 0 : i32
    return %c0_i32, %c0_i32_0 : i32, i32
  }
  func.func @transform_12(%arg0: i32) -> (i32, i32) {
    %c0_i32 = arith.constant 0 : i32
    %c0_i32_0 = arith.constant 0 : i32
    %c0_i32_1 = arith.constant 0 : i32
    return %c0_i32, %c0_i32_0 : i32, i32
  }
  func.func @transform_13(%arg0: i32) -> (i32, i32) {
    %c0_i32 = arith.constant 0 : i32
    %c0_i32_0 = arith.constant 0 : i32
    %c0_i32_1 = arith.constant 0 : i32
    return %c0_i32, %c0_i32_0 : i32, i32
  }
  func.func @transform_14(%arg0: i32) -> (i32, i32, i32) {
    %c0_i32 = arith.constant 0 : i32
    %c0_i32_0 = arith.constant 0 : i32
    %c0_i32_1 = arith.constant 0 : i32
    return %arg0, %c0_i32, %c0_i32_0 : i32, i32, i32
  }
}

</mosaic_0001>

<bundles_post_ra>
// kernel: bert_qa_forward.4
= control target key start
LH: loop header
LB: loop body
LE: loop exit
PB: predicated region body
PF: predicated region fallthrough
CT: control target
= control target key end

     0   :  { %v54_v22 = vlaneseq  ;;  %s145_s0 = inlined_call_operand.vmem [shape: f32[16,256], index: 0, kind: input, shape index: {}]   ;;  %s146_s1 = inlined_call_operand.vmem [shape: f32[1,256], index: 1, kind: input, shape index: {}]   ;;  %s147_s2 = inlined_call_operand.vmem [shape: f32[1,256], index: 2, kind: input, shape index: {}]   ;;  %s148_s3 = inlined_call_operand.vmem [shape: f32[16,256], index: 3, kind: output, shape index: {}]  }
   0x1   :  { %v14_v0 = vld [vmem:[%s145_s0] sm:$0xff]  ;;  %v15_v1 = vld [vmem:[%s145_s0 + $0x8] sm:$0xff]  ;;  %v16_v2 = vld [vmem:[%s145_s0 + $0x10] sm:$0xff] }
   0x2   :  { %v20_v3 = vadd.f32 %v15_v1, %v14_v0  ;;  %v17_v4 = vld [vmem:[%s145_s0 + $0x18] sm:$0xff]  ;;  %v55_v26 = vshrl.u32 %v54_v22, 7  ;;  %v18_v30 = vld [vmem:[%s146_s1] sm:$0x3] }
   0x3   :  { %v23_v5 = vadd.f32 %v17_v4, %v16_v2  ;;  %v19_v31 = vld [vmem:[%s147_s2] sm:$0x3] }
   0x4   :  { %21 = vadd.xlane.f32.xlu0 %v20_v3  ;;  %v56_v28 = vsub.s32 0, %v55_v26  ;;  %v60_v29 = vsub.s32 1, %v55_v26 }
   0x6   :  { %v57_v32 = vrot.slane %v18_v30, %v56_v28  ;;  %v61_v33 = vrot.slane %v18_v30, %v60_v29  ;;  %v72_v35 = vrot.slane %v19_v31, %v56_v28  ;;  %v76_v36 = vrot.slane %v19_v31, %v60_v29 }
   0x8   :  { %24 = vadd.xlane.f32.xlu0 %v23_v5 }
  0x91   :  { %v22_v6 = vpop.xlane.xlu0 %21 }
  0x92   :  { %v27_v7 = vmul.f32 0.00390625, %v22_v6 }
  0x94   :  { %v29_v8 = vsub.f32 %v14_v0, %v27_v7  ;;  %v30_v9 = vsub.f32 %v15_v1, %v27_v7 }
  0x95   :  { %v25_v10 = vpop.xlane.xlu0 %24 }
  0x96   :  { %v28_v11 = vmul.f32 0.00390625, %v25_v10  ;;  %v33_v12 = vmul.f32 %v29_v8, %v29_v8  ;;  %v34_v13 = vmul.f32 %v30_v9, %v30_v9 }
  0x98   :  { %v31_v14 = vsub.f32 %v16_v2, %v28_v11  ;;  %v32_v15 = vsub.f32 %v17_v4, %v28_v11  ;;  %v37_v16 = vadd.f32 %v34_v13, %v33_v12 }
  0x9a   :  { %38 = vadd.xlane.f32.xlu1 %v37_v16  ;;  %v35_v17 = vmul.f32 %v31_v14, %v31_v14  ;;  %v36_v18 = vmul.f32 %v32_v15, %v32_v15 }
  0x9c   :  { %v40_v19 = vadd.f32 %v36_v18, %v35_v17 }
  0x9e   :  { %41 = vadd.xlane.f32.xlu1 %v40_v19 }
 0x127   :  { %v39_v20 = vpop.xlane.xlu1 %38 }
 0x128   :  { %v43_v21 = vmul.f32 0.00390625, %v39_v20 }
 0x12a   :  { %v45_v23 = vadd.f32 1e-12, %v43_v21 }
 0x12b   :  { %v42_v24 = vpop.xlane.xlu1 %41 }
 0x12c   :  { %91 = vrsqrt.f32 %v45_v23  ;;  %v44_v25 = vmul.f32 0.00390625, %v42_v24 }
 0x12e   :  { %v46_v27 = vadd.f32 1e-12, %v44_v25 }
 0x130   :  { %93 = vrsqrt.f32 %v46_v27 }
 0x136   :  { %v92_v34 = vpop.eup %91 }
 0x137   :  { %v49_v37 = vmul.f32 %v92_v34, %v29_v8  ;;  %v50_v38 = vmul.f32 %v92_v34, %v30_v9 }
 0x139   :  { %v64_v39 = vmul.f32 %v57_v32, %v49_v37  ;;  %v65_v40 = vmul.f32 %v61_v33, %v50_v38 }
 0x13a   :  { %v94_v41 = vpop.eup %93 }
 0x13b   :  { %v79_v42 = vadd.f32 %v72_v35, %v64_v39  ;;  %v80_v43 = vadd.f32 %v76_v36, %v65_v40  ;;  %v51_v44 = vmul.f32 %v94_v41, %v31_v14  ;;  %v52_v45 = vmul.f32 %v94_v41, %v32_v15 }
 0x13d   :  { %83 = vst [vmem:[%s148_s3] sm:$0xff] %v79_v42  ;;  %84 = vst [vmem:[%s148_s3 + $0x8] sm:$0xff] %v80_v43  ;;  %v66_v46 = vmul.f32 %v57_v32, %v51_v44  ;;  %v67_v47 = vmul.f32 %v61_v33, %v52_v45 }
 0x13f   :  { %v81_v48 = vadd.f32 %v72_v35, %v66_v46  ;;  %v82_v49 = vadd.f32 %v76_v36, %v67_v47 }
 0x141   :  { %85 = vst [vmem:[%s148_s3 + $0x10] sm:$0xff] %v81_v48  ;;  %86 = vst [vmem:[%s148_s3 + $0x18] sm:$0xff] %v82_v49 }

// kernel: bert_qa_forward.7
= control target key start
LH: loop header
LB: loop body
LE: loop exit
PB: predicated region body
PF: predicated region fallthrough
CT: control target
= control target key end

     0   :  { %s347_s1 = inlined_call_operand.vmem [shape: bf16[256,128], index: 1, kind: input, shape index: {}]   ;;  %s348_s0 = inlined_call_operand.vmem [shape: f32[16,256], index: 0, kind: input, shape index: {}]   ;;  %s349_s2 = inlined_call_operand.vmem [shape: f32[1,128], index: 2, kind: input, shape index: {}]   ;;  %s350_s3 = inlined_call_operand.vmem [shape: f32[16,128], index: 3, kind: output, shape index: {}]  }
   0x1   :  { %v242_v0 = vld [vmem:[%s347_s1 + $0x40] sm:$0xff]   ;;  %v244_v2 = vld [vmem:[%s347_s1 + $0x48] sm:$0xff]   ;;  %v246_v4 = vld [vmem:[%s347_s1 + $0x50] sm:$0xff]  }
   0x2   :  { %v243_v1 = vld [vmem:[%s347_s1] sm:$0xff]   ;;  %220 = vmatprep.subr.bf16.mxu0 %v242_v0  ;;  %v245_v3 = vld [vmem:[%s347_s1 + $0x8] sm:$0xff]   ;;  %v247_v5 = vld [vmem:[%s347_s1 + $0x10] sm:$0xff]  }
   0x3   :  { %221 = vmatpush3.bf16.msra.mxu0 %v243_v1  ;;  %v248_v6 = vld [vmem:[%s347_s1 + $0x58] sm:$0xff]   ;;  %v250_v8 = vld [vmem:[%s347_s1 + $0x60] sm:$0xff]   ;;  %v252_v10 = vld [vmem:[%s347_s1 + $0x68] sm:$0xff]  }
   0x4   :  { %222 = vmatprep.subr.bf16.mxu0 %v244_v2  ;;  %v249_v7 = vld [vmem:[%s347_s1 + $0x18] sm:$0xff]   ;;  %v251_v9 = vld [vmem:[%s347_s1 + $0x20] sm:$0xff]   ;;  %v16_v11 = vld [vmem:[%s348_s0 + $0x8] sm:$0xff] }
   0x5   :  { %v18_v12 = vld [vmem:[%s348_s0 + $0x18] sm:$0xff]  ;;  %v253_v14 = vld [vmem:[%s347_s1 + $0x28] sm:$0xff]   ;;  %v254_v15 = vld [vmem:[%s347_s1 + $0x70] sm:$0xff]  }
   0x6   :  { %v20_v13 = vpack.c.bf16 %v18_v12, %v16_v11  ;;  %v255_v16 = vld [vmem:[%s347_s1 + $0x30] sm:$0xff]   ;;  %v256_v17 = vld [vmem:[%s347_s1 + $0x78] sm:$0xff]   ;;  %v15_v19 = vld [vmem:[%s348_s0] sm:$0xff] }
   0x7   :  { %223 = vmatpush3.bf16.msra.mxu0 %v245_v3  ;;  %v257_v18 = vld [vmem:[%s347_s1 + $0x38] sm:$0xff]   ;;  %v17_v20 = vld [vmem:[%s348_s0 + $0x10] sm:$0xff]  ;;  %v203_v23 = vld [vmem:[%s349_s2] ss:$0 sm:$0xff] }
   0x8   :  { %224 = vmatprep.subr.bf16.mxu0 %v246_v4  ;;  %188 = vmatprep.mubr.bf16.mxu0 %v20_v13  ;;  %v19_v21 = vpack.c.bf16 %v17_v20, %v15_v19 }
   0xb   :  { %225 = vmatpush3.bf16.msra.mxu0 %v247_v5 }
   0xc   :  { %226 = vmatprep.subr.bf16.mxu0 %v248_v6 }
   0xf   :  { %227 = vmatpush3.bf16.msra.mxu0 %v249_v7 }
  0x10   :  { %228 = vmatprep.subr.bf16.mxu0 %v250_v8 }
  0x13   :  { %229 = vmatpush3.bf16.msra.mxu0 %v251_v9 }
  0x14   :  { %230 = vmatprep.subr.bf16.mxu0 %v252_v10 }
  0x17   :  { %231 = vmatpush3.bf16.msra.mxu0 %v253_v14 }
  0x18   :  { %232 = vmatprep.subr.bf16.mxu0 %v254_v15 }
  0x1b   :  { %233 = vmatpush3.bf16.msra.mxu0 %v255_v16 }
  0x1c   :  { %234 = vmatprep.subr.bf16.mxu0 %v256_v17 }
  0x1f   :  { %235 = vmatpush3.bf16.msra.mxu0 %v257_v18 }
  0x22   :  { %189 = vmatmul.mubr.bf16.vlgmr.msra.gmra.mrb[0].mxu0 %v19_v21 }
  0xf5   :  { %v236_v22 = vpop.f32.mrb[0].mxu0 }
  0xf6   :  { %v237_v24 = vpop.f32.mrb[1].mxu0 }
  0xf7   :  { %v238_v25 = vadd.f32 %v237_v24, %v236_v22  ;;  %v239_v26 = vpop.f32.mrb[2].mxu0 }
  0xf8   :  { %v240_v27 = vpop.f32.mrb[3].mxu0 }
  0xf9   :  { %v191_v28 = vadd.f32 %v238_v25, %v203_v23  ;;  %v241_v29 = vadd.f32 %v240_v27, %v239_v26 }
  0xfb   :  { %197 = vst [vmem:[%s350_s3] sm:$0xff] %v191_v28  ;;  %v194_v30 = vadd.f32 %v241_v29, %v203_v23 }
  0xfd   :  { %198 = vst [vmem:[%s350_s3 + $0x8] sm:$0xff] %v194_v30 }

// kernel: bert_qa_forward.6
= control target key start
LH: loop header
LB: loop body
LE: loop exit
PB: predicated region body
PF: predicated region fallthrough
CT: control target
= control target key end

     0   :  { %s4823_s29 = smov 0   ;;  %s6204_s0 = inlined_call_operand.vmem [shape: f32[2,8,256], index: 0, kind: input, shape index: {}]   ;;  %s6205_s1 = inlined_call_operand.vmem [shape: f32[2,1,8], index: 1, kind: input, shape index: {}]   ;;  %s6206_s2 = inlined_call_operand.vmem [shape: bf16[256,768], index: 2, kind: input, shape index: {}]   ;;  %s6207_s3 = inlined_call_operand.vmem [shape: f32[1,768], index: 3, kind: input, shape index: {}]   ;;  %s6208_s4 = inlined_call_operand.vmem [shape: bf16[256,256], index: 4, kind: input, shape index: {}]   ;;  %s6209_s5 = inlined_call_operand.vmem [shape: f32[1,256], index: 5, kind: input, shape index: {}]   ;;  %s6210_s6 = inlined_call_operand.vmem [shape: f32[1,256], index: 6, kind: input, shape index: {}]   ;;  %s6211_s7 = inlined_call_operand.vmem [shape: f32[1,256], index: 7, kind: input, shape index: {}]   ;;  %s6212_s8 = inlined_call_operand.vmem [shape: bf16[256,1024], index: 8, kind: input, shape index: {}]   ;;  %s6213_s9 = inlined_call_operand.vmem [shape: f32[1,1024], index: 9, kind: input, shape index: {}]   ;;  %s6214_s10 = inlined_call_operand.vmem [shape: bf16[1024,256], index: 10, kind: input, shape index: {}]   ;;  %s6215_s11 = inlined_call_operand.vmem [shape: f32[1,256], index: 11, kind: input, shape index: {}]   ;;  %s6216_s12 = inlined_call_operand.vmem [shape: f32[1,256], index: 12, kind: input, shape index: {}]   ;;  %s6217_s13 = inlined_call_operand.vmem [shape: f32[1,256], index: 13, kind: input, shape index: {}]   ;;  %s6218_s14 = inlined_call_operand.vmem [shape: f32[2,8,256], index: 14, kind: output, shape index: {}]  }
   0x1 LB: > { %s3882_s30 = sadd.s32 4294967295, %s4743_s29   ;;  %p3886_p0 = scmp.ge.s32.totalorder %s4743_s29, 1  ;;  %s4743_s29 = sphi %s4823_s29, %s24_s29  }
   0x2   : > { %p420_p1 = scmp.lt.s32.totalorder %s4743_s29, 3 }
   0x4   : > { %p421_p2 = pnand %p3886_p0, %p420_p1 }
   0x5   : > { %v4325_v0 = vld [vmem:[%s6206_s2 + $0xc] ss:$24 sps:$4 sm:$0xff] (!%p421_p2)   ;;  %v4327_v1 = vld [vmem:[%s6206_s2 + $0x8] ss:$24 sps:$4 sm:$0xff] (!%p421_p2)   ;;  %v4328_v2 = vld [vmem:[%s6206_s2 + $0x3c] ss:$24 sps:$4 sm:$0xff] (!%p421_p2)  }
   0x6   : > { %424 = sbr.rel (%p421_p2) target bundleno = 2958 (0xb8e), region = 76  ;;  %1137 = vmatprep.subr.bf16.mxu1 (!%p421_p2), %v4325_v0  ;;  %v4330_v3 = vld [vmem:[%s6206_s2 + $0x4] ss:$24 sps:$4 sm:$0xff] (!%p421_p2)   ;;  %v4332_v4 = vld [vmem:[%s6206_s2 + $0x38] ss:$24 sps:$4 sm:$0xff] (!%p421_p2)   ;;  %p469_p3 = scmp.lt.s32.totalorder (!%p421_p2), %s3882_s30, 1 }
   0x7   : > { %1138 = vmatpush1.bf16.msra.mxu1 (!%p421_p2), %v4327_v1  ;;  %v4333_v5 = vld [vmem:[%s6206_s2] ss:$24 sps:$4 sm:$0xff] (!%p421_p2)   ;;  %v4334_v6 = vld [vmem:[%s6206_s2 + $0x6c] ss:$24 sps:$4 sm:$0xff] (!%p421_p2)   ;;  %1096 = vmatprep.subr.bf16.mxu0 (!%p421_p2), %v4330_v3  ;;  %v4339_v8 = vld [vmem:[%s6206_s2 + $0x30] ss:$24 sps:$4 sm:$0xff] (!%p421_p2)  }
   0x8   : > { %1139 = vmatprep.subr.bf16.mxu1 (!%p421_p2), %v4328_v2  ;;  %v4336_v7 = vld [vmem:[%s6206_s2 + $0x34] ss:$24 sps:$4 sm:$0xff] (!%p421_p2)   ;;  %1097 = vmatpush1.bf16.msra.mxu0 (!%p421_p2), %v4333_v5  ;;  %v4338_v9 = vld [vmem:[%s6206_s2 + $0x68] ss:$24 sps:$4 sm:$0xff] (!%p421_p2)   ;;  %v4342_v11 = vld [vmem:[%s6206_s2 + $0x64] ss:$24 sps:$4 sm:$0xff] (!%p421_p2)   ;;  %v586_v5 = vlaneseq (!%p421_p2) }
   0x9   : > { %1098 = vmatprep.subr.bf16.mxu0 (!%p421_p2), %v4336_v7  ;;  %v4340_v10 = vld [vmem:[%s6206_s2 + $0x9c] ss:$24 sps:$4 sm:$0xff] (!%p421_p2)   ;;  %v4345_v12 = vld [vmem:[%s6206_s2 + $0x60] ss:$24 sps:$4 sm:$0xff] (!%p421_p2)   ;;  %v4346_v15 = vld [vmem:[%s6206_s2 + $0xcc] ss:$24 sps:$4 sm:$0xff] (!%p421_p2)  }
   0xa   : > { %v4344_v13 = vld [vmem:[%s6206_s2 + $0x98] ss:$24 sps:$4 sm:$0xff] (!%p421_p2)   ;;  %v4348_v14 = vld [vmem:[%s6206_s2 + $0x94] ss:$24 sps:$4 sm:$0xff] (!%p421_p2)   ;;  %v4350_v16 = vld [vmem:[%s6206_s2 + $0xc8] ss:$24 sps:$4 sm:$0xff] (!%p421_p2)  }
   0xb   : > { %1140 = vmatpush1.bf16.msra.mxu1 (!%p421_p2), %v4332_v4  ;;  %v4351_v17 = vld [vmem:[%s6206_s2 + $0x90] ss:$24 sps:$4 sm:$0xff] (!%p421_p2)   ;;  %v4354_v18 = vld [vmem:[%s6206_s2 + $0xc4] ss:$24 sps:$4 sm:$0xff] (!%p421_p2)   ;;  %v4357_v20 = vld [vmem:[%s6206_s2 + $0xc0] ss:$24 sps:$4 sm:$0xff] (!%p421_p2)  }
   0xc   : > { %1141 = vmatprep.subr.bf16.mxu1 (!%p421_p2), %v4334_v6  ;;  %1099 = vmatpush1.bf16.msra.mxu0 (!%p421_p2), %v4339_v8  ;;  %v4352_v19 = vld [vmem:[%s6206_s2 + $0xfc] ss:$24 sps:$4 sm:$0xff] (!%p421_p2)   ;;  %v4356_v21 = vld [vmem:[%s6206_s2 + $0xf8] ss:$24 sps:$4 sm:$0xff] (!%p421_p2)   ;;  %v4358_v23 = vld [vmem:[%s6206_s2 + $0x12c] ss:$24 sps:$4 sm:$0xff] (!%p421_p2)  }
   0xd   : > { %1100 = vmatprep.subr.bf16.mxu0 %v4342_v11  ;;  %v4360_v22 = vld [vmem:[%s6206_s2 + $0xf4] ss:$24 sps:$4 sm:$0xff]   ;;  %v4362_v24 = vld [vmem:[%s6206_s2 + $0x128] ss:$24 sps:$4 sm:$0xff]   ;;  %v4366_v26 = vld [vmem:[%s6206_s2 + $0x124] ss:$24 sps:$4 sm:$0xff]  }
   0xe   : > { %v4363_v25 = vld [vmem:[%s6206_s2 + $0xf0] ss:$24 sps:$4 sm:$0xff]   ;;  %v4364_v27 = vld [vmem:[%s6206_s2 + $0x15c] ss:$24 sps:$4 sm:$0xff]   ;;  %v4369_v28 = vld [vmem:[%s6206_s2 + $0x120] ss:$24 sps:$4 sm:$0xff]  }
   0xf   : > { %1142 = vmatpush1.bf16.msra.mxu1 %v4338_v9  ;;  %v4368_v29 = vld [vmem:[%s6206_s2 + $0x158] ss:$24 sps:$4 sm:$0xff]   ;;  %v4372_v30 = vld [vmem:[%s6206_s2 + $0x154] ss:$24 sps:$4 sm:$0xff]   ;;  %v4374_v32 = vld [vmem:[%s6206_s2 + $0x188] ss:$24 sps:$4 sm:$0xff]  }
  0x10   : > { %1143 = vmatprep.subr.bf16.mxu1 %v4340_v10  ;;  %1101 = vmatpush1.bf16.msra.mxu0 %v4345_v12  ;;  %v4370_v31 = vld [vmem:[%s6206_s2 + $0x18c] ss:$24 sps:$4 sm:$0xff]   ;;  %v4375_v33 = vld [vmem:[%s6206_s2 + $0x150] ss:$24 sps:$4 sm:$0xff]   ;;  %s6220_s30 = smov (!%p469_p3, %s3882_s30), 1  ;;  %v4745_v4 = vmov 0.0  }
  0x11   : > { %1102 = vmatprep.subr.bf16.mxu0 %v4348_v14  ;;  %v4378_v34 = vld [vmem:[%s6206_s2 + $0x184] ss:$24 sps:$4 sm:$0xff]   ;;  %v4381_v36 = vld [vmem:[%s6206_s2 + $0x180] ss:$24 sps:$4 sm:$0xff]   ;;  %v4384_v38 = vld [vmem:[%s6206_s2 + $0x1b4] ss:$24 sps:$4 sm:$0xff]   ;;  %s476_s16 = scalar_lea.vmem %s6205_s1, %s6220_s30 }
  0x12   : > { %v4376_v35 = vld [vmem:[%s6206_s2 + $0x1bc] ss:$24 sps:$4 sm:$0xff]   ;;  %v4380_v37 = vld [vmem:[%s6206_s2 + $0x1b8] ss:$24 sps:$4 sm:$0xff]   ;;  %s4280_s23 = sshll.u32 %s6220_s30, 4  ;;  %vm4746_vm0 = vmmov 0  }
  0x13   : > { %1144 = vmatpush1.bf16.msra.mxu1 %v4344_v13  ;;  %v4382_v39 = vld [vmem:[%s6206_s2 + $0x1ec] ss:$24 sps:$4 sm:$0xff]   ;;  %v4386_v40 = vld [vmem:[%s6206_s2 + $0x1e8] ss:$24 sps:$4 sm:$0xff]   ;;  %s4969_s18 = scalar_lea.vmem %s6204_s0, %s4280_s23  ;;  %v4388_v43 = vld [vmem:[%s6206_s2 + $0x21c] ss:$24 sps:$4 sm:$0xff]   ;;  %s481_s26 = scalar_lea.vmem %s6218_s14, %s4280_s23 }
  0x14   : > { %1145 = vmatprep.subr.bf16.mxu1 %v4346_v15  ;;  %1103 = vmatpush1.bf16.msra.mxu0 %v4351_v17  ;;  %v4387_v41 = vld [vmem:[%s6206_s2 + $0x1b0] ss:$24 sps:$4 sm:$0xff]   ;;  %v4390_v42 = vld [vmem:[%s6206_s2 + $0x1e4] ss:$24 sps:$4 sm:$0xff]   ;;  %v4393_v46 = vld [vmem:[%s6206_s2 + $0x1e0] ss:$24 sps:$4 sm:$0xff]  }
  0x15   : > { %1104 = vmatprep.subr.bf16.mxu0 %v4354_v18  ;;  %v4392_v44 = vld [vmem:[%s6206_s2 + $0x218] ss:$24 sps:$4 sm:$0xff]   ;;  %v4981_v45 = vld [vmem:[%s4969_s18 + $0x8] sm:$0xff]  ;;  %v4402_v52 = vld [vmem:[%s6206_s2 + $0x244] ss:$24 sps:$4 sm:$0xff]   ;;  %v5054_v6 = vshrl.u32 %v586_v5, 7 }
  0x16   : > { %v487_v47 = vpack.c.bf16 %v4981_v45, %v4981_v45  ;;  %v4394_v48 = vld [vmem:[%s6206_s2 + $0x24c] ss:$24 sps:$4 sm:$0xff]   ;;  %v4399_v50 = vld [vmem:[%s6206_s2 + $0x210] ss:$24 sps:$4 sm:$0xff]   ;;  %v4400_v53 = vld [vmem:[%s6206_s2 + $0x27c] ss:$24 sps:$4 sm:$0xff]  }
  0x17   : > { %1146 = vmatpush1.bf16.msra.mxu1 %v4350_v16  ;;  %v4396_v49 = vld [vmem:[%s6206_s2 + $0x214] ss:$24 sps:$4 sm:$0xff]   ;;  %v4398_v51 = vld [vmem:[%s6206_s2 + $0x248] ss:$24 sps:$4 sm:$0xff]   ;;  %v4404_v55 = vld [vmem:[%s6206_s2 + $0x278] ss:$24 sps:$4 sm:$0xff]  }
  0x18   : > { %1147 = vmatprep.subr.bf16.mxu1 %v4352_v19  ;;  %1105 = vmatpush1.bf16.msra.mxu0 %v4357_v20  ;;  %v4405_v54 = vld [vmem:[%s6206_s2 + $0x240] ss:$24 sps:$4 sm:$0xff]   ;;  %v4408_v56 = vld [vmem:[%s6206_s2 + $0x274] ss:$24 sps:$4 sm:$0xff]   ;;  %v4411_v58 = vld [vmem:[%s6206_s2 + $0x270] ss:$24 sps:$4 sm:$0xff]  }
  0x19   : > { %1106 = vmatprep.subr.bf16.mxu0 %v4360_v22  ;;  %1169 = vmatprep.mubr.bf16.mxu1 %v487_v47  ;;  %v4406_v57 = vld [vmem:[%s6206_s2 + $0x2ac] ss:$24 sps:$4 sm:$0xff]   ;;  %v4410_v59 = vld [vmem:[%s6206_s2 + $0x2a8] ss:$24 sps:$4 sm:$0xff]   ;;  %v4412_v61 = vld [vmem:[%s6206_s2 + $0x2dc] ss:$24 sps:$4 sm:$0xff]  }
  0x1a   : > { %1128 = vmatprep.mubr.bf16.mxu0 %v487_v47  ;;  %v4414_v60 = vld [vmem:[%s6206_s2 + $0x2a4] ss:$24 sps:$4 sm:$0xff]   ;;  %v4417_v62 = vld [vmem:[%s6206_s2 + $0x2a0] ss:$24 sps:$4 sm:$0xff]   ;;  %v4418_v1 = vld [vmem:[%s6206_s2 + $0x2d4] ss:$24 sps:$4 sm:$0xff]  }
  0x1b   : > { %1148 = vmatpush1.bf16.msra.mxu1 %v4356_v21  ;;  %v4416_v63 = vld [vmem:[%s6206_s2 + $0x2d8] ss:$24 sps:$4 sm:$0xff]   ;;  %v5037_v0 = vld [vmem:[%s4969_s18] sm:$0xff]  ;;  %v596_v7 = vsub.s32 2, %v5054_v6  ;;  %v5063_v9 = vsub.s32 0, %v5054_v6  ;;  %vm1270_vm1 = vcmask 64512  }
  0x1c   : > { %1149 = vmatprep.subr.bf16.mxu1 %v4358_v23  ;;  %1107 = vmatpush1.bf16.msra.mxu0 %v4363_v25  ;;  %v4420_v2 = vld [vmem:[%s6206_s2 + $0x2d0] ss:$24 sps:$4 sm:$0xff]   ;;  %v5047_v3 = vpack.c.bf16 %v5037_v0, %v5037_v0  ;;  %v5060_v8 = vld [vmem:[%s6207_s3] sm:$0x3f]  ;;  %v4423_v25 = vld [vmem:[%s6206_s2 + $0x14] ss:$24 sps:$4 sm:$0xff]  }
  0x1d   : > { %1108 = vmatprep.subr.bf16.mxu0 %v4366_v26  ;;  %v597_v10 = vrot.slane %v5060_v8, %v596_v7  ;;  %v589_v12 = vrot.slane %v5060_v8, %v5063_v9  ;;  %v4426_v26 = vld [vmem:[%s6206_s2 + $0x44] ss:$24 sps:$4 sm:$0xff]   ;;  %vm1286_vm2 = vcmask 1043456  }
  0x1f   : > { %1150 = vmatpush1.bf16.msra.mxu1 %v4362_v24  ;;  %v4421_v24 = vld [vmem:[%s6206_s2 + $0x10] ss:$24 sps:$4 sm:$0xff]  }
  0x20   : > { %1151 = vmatprep.subr.bf16.mxu1 %v4364_v27  ;;  %1109 = vmatpush1.bf16.msra.mxu0 %v4369_v28  ;;  %v4424_v27 = vld [vmem:[%s6206_s2 + $0x40] ss:$24 sps:$4 sm:$0xff]   ;;  %v4429_v28 = vld [vmem:[%s6206_s2 + $0x74] ss:$24 sps:$4 sm:$0xff]  }
  0x21   : > { %1110 = vmatprep.subr.bf16.mxu0 %v4372_v30  ;;  %v4432_v30 = vld [vmem:[%s6206_s2 + $0xa4] ss:$24 sps:$4 sm:$0xff]  }
  0x23   : > { %1152 = vmatpush1.bf16.msra.mxu1 %v4368_v29  ;;  %v4427_v29 = vld [vmem:[%s6206_s2 + $0x70] ss:$24 sps:$4 sm:$0xff]  }
  0x24   : > { %1153 = vmatprep.subr.bf16.mxu1 %v4370_v31  ;;  %1111 = vmatpush1.bf16.msra.mxu0 %v4375_v33  ;;  %v4430_v31 = vld [vmem:[%s6206_s2 + $0xa0] ss:$24 sps:$4 sm:$0xff]   ;;  %v4433_v33 = vld [vmem:[%s6206_s2 + $0xd0] ss:$24 sps:$4 sm:$0xff]  }
  0x25   : > { %1112 = vmatprep.subr.bf16.mxu0 %v4378_v34  ;;  %v4438_v34 = vld [vmem:[%s6206_s2 + $0x104] ss:$24 sps:$4 sm:$0xff]  }
  0x27   : > { %1154 = vmatpush1.bf16.msra.mxu1 %v4374_v32  ;;  %v4435_v32 = vld [vmem:[%s6206_s2 + $0xd4] ss:$24 sps:$4 sm:$0xff]  }
  0x28   : > { %1155 = vmatprep.subr.bf16.mxu1 %v4376_v35  ;;  %1113 = vmatpush1.bf16.msra.mxu0 %v4381_v36  ;;  %v4436_v35 = vld [vmem:[%s6206_s2 + $0x100] ss:$24 sps:$4 sm:$0xff]   ;;  %v4441_v36 = vld [vmem:[%s6206_s2 + $0x134] ss:$24 sps:$4 sm:$0xff]  }
  0x29   : > { %1114 = vmatprep.subr.bf16.mxu0 %v4384_v38  ;;  %v4444_v38 = vld [vmem:[%s6206_s2 + $0x164] ss:$24 sps:$4 sm:$0xff]  }
  0x2b   : > { %1156 = vmatpush1.bf16.msra.mxu1 %v4380_v37  ;;  %v4439_v37 = vld [vmem:[%s6206_s2 + $0x130] ss:$24 sps:$4 sm:$0xff]  }
  0x2c   : > { %1157 = vmatprep.subr.bf16.mxu1 %v4382_v39  ;;  %1115 = vmatpush1.bf16.msra.mxu0 %v4387_v41  ;;  %v4442_v39 = vld [vmem:[%s6206_s2 + $0x160] ss:$24 sps:$4 sm:$0xff]   ;;  %v4445_v41 = vld [vmem:[%s6206_s2 + $0x190] ss:$24 sps:$4 sm:$0xff]  }
  0x2d   : > { %1116 = vmatprep.subr.bf16.mxu0 %v4390_v42  ;;  %v4450_v42 = vld [vmem:[%s6206_s2 + $0x1c4] ss:$24 sps:$4 sm:$0xff]  }
  0x2f   : > { %1158 = vmatpush1.bf16.msra.mxu1 %v4386_v40  ;;  %v4447_v40 = vld [vmem:[%s6206_s2 + $0x194] ss:$24 sps:$4 sm:$0xff]  }
  0x30   : > { %1159 = vmatprep.subr.bf16.mxu1 %v4388_v43  ;;  %1117 = vmatpush1.bf16.msra.mxu0 %v4393_v46  ;;  %v4448_v43 = vld [vmem:[%s6206_s2 + $0x1c0] ss:$24 sps:$4 sm:$0xff]   ;;  %v4451_v46 = vld [vmem:[%s6206_s2 + $0x1f0] ss:$24 sps:$4 sm:$0xff]  }
  0x31   : > { %1118 = vmatprep.subr.bf16.mxu0 %v4396_v49  ;;  %v4459_v49 = vld [vmem:[%s6206_s2 + $0x254] ss:$24 sps:$4 sm:$0xff]  }
  0x33   : > { %1160 = vmatpush1.bf16.msra.mxu1 %v4392_v44  ;;  %v4453_v44 = vld [vmem:[%s6206_s2 + $0x1f4] ss:$24 sps:$4 sm:$0xff]  }
  0x34   : > { %1161 = vmatprep.subr.bf16.mxu1 %v4394_v48  ;;  %1119 = vmatpush1.bf16.msra.mxu0 %v4399_v50  ;;  %v4454_v48 = vld [vmem:[%s6206_s2 + $0x220] ss:$24 sps:$4 sm:$0xff]   ;;  %v4457_v50 = vld [vmem:[%s6206_s2 + $0x250] ss:$24 sps:$4 sm:$0xff]  }
  0x35   : > { %1120 = vmatprep.subr.bf16.mxu0 %v4402_v52  ;;  %v4460_v52 = vld [vmem:[%s6206_s2 + $0x280] ss:$24 sps:$4 sm:$0xff]  }
  0x37   : > { %1162 = vmatpush1.bf16.msra.mxu1 %v4398_v51  ;;  %v4462_v51 = vld [vmem:[%s6206_s2 + $0x284] ss:$24 sps:$4 sm:$0xff]  }
  0x38   : > { %1163 = vmatprep.subr.bf16.mxu1 %v4400_v53  ;;  %1121 = vmatpush1.bf16.msra.mxu0 %v4405_v54  ;;  %v4465_v53 = vld [vmem:[%s6206_s2 + $0x2b4] ss:$24 sps:$4 sm:$0xff]   ;;  %v4463_v54 = vld [vmem:[%s6206_s2 + $0x2b0] ss:$24 sps:$4 sm:$0xff]  }
  0x39   : > { %1122 = vmatprep.subr.bf16.mxu0 %v4408_v56  ;;  %v4466_v56 = vld [vmem:[%s6206_s2 + $0x2e0] ss:$24 sps:$4 sm:$0xff]  }
  0x3b   : > { %1164 = vmatpush1.bf16.msra.mxu1 %v4404_v55  ;;  %v4468_v55 = vld [vmem:[%s6206_s2 + $0x2e4] ss:$24 sps:$4 sm:$0xff]  }
  0x3c   : > { %1165 = vmatprep.subr.bf16.mxu1 %v4406_v57  ;;  %1123 = vmatpush1.bf16.msra.mxu0 %v4411_v58  ;;  %v5178_v58 = vld [vmem:[%s476_s16] ss:$0 sm:$0xff] }
  0x3d   : > { %1124 = vmatprep.subr.bf16.mxu0 %v4414_v60 }
  0x3f   : > { %1166 = vmatpush1.bf16.msra.mxu1 %v4410_v59 }
  0x40   : > { %1167 = vmatprep.subr.bf16.mxu1 %v4412_v61  ;;  %1125 = vmatpush1.bf16.msra.mxu0 %v4417_v62 }
  0x41   : > { %1126 = vmatprep.subr.bf16.mxu0 %v4418_v1 }
  0x43   : > { %1168 = vmatpush1.bf16.msra.mxu1 %v4416_v63 }
  0x44   : > { %1127 = vmatpush1.bf16.msra.mxu0 %v4420_v2  ;;  %4290 = vmatprep.subr.bf16.mxu1 %v4745_v4 }
  0x45   : > { %1178 = vmatprep.subr.bf16.mxu0 %v4423_v25 }
  0x46   : > { %1170 = vmatmul.mubr.bf16.vlgmr.msra.gmra.mrb[0].mxu1 %v5047_v3 }
  0x47   : > { %1129 = vmatmul.mubr.bf16.vlgmr.msra.gmra.mrb[0].mxu0 %v5047_v3  ;;  %4292 = vmatprep.mubr.msk.bf16.mxu1 %vm4746_vm0, %v4745_v4 }
  0x48   : > { %1210 = vmatprep.mubr.bf16.mxu0 %v487_v47  ;;  %1179 = vmatpush1.bf16.msra.mxu0 %v4421_v24  ;;  %v4456_v47 = vld [vmem:[%s6206_s2 + $0x224] ss:$24 sps:$4 sm:$0xff]  }
  0x49   : > { %1180 = vmatprep.subr.bf16.mxu0 %v4426_v26 }
  0x4c   : > { %1181 = vmatpush1.bf16.msra.mxu0 %v4424_v27 }
  0x4d   : > { %1182 = vmatprep.subr.bf16.mxu0 %v4429_v28  ;;  %v4469_v28 = vld [vmem:[%s6208_s4] ss:$8 sps:$4 sm:$0xff]  }
  0x50   : > { %1183 = vmatpush1.bf16.msra.mxu0 %v4427_v29  ;;  %v4471_v29 = vld [vmem:[%s6208_s4 + $0x4] ss:$8 sps:$4 sm:$0xff]  }
  0x51   : > { %1184 = vmatprep.subr.bf16.mxu0 %v4432_v30  ;;  %v4474_v30 = vld [vmem:[%s6208_s4 + $0x14] ss:$8 sps:$4 sm:$0xff]  }
  0x54   : > { %1185 = vmatpush1.bf16.msra.mxu0 %v4430_v31  ;;  %v4472_v31 = vld [vmem:[%s6208_s4 + $0x10] ss:$8 sps:$4 sm:$0xff]  }
  0x55   : > { %1186 = vmatprep.subr.bf16.mxu0 %v4435_v32  ;;  %v4477_v32 = vld [vmem:[%s6208_s4 + $0x24] ss:$8 sps:$4 sm:$0xff]  }
  0x58   : > { %1187 = vmatpush1.bf16.msra.mxu0 %v4433_v33  ;;  %v4475_v33 = vld [vmem:[%s6208_s4 + $0x20] ss:$8 sps:$4 sm:$0xff]  }
  0x59   : > { %1188 = vmatprep.subr.bf16.mxu0 %v4438_v34  ;;  %v4480_v34 = vld [vmem:[%s6208_s4 + $0x34] ss:$8 sps:$4 sm:$0xff]  }
  0x5c   : > { %1189 = vmatpush1.bf16.msra.mxu0 %v4436_v35  ;;  %v4478_v35 = vld [vmem:[%s6208_s4 + $0x30] ss:$8 sps:$4 sm:$0xff]  }
  0x5d   : > { %1190 = vmatprep.subr.bf16.mxu0 %v4441_v36  ;;  %v4483_v36 = vld [vmem:[%s6208_s4 + $0x44] ss:$8 sps:$4 sm:$0xff]  }
  0x60   : > { %1191 = vmatpush1.bf16.msra.mxu0 %v4439_v37  ;;  %v4481_v37 = vld [vmem:[%s6208_s4 + $0x40] ss:$8 sps:$4 sm:$0xff]  }
  0x61   : > { %1192 = vmatprep.subr.bf16.mxu0 %v4444_v38  ;;  %v4486_v38 = vld [vmem:[%s6208_s4 + $0x54] ss:$8 sps:$4 sm:$0xff]  }
  0x64   : > { %1193 = vmatpush1.bf16.msra.mxu0 %v4442_v39  ;;  %v4484_v39 = vld [vmem:[%s6208_s4 + $0x50] ss:$8 sps:$4 sm:$0xff]  }
  0x65   : > { %1194 = vmatprep.subr.bf16.mxu0 %v4447_v40  ;;  %v4489_v40 = vld [vmem:[%s6208_s4 + $0x64] ss:$8 sps:$4 sm:$0xff]  }
  0x68   : > { %1195 = vmatpush1.bf16.msra.mxu0 %v4445_v41  ;;  %v4487_v41 = vld [vmem:[%s6208_s4 + $0x60] ss:$8 sps:$4 sm:$0xff]  }
  0x69   : > { %1196 = vmatprep.subr.bf16.mxu0 %v4450_v42  ;;  %v4492_v42 = vld [vmem:[%s6208_s4 + $0x74] ss:$8 sps:$4 sm:$0xff]  }
  0x6c   : > { %1197 = vmatpush1.bf16.msra.mxu0 %v4448_v43  ;;  %v4490_v43 = vld [vmem:[%s6208_s4 + $0x70] ss:$8 sps:$4 sm:$0xff]  }
  0x6d   : > { %1198 = vmatprep.subr.bf16.mxu0 %v4453_v44 }
  0x70   : > { %1199 = vmatpush1.bf16.msra.mxu0 %v4451_v46  ;;  %v600_v46 = vsub.s32 3, %v5054_v6 }
  0x71   : > { %1200 = vmatprep.subr.bf16.mxu0 %v4456_v47 }
  0x72   : > { %v601_v47 = vrot.slane %v5060_v8, %v600_v46 }
  0x74   : > { %1201 = vmatpush1.bf16.msra.mxu0 %v4454_v48  ;;  %v5245_v48 = vsub.s32 1, %v5054_v6 }
  0x75   : > { %1202 = vmatprep.subr.bf16.mxu0 %v4459_v49 }
  0x78   : > { %1203 = vmatpush1.bf16.msra.mxu0 %v4457_v50 }
  0x79   : > { %1204 = vmatprep.subr.bf16.mxu0 %v4462_v51 }
  0x7c   : > { %1205 = vmatpush1.bf16.msra.mxu0 %v4460_v52  ;;  %v593_v52 = vrot.slane %v5060_v8, %v5245_v48 }
  0x7d   : > { %1206 = vmatprep.subr.bf16.mxu0 %v4465_v53 }
  0x80   : > { %1207 = vmatpush1.bf16.msra.mxu0 %v4463_v54 }
  0x81   : > { %1208 = vmatprep.subr.bf16.mxu0 %v4468_v55 }
  0x84   : > { %1209 = vmatpush1.bf16.msra.mxu0 %v4466_v56 }
  0x85   : > { %1668 = vmatprep.subr.bf16.mxu0 %v4471_v29  ;;  %v4501_v29 = vld [vmem:[%s6208_s4 + $0xa4] ss:$8 sps:$4 sm:$0xff]  }
  0x87   : > { %1211 = vmatmul.mubr.bf16.vlgmr.msra.gmra.mrb[4].mxu0 %v5047_v3  ;;  %v604_v3 = vsub.s32 4, %v5054_v6 }
  0x88   : > { %1669 = vmatpush1.bf16.msra.mxu0 %v4469_v28  ;;  %v4496_v28 = vld [vmem:[%s6208_s4 + $0x90] ss:$8 sps:$4 sm:$0xff]  }
  0x89   : > { %1670 = vmatprep.subr.bf16.mxu0 %v4474_v30  ;;  %v4499_v30 = vld [vmem:[%s6208_s4 + $0xa0] ss:$8 sps:$4 sm:$0xff]  }
  0x8c   : > { %1671 = vmatpush1.bf16.msra.mxu0 %v4472_v31  ;;  %v4504_v31 = vld [vmem:[%s6208_s4 + $0xb4] ss:$8 sps:$4 sm:$0xff]  }
  0x8d   : > { %1672 = vmatprep.subr.bf16.mxu0 %v4477_v32  ;;  %v4502_v32 = vld [vmem:[%s6208_s4 + $0xb0] ss:$8 sps:$4 sm:$0xff]  }
  0x90   : > { %1673 = vmatpush1.bf16.msra.mxu0 %v4475_v33  ;;  %v4507_v33 = vld [vmem:[%s6208_s4 + $0xc4] ss:$8 sps:$4 sm:$0xff]  }
  0x91   : > { %1674 = vmatprep.subr.bf16.mxu0 %v4480_v34  ;;  %v4505_v34 = vld [vmem:[%s6208_s4 + $0xc0] ss:$8 sps:$4 sm:$0xff]  }
  0x94   : > { %1675 = vmatpush1.bf16.msra.mxu0 %v4478_v35  ;;  %v4510_v35 = vld [vmem:[%s6208_s4 + $0xd4] ss:$8 sps:$4 sm:$0xff]  }
  0x95   : > { %1676 = vmatprep.subr.bf16.mxu0 %v4483_v36  ;;  %v4508_v36 = vld [vmem:[%s6208_s4 + $0xd0] ss:$8 sps:$4 sm:$0xff]  }
  0x98   : > { %1677 = vmatpush1.bf16.msra.mxu0 %v4481_v37  ;;  %v4513_v37 = vld [vmem:[%s6208_s4 + $0xe4] ss:$8 sps:$4 sm:$0xff]  }
  0x99   : > { %1678 = vmatprep.subr.bf16.mxu0 %v4486_v38  ;;  %v4511_v38 = vld [vmem:[%s6208_s4 + $0xe0] ss:$8 sps:$4 sm:$0xff]  }
  0x9c   : > { %1679 = vmatpush1.bf16.msra.mxu0 %v4484_v39  ;;  %v4516_v39 = vld [vmem:[%s6208_s4 + $0xf4] ss:$8 sps:$4 sm:$0xff]  }
  0x9d   : > { %1680 = vmatprep.subr.bf16.mxu0 %v4489_v40  ;;  %v4514_v40 = vld [vmem:[%s6208_s4 + $0xf0] ss:$8 sps:$4 sm:$0xff]  }
  0xa0   : > { %1681 = vmatpush1.bf16.msra.mxu0 %v4487_v41 }
  0xa1   : > { %1682 = vmatprep.subr.bf16.mxu0 %v4492_v42 }
  0xa4   : > { %1683 = vmatpush1.bf16.msra.mxu0 %v4490_v43 }
 0x119   : > { %v1171_v11 = vpop.f32.mrb[0].mxu1 }
 0x11a   : > { %v1172_v13 = vadd.f32 %v1171_v11, %v597_v10  ;;  %v5070_v14 = vpop.f32.mrb[1].mxu1  ;;  %v1130_v18 = vpop.f32.mrb[0].mxu0  ;;  %v608_v10 = vsub.s32 5, %v5054_v6 }
 0x11b   : > { %v1175_v15 = vpop.f32.mrb[2].mxu1  ;;  %v1131_v19 = vadd.f32 %v1130_v18, %v589_v12  ;;  %v5072_v20 = vpop.f32.mrb[1].mxu0  ;;  %v605_v12 = vrot.slane %v5060_v8, %v604_v3  ;;  %v1174_v50 = vadd.f32 %v5070_v14, %v601_v47  ;;  %v4747_v14 = vmov 0  }
 0x11c   : > { %v1220_v16 = vpack.c.bf16 %v1172_v13, %v1172_v13  ;;  %v1176_v17 = vpop.f32.mrb[3].mxu1  ;;  %v1134_v21 = vpop.f32.mrb[2].mxu0  ;;  %v609_v13 = vrot.slane %v5060_v8, %v608_v10  ;;  %v1133_v55 = vadd.f32 %v5072_v20, %v593_v52  ;;  %1700 = vmatprep.mubr.bf16.mxu0 %v4747_v14 }
 0x11d   : > { %v1135_v22 = vpop.f32.mrb[3].mxu0  ;;  %v1219_v23 = vpack.c.bf16 %v1131_v19, %v1131_v19  ;;  %v1348_v54 = vpack.c.bf16 %v1174_v50, %v1174_v50 }
 0x11e   : > { %4291 = vmatpush3.bf16.xpose.msra.mxu1 %v1220_v16  ;;  %v1347_v56 = vpack.c.bf16 %v1133_v55, %v1133_v55 }
 0x11f   : > { %4296 = vmatprep.subr.bf16.mxu1 %v4745_v4 }
 0x125   : > { %4293 = vmatmul.mubr.bf16.vlgmr.msra.gmra.mrb[4].mxu1 %v1219_v23 }
 0x126   : > { %4298 = vmatprep.mubr.msk.bf16.mxu1 %vm4746_vm0, %v4745_v4 }
 0x15a   : > { %v1212_v15 = vpop.f32.mrb[4].mxu0 }
 0x15b   : > { %v1213_v16 = vadd.f32 %v1212_v15, %v605_v12  ;;  %v1214_v17 = vpop.f32.mrb[5].mxu0 }
 0x15c   : > { %v1215_v18 = vadd.f32 %v1214_v17, %v609_v13  ;;  %v1216_v19 = vpop.f32.mrb[6].mxu0  ;;  %v4495_v17 = vld [vmem:[%s6208_s4 + $0x84] ss:$8 sps:$4 sm:$0xff]  }
 0x15d   : > { %v1221_v21 = vpack.c.bf16 %v1213_v16, %v1213_v16  ;;  %v1217_v22 = vpop.f32.mrb[7].mxu0 }
 0x15e   : > { %v1349_v23 = vpack.c.bf16 %v1215_v18, %v1215_v18 }
 0x15f   : > { %v1288_v24 = vsel %vm1286_vm2, %v1221_v21, 0 }
 0x160   : > { %v1408_v25 = vsel %vm1286_vm2, %v1349_v23, 0  ;;  %4297 = vmatpush3.bf16.msra.mxu1 %v1288_v24 }
 0x161   : > { %4302 = vmatprep.subr.bf16.mxu1 %v4745_v4 }
 0x1f8   : > { %v1256_v57 = vpop.f32.mrb[4].mxu1 }
 0x1f9   : > { %v1262_v59 = vmul.f32 0.088388346, %v1256_v57  ;;  %v4294_v60 = vpop.f32.mrb[5].mxu1 }
 0x1fa   : > { %v1259_v61 = vpop.f32.mrb[6].mxu1 }
 0x1fb   : > { %v4295_v62 = vpop.f32.mrb[7].mxu1  ;;  %v1269_v63 = vadd.f32 %v5178_v58, %v1262_v59 }
 0x1fd   : > { %v1271_v1 = vsel %vm1270_vm1, %v1269_v63, -inf }
 0x1fe   : > { %1272 = vmax.xlane.f32.xlu0 %v1271_v1 }
 0x28b   : > { %v1273_v2 = vpop.xlane.xlu0 %1272 }
 0x28c   : > { %v1274_v5 = vsub.f32 %v1269_v63, %v1273_v2 }
 0x28e   : > { %v1275_v11 = vmul.f32 1.442695, %v1274_v5 }
 0x290   : > { %4709 = vpow2.f32 %v1275_v11 }
 0x29a   : > { %v4710_v26 = vpop.eup %4709 }
 0x29b   : > { %v1277_v27 = vsel %vm1270_vm1, %v4710_v26, 0.0 }
 0x29c   : > { %1278 = vadd.xlane.f32.xlu0 %v1277_v27  ;;  %v4498_v27 = vld [vmem:[%s6208_s4 + $0x94] ss:$8 sps:$4 sm:$0xff]  }
 0x329   : > { %v1279_v44 = vpop.xlane.xlu0 %1278 }
 0x32a   : > { %4711 = vrcp.f32 %v1279_v44 }
 0x334   : > { %v4712_v49 = vpop.eup %4711 }
 0x335   : > { %v1281_v51 = vmul.f32 %v4712_v49, %v4710_v26  ;;  %v1709_v49 = vld [vmem:[%s6209_s5] sm:$0x3] }
 0x336   : > { %v1714_v50 = vrot.slane %v1709_v49, %v5063_v9  ;;  %v1718_v52 = vrot.slane %v1709_v49, %v5245_v48 }
 0x337   : > { %v1282_v53 = vpack.c.bf16 %v1281_v51, %v1281_v51 }
 0x339   : > { %4299 = vmatmul.mubr.msk.bf16.vlgmr.msra.gmra.mrb[8].mxu1 %vm1270_vm1, %v1282_v53 }
 0x33a   : > { %4303 = vmatpush3.bf16.xpose.msra.mxu1 %v1348_v54  ;;  %4304 = vmatprep.mubr.msk.bf16.mxu1 %vm4746_vm0, %v4745_v4 }
 0x33b   : > { %4308 = vmatprep.subr.bf16.mxu1 %v4745_v4 }
 0x341   : > { %4305 = vmatmul.mubr.bf16.vlgmr.msra.gmra.mrb[12].mxu1 %v1347_v56 }
 0x342   : > { %4309 = vmatpush3.bf16.msra.mxu1 %v1408_v25  ;;  %4310 = vmatprep.mubr.msk.bf16.mxu1 %vm4746_vm0, %v4745_v4  ;;  %v4493_v25 = vld [vmem:[%s6208_s4 + $0x80] ss:$8 sps:$4 sm:$0xff]  }
 0x343   : > { %1547 = vmatprep.subr.bf16.mxu1 %v4495_v17 }
 0x40c   : > { %v1324_v8 = vpop.f32.mrb[8].mxu1 }
 0x40d   : > { %v1330_v57 = vpack.c.bf16 %v1324_v8, %v1324_v8  ;;  %v4300_v59 = vpop.f32.mrb[9].mxu1 }
 0x40e   : > { %v1327_v60 = vpop.f32.mrb[10].mxu1 }
 0x40f   : > { %v4301_v61 = vpop.f32.mrb[11].mxu1  ;;  %1701 = vmatmul.mubr.bf16.vlgmr.msra.gmra.mrb[8].mxu0 %v1330_v57 }
 0x414   : > { %v1384_v62 = vpop.f32.mrb[12].mxu1 }
 0x415   : > { %v1390_v63 = vmul.f32 0.088388346, %v1384_v62  ;;  %v4306_v1 = vpop.f32.mrb[13].mxu1  ;;  %v1772_v62 = vld [vmem:[%s6212_s8] sm:$0xff] }
 0x416   : > { %v1387_v20 = vpop.f32.mrb[14].mxu1 }
 0x417   : > { %v4307_v2 = vpop.f32.mrb[15].mxu1  ;;  %v1391_v5 = vadd.f32 %v5178_v58, %v1390_v63  ;;  %v1776_v63 = vld [vmem:[%s6212_s8 + $0x20] sm:$0xff] }
 0x418   : > { %v4022_v1 = vcombine.low %v1772_v62, %v1776_v63  ;;  %v4023_v20 = vcombine.high %v1772_v62, %v1776_v63  ;;  %v1780_v2 = vld [vmem:[%s6212_s8 + $0x40] sm:$0xff]  ;;  %v1829_v63 = vld [vmem:[%s6212_s8 + $0x1c8] sm:$0xff] }
 0x419   : > { %v1392_v11 = vsel %vm1270_vm1, %v1391_v5, -inf  ;;  %v1832_v62 = vld [vmem:[%s6212_s8 + $0x1e0] sm:$0xff] }
 0x41a   : > { %1393 = vmax.xlane.f32.xlu1 %v1392_v11 }
 0x4a7   : > { %v1394_v12 = vpop.xlane.xlu1 %1393 }
 0x4a8   : > { %v1395_v4 = vsub.f32 %v1391_v5, %v1394_v12  ;;  %v1784_v5 = vld [vmem:[%s6212_s8 + $0x60] sm:$0xff] }
 0x4aa   : > { %v1396_v13 = vmul.f32 1.442695, %v1395_v4  ;;  %v4031_v4 = vcombine.high %v1780_v2, %v1784_v5 }
 0x4ac   : > { %4713 = vpow2.f32 %v1396_v13  ;;  %v1781_v13 = vld [vmem:[%s6212_s8 + $0x48] sm:$0xff] }
 0x4b6   : > { %v4714_v15 = vpop.eup %4713 }
 0x4b7   : > { %v1398_v16 = vsel %vm1270_vm1, %v4714_v15, 0.0 }
 0x4b8   : > { %1399 = vadd.xlane.f32.xlu1 %v1398_v16  ;;  %v1788_v16 = vld [vmem:[%s6212_s8 + $0x80] sm:$0xff] }
 0x4e2   : > { %v1702_v18 = vpop.f32.mrb[8].mxu0 }
 0x4e3   : > { %v1704_v19 = vpop.f32.mrb[9].mxu0 }
 0x4e4   : > { %v1706_v21 = vpop.f32.mrb[10].mxu0 }
 0x4e5   : > { %v1707_v58 = vpop.f32.mrb[11].mxu0  ;;  %v1793_v21 = vld [vmem:[%s6212_s8 + $0xa8] sm:$0xff] }
 0x4e6   : > { %v4030_v58 = vcombine.low %v1780_v2, %v1784_v5  ;;  %v1836_v5 = vld [vmem:[%s6212_s8 + $0x200] sm:$0xff] }
 0x545   : > { %v1400_v22 = vpop.xlane.xlu1 %1399 }
 0x546   : > { %4715 = vrcp.f32 %v1400_v22 }
 0x550   : > { %v4716_v23 = vpop.eup %4715 }
 0x551   : > { %v1402_v24 = vmul.f32 %v4716_v23, %v4714_v15  ;;  %v1785_v15 = vld [vmem:[%s6212_s8 + $0x68] sm:$0xff] }
 0x552   : > { %v4033_v17 = vcombine.high %v1781_v13, %v1785_v15  ;;  %v4032_v22 = vcombine.low %v1781_v13, %v1785_v15 }
 0x553   : > { %v1403_v26 = vpack.c.bf16 %v1402_v24, %v1402_v24 }
 0x555   : > { %4311 = vmatmul.mubr.msk.bf16.vlgmr.msra.gmra.mrb[16].mxu1 %vm1270_vm1, %v1403_v26  ;;  %v1800_v26 = vld [vmem:[%s6212_s8 + $0xe0] sm:$0xff] }
 0x556   : > { %1548 = vmatpush1.bf16.msra.mxu1 %v4493_v25  ;;  %1579 = vmatprep.mubr.bf16.mxu1 %v4747_v14  ;;  %v1796_v25 = vld [vmem:[%s6212_s8 + $0xc0] sm:$0xff] }
 0x557   : > { %1549 = vmatprep.subr.bf16.mxu1 %v4498_v27  ;;  %v1797_v27 = vld [vmem:[%s6212_s8 + $0xc8] sm:$0xff] }
 0x55a   : > { %1550 = vmatpush1.bf16.msra.mxu1 %v4496_v28  ;;  %v1801_v28 = vld [vmem:[%s6212_s8 + $0xe8] sm:$0xff] }
 0x55b   : > { %1551 = vmatprep.subr.bf16.mxu1 %v4501_v29 }
 0x55e   : > { %1552 = vmatpush1.bf16.msra.mxu1 %v4499_v30 }
 0x55f   : > { %1553 = vmatprep.subr.bf16.mxu1 %v4504_v31  ;;  %v4047_v31 = vcombine.high %v1796_v25, %v1800_v26 }
 0x562   : > { %1554 = vmatpush1.bf16.msra.mxu1 %v4502_v32  ;;  %v4049_v32 = vcombine.high %v1797_v27, %v1801_v28 }
 0x563   : > { %1555 = vmatprep.subr.bf16.mxu1 %v4507_v33  ;;  %v1804_v33 = vld [vmem:[%s6212_s8 + $0x100] sm:$0xff] }
 0x566   : > { %1556 = vmatpush1.bf16.msra.mxu1 %v4505_v34  ;;  %v1808_v34 = vld [vmem:[%s6212_s8 + $0x120] sm:$0xff] }
 0x567   : > { %1557 = vmatprep.subr.bf16.mxu1 %v4510_v35  ;;  %v1805_v35 = vld [vmem:[%s6212_s8 + $0x108] sm:$0xff] }
 0x56a   : > { %1558 = vmatpush1.bf16.msra.mxu1 %v4508_v36  ;;  %v1809_v36 = vld [vmem:[%s6212_s8 + $0x128] sm:$0xff] }
 0x56b   : > { %1559 = vmatprep.subr.bf16.mxu1 %v4513_v37  ;;  %v4046_v37 = vcombine.low %v1796_v25, %v1800_v26  ;;  %v4056_v49 = vcombine.low %v1805_v35, %v1809_v36  ;;  %v1852_v26 = vld [vmem:[%s6212_s8 + $0x280] sm:$0xff] }
 0x56e   : > { %1560 = vmatpush1.bf16.msra.mxu1 %v4511_v38  ;;  %v4048_v38 = vcombine.low %v1797_v27, %v1801_v28  ;;  %v1856_v27 = vld [vmem:[%s6212_s8 + $0x2a0] sm:$0xff]  ;;  %v1853_v28 = vld [vmem:[%s6212_s8 + $0x288] sm:$0xff] }
 0x56f   : > { %1561 = vmatprep.subr.bf16.mxu1 %v4516_v39  ;;  %v4055_v39 = vcombine.high %v1804_v33, %v1808_v34 }
 0x572   : > { %1562 = vmatpush1.bf16.msra.mxu1 %v4514_v40  ;;  %v4057_v40 = vcombine.high %v1805_v35, %v1809_v36 }
 0x573   : > { %2582 = vmatprep.subr.bf16.mxu1 %v4023_v20 }
 0x628   : > { %v1444_v41 = vpop.f32.mrb[16].mxu1 }
 0x629   : > { %v1450_v42 = vpack.c.bf16 %v1444_v41, %v1444_v41  ;;  %v4312_v43 = vpop.f32.mrb[17].mxu1  ;;  %v1812_v41 = vld [vmem:[%s6212_s8 + $0x140] sm:$0xff] }
 0x62a   : > { %v1447_v44 = vpop.f32.mrb[18].mxu1  ;;  %v1813_v43 = vld [vmem:[%s6212_s8 + $0x148] sm:$0xff] }
 0x62b   : > { %v4313_v47 = vpop.f32.mrb[19].mxu1  ;;  %1580 = vmatmul.mubr.bf16.vlgmr.msra.gmra.mrb[20].mxu1 %v1450_v42  ;;  %v1816_v42 = vld [vmem:[%s6212_s8 + $0x160] sm:$0xff]  ;;  %v1817_v44 = vld [vmem:[%s6212_s8 + $0x168] sm:$0xff] }
 0x62c   : > { %2583 = vmatpush1.bf16.msra.mxu1 %v4022_v1  ;;  %v4054_v47 = vcombine.low %v1804_v33, %v1808_v34  ;;  %v4102_v34 = vcombine.low %v1852_v26, %v1856_v27 }
 0x62d   : > { %2584 = vmatprep.subr.bf16.mxu1 %v4031_v4  ;;  %v1841_v4 = vld [vmem:[%s6212_s8 + $0x228] sm:$0xff] }
 0x630   : > { %2585 = vmatpush1.bf16.msra.mxu1 %v4030_v58  ;;  %v1849_v58 = vld [vmem:[%s6212_s8 + $0x268] sm:$0xff] }
 0x6fe   : > { %v1581_v51 = vpop.f32.mrb[20].mxu1 }
 0x6ff   : > { %v1703_v53 = vadd.f32 %v1702_v18, %v1581_v51  ;;  %v1583_v54 = vpop.f32.mrb[21].mxu1  ;;  %v1792_v18 = vld [vmem:[%s6212_s8 + $0xa0] sm:$0xff]  ;;  %v4065_v51 = vcombine.high %v1813_v43, %v1817_v44 }
 0x700   : > { %v1705_v55 = vadd.f32 %v1704_v19, %v1583_v54  ;;  %v1585_v56 = vpop.f32.mrb[22].mxu1  ;;  %v1789_v19 = vld [vmem:[%s6212_s8 + $0x88] sm:$0xff]  ;;  %v4039_v23 = vcombine.high %v1788_v16, %v1792_v18  ;;  %v4038_v29 = vcombine.low %v1788_v16, %v1792_v18  ;;  %v1844_v18 = vld [vmem:[%s6212_s8 + $0x240] sm:$0xff] }
 0x701   : > { %v1721_v14 = vadd.f32 %v1714_v50, %v1703_v53  ;;  %v1586_v8 = vpop.f32.mrb[23].mxu1  ;;  %v4041_v24 = vcombine.high %v1789_v19, %v1793_v21  ;;  %v4040_v30 = vcombine.low %v1789_v19, %v1793_v21  ;;  %v4063_v50 = vcombine.high %v1812_v41, %v1816_v42  ;;  %v1824_v53 = vld [vmem:[%s6212_s8 + $0x1a0] sm:$0xff]  ;;  %v1821_v54 = vld [vmem:[%s6212_s8 + $0x188] sm:$0xff] }
 0x702   : > { %v1722_v57 = vadd.f32 %v1718_v52, %v1705_v55  ;;  %2586 = vmatprep.subr.bf16.mxu1 %v4039_v23  ;;  %v1820_v52 = vld [vmem:[%s6212_s8 + $0x180] sm:$0xff]  ;;  %v1825_v55 = vld [vmem:[%s6212_s8 + $0x1a8] sm:$0xff]  ;;  %v4062_v56 = vcombine.low %v1812_v41, %v1816_v42 }
 0x703   : > { %v5315_v59 = vadd.f32 %v1721_v14, %v5037_v0  ;;  %v1773_v0 = vld [vmem:[%s6212_s8 + $0x8] sm:$0xff]  ;;  %2587 = vmatpush1.bf16.msra.mxu1 %v4038_v29  ;;  %v4064_v14 = vcombine.low %v1813_v43, %v1817_v44  ;;  %v4071_v8 = vcombine.high %v1820_v52, %v1824_v53  ;;  %v4070_v1 = vcombine.low %v1820_v52, %v1824_v53  ;;  %v1848_v19 = vld [vmem:[%s6212_s8 + $0x260] sm:$0xff] }
 0x704   : > { %v5318_v60 = vadd.f32 %v1722_v57, %v4981_v45  ;;  %v1777_v45 = vld [vmem:[%s6212_s8 + $0x28] sm:$0xff]  ;;  %2588 = vmatprep.subr.bf16.mxu1 %v4047_v31  ;;  %v4073_v57 = vcombine.high %v1821_v54, %v1825_v55  ;;  %v4072_v20 = vcombine.low %v1821_v54, %v1825_v55  ;;  %v1860_v43 = vld [vmem:[%s6212_s8 + $0x2c0] sm:$0xff] }
 0x705   : > { %v4024_v11 = vcombine.low %v1773_v0, %v1777_v45  ;;  %v4025_v12 = vcombine.high %v1773_v0, %v1777_v45  ;;  %v1833_v0 = vld [vmem:[%s6212_s8 + $0x1e8] sm:$0xff]  ;;  %v1868_v52 = vld [vmem:[%s6212_s8 + $0x300] sm:$0xff] }
 0x706   : > { %v1727_v61 = vadd.f32 %v5318_v60, %v5315_v59  ;;  %v4081_v2 = vcombine.high %v1829_v63, %v1833_v0  ;;  %v4080_v15 = vcombine.low %v1829_v63, %v1833_v0  ;;  %v1845_v21 = vld [vmem:[%s6212_s8 + $0x248] sm:$0xff]  ;;  %v1872_v53 = vld [vmem:[%s6212_s8 + $0x320] sm:$0xff] }
 0x707   : > { %2623 = vmatprep.subr.bf16.mxu0 %v4025_v12  ;;  %2589 = vmatpush1.bf16.msra.mxu1 %v4046_v37  ;;  %v1837_v12 = vld [vmem:[%s6212_s8 + $0x208] sm:$0xff]  ;;  %v4097_v25 = vcombine.high %v1845_v21, %v1849_v58  ;;  %v4096_v31 = vcombine.low %v1845_v21, %v1849_v58  ;;  %v4119_v55 = vcombine.high %v1868_v52, %v1872_v53 }
 0x708   : > { %1728 = vadd.xlane.f32.xlu0 %v1727_v61  ;;  %2624 = vmatpush1.bf16.msra.mxu0 %v4024_v11  ;;  %v1828_v61 = vld [vmem:[%s6212_s8 + $0x1c0] sm:$0xff]  ;;  %v4088_v23 = vcombine.low %v1837_v12, %v1841_v4  ;;  %v1857_v29 = vld [vmem:[%s6212_s8 + $0x2a8] sm:$0xff] }
 0x709   : > { %2625 = vmatprep.subr.bf16.mxu0 %v4033_v17  ;;  %2590 = vmatprep.subr.bf16.mxu1 %v4055_v39  ;;  %v4079_v45 = vcombine.high %v1828_v61, %v1832_v62  ;;  %v1840_v11 = vld [vmem:[%s6212_s8 + $0x220] sm:$0xff]  ;;  %v4078_v13 = vcombine.low %v1828_v61, %v1832_v62  ;;  %v4089_v17 = vcombine.high %v1837_v12, %v1841_v4  ;;  %v1869_v54 = vld [vmem:[%s6212_s8 + $0x308] sm:$0xff] }
 0x70a   : > { %v4087_v16 = vcombine.high %v1836_v5, %v1840_v11  ;;  %v4105_v33 = vcombine.high %v1853_v28, %v1857_v29  ;;  %v4104_v35 = vcombine.low %v1853_v28, %v1857_v29  ;;  %v1876_v61 = vld [vmem:[%s6212_s8 + $0x340] sm:$0xff]  ;;  %v1877_v63 = vld [vmem:[%s6212_s8 + $0x348] sm:$0xff]  ;;  %v1775_v28 = vld [vmem:[%s6212_s8 + $0x18] sm:$0xff] }
 0x70b   : > { %2591 = vmatpush1.bf16.msra.mxu1 %v4054_v47  ;;  %v1865_v47 = vld [vmem:[%s6212_s8 + $0x2e8] sm:$0xff]  ;;  %v1880_v62 = vld [vmem:[%s6212_s8 + $0x360] sm:$0xff] }
 0x70c   : > { %2626 = vmatpush1.bf16.msra.mxu0 %v4032_v22  ;;  %2592 = vmatprep.subr.bf16.mxu1 %v4063_v50  ;;  %v4086_v22 = vcombine.low %v1836_v5, %v1840_v11  ;;  %v4127_v0 = vcombine.high %v1876_v61, %v1880_v62  ;;  %v1884_v5 = vld [vmem:[%s6212_s8 + $0x380] sm:$0xff]  ;;  %v1885_v12 = vld [vmem:[%s6212_s8 + $0x388] sm:$0xff] }
 0x70d   : > { %2627 = vmatprep.subr.bf16.mxu0 %v4041_v24  ;;  %v4095_v24 = vcombine.high %v1844_v18, %v1848_v19  ;;  %v1888_v11 = vld [vmem:[%s6212_s8 + $0x3a0] sm:$0xff]  ;;  %v1893_v21 = vld [vmem:[%s6212_s8 + $0x3c8] sm:$0xff] }
 0x70e   : > { %v4135_v4 = vcombine.high %v1884_v5, %v1888_v11 }
 0x70f   : > { %2593 = vmatpush1.bf16.msra.mxu1 %v4062_v56  ;;  %v1873_v56 = vld [vmem:[%s6212_s8 + $0x328] sm:$0xff] }
 0x710   : > { %2628 = vmatpush1.bf16.msra.mxu0 %v4040_v30  ;;  %2594 = vmatprep.subr.bf16.mxu1 %v4071_v8  ;;  %v4094_v30 = vcombine.low %v1844_v18, %v1848_v19  ;;  %v4120_v8 = vcombine.low %v1869_v54, %v1873_v56  ;;  %v1892_v18 = vld [vmem:[%s6212_s8 + $0x3c0] sm:$0xff] }
 0x711   : > { %2629 = vmatprep.subr.bf16.mxu0 %v4049_v32  ;;  %v4103_v32 = vcombine.high %v1852_v26, %v1856_v27  ;;  %v1896_v19 = vld [vmem:[%s6212_s8 + $0x3e0] sm:$0xff]  ;;  %v1774_v26 = vld [vmem:[%s6212_s8 + $0x10] sm:$0xff] }
 0x712   : > { %v4143_v58 = vcombine.high %v1892_v18, %v1896_v19  ;;  %v1778_v27 = vld [vmem:[%s6212_s8 + $0x30] sm:$0xff] }
 0x713   : > { %2595 = vmatpush1.bf16.msra.mxu1 %v4070_v1  ;;  %v1881_v1 = vld [vmem:[%s6212_s8 + $0x368] sm:$0xff]  ;;  %v4027_v29 = vcombine.high %v1774_v26, %v1778_v27 }
 0x714   : > { %2630 = vmatpush1.bf16.msra.mxu0 %v4048_v38  ;;  %2596 = vmatprep.subr.bf16.mxu1 %v4079_v45  ;;  %v4128_v45 = vcombine.low %v1877_v63, %v1881_v1 }
 0x715   : > { %2631 = vmatprep.subr.bf16.mxu0 %v4057_v40 }
 0x717   : > { %2597 = vmatpush1.bf16.msra.mxu1 %v4078_v13  ;;  %v1889_v13 = vld [vmem:[%s6212_s8 + $0x3a8] sm:$0xff] }
 0x718   : > { %2632 = vmatpush1.bf16.msra.mxu0 %v4056_v49  ;;  %2598 = vmatprep.subr.bf16.mxu1 %v4087_v16  ;;  %v4136_v16 = vcombine.low %v1885_v12, %v1889_v13 }
 0x719   : > { %2633 = vmatprep.subr.bf16.mxu0 %v4065_v51 }
 0x71b   : > { %2599 = vmatpush1.bf16.msra.mxu1 %v4086_v22  ;;  %v1897_v22 = vld [vmem:[%s6212_s8 + $0x3e8] sm:$0xff] }
 0x71c   : > { %2634 = vmatpush1.bf16.msra.mxu0 %v4064_v14  ;;  %2600 = vmatprep.subr.bf16.mxu1 %v4095_v24  ;;  %v4118_v14 = vcombine.low %v1868_v52, %v1872_v53  ;;  %v4145_v24 = vcombine.high %v1893_v21, %v1897_v22  ;;  %v1782_v53 = vld [vmem:[%s6212_s8 + $0x50] sm:$0xff] }
 0x71d   : > { %2635 = vmatprep.subr.bf16.mxu0 %v4073_v57  ;;  %v4121_v57 = vcombine.high %v1869_v54, %v1873_v56  ;;  %v1787_v54 = vld [vmem:[%s6212_s8 + $0x78] sm:$0xff] }
 0x71f   : > { %2601 = vmatpush1.bf16.msra.mxu1 %v4094_v30  ;;  %v1779_v30 = vld [vmem:[%s6212_s8 + $0x38] sm:$0xff] }
 0x720   : > { %2636 = vmatpush1.bf16.msra.mxu0 %v4072_v20  ;;  %2602 = vmatprep.subr.bf16.mxu1 %v4103_v32  ;;  %v4126_v20 = vcombine.low %v1876_v61, %v1880_v62  ;;  %v4028_v32 = vcombine.low %v1775_v28, %v1779_v30  ;;  %v1794_v61 = vld [vmem:[%s6212_s8 + $0xb0] sm:$0xff]  ;;  %v1791_v62 = vld [vmem:[%s6212_s8 + $0x98] sm:$0xff] }
 0x721   : > { %2637 = vmatprep.subr.bf16.mxu0 %v4081_v2  ;;  %v4129_v2 = vcombine.high %v1877_v63, %v1881_v1  ;;  %v1795_v63 = vld [vmem:[%s6212_s8 + $0xb8] sm:$0xff] }
 0x723   : > { %2603 = vmatpush1.bf16.msra.mxu1 %v4102_v34 }
 0x724   : > { %2638 = vmatpush1.bf16.msra.mxu0 %v4080_v15  ;;  %v4134_v15 = vcombine.low %v1884_v5, %v1888_v11  ;;  %v1802_v5 = vld [vmem:[%s6212_s8 + $0xf0] sm:$0xff]  ;;  %v1799_v11 = vld [vmem:[%s6212_s8 + $0xd8] sm:$0xff] }
 0x725   : > { %2639 = vmatprep.subr.bf16.mxu0 %v4089_v17  ;;  %v4137_v17 = vcombine.high %v1885_v12, %v1889_v13  ;;  %v1803_v12 = vld [vmem:[%s6212_s8 + $0xf8] sm:$0xff]  ;;  %v4044_v13 = vcombine.low %v1791_v62, %v1795_v63 }
 0x728   : > { %2640 = vmatpush1.bf16.msra.mxu0 %v4088_v23  ;;  %v4142_v23 = vcombine.low %v1892_v18, %v1896_v19  ;;  %v1810_v18 = vld [vmem:[%s6212_s8 + $0x130] sm:$0xff]  ;;  %v1807_v19 = vld [vmem:[%s6212_s8 + $0x118] sm:$0xff] }
 0x729   : > { %2641 = vmatprep.subr.bf16.mxu0 %v4097_v25  ;;  %v4144_v25 = vcombine.low %v1893_v21, %v1897_v22  ;;  %v1811_v21 = vld [vmem:[%s6212_s8 + $0x138] sm:$0xff]  ;;  %v4052_v22 = vcombine.low %v1799_v11, %v1803_v12 }
 0x72c   : > { %2642 = vmatpush1.bf16.msra.mxu0 %v4096_v31  ;;  %v4026_v31 = vcombine.low %v1774_v26, %v1778_v27  ;;  %v1818_v26 = vld [vmem:[%s6212_s8 + $0x170] sm:$0xff]  ;;  %v1815_v27 = vld [vmem:[%s6212_s8 + $0x158] sm:$0xff] }
 0x72d   : > { %2643 = vmatprep.subr.bf16.mxu0 %v4105_v33  ;;  %v4029_v33 = vcombine.high %v1775_v28, %v1779_v30  ;;  %v1819_v28 = vld [vmem:[%s6212_s8 + $0x178] sm:$0xff]  ;;  %v4060_v30 = vcombine.low %v1807_v19, %v1811_v21 }
 0x730   : > { %2644 = vmatpush1.bf16.msra.mxu0 %v4104_v35 }
 0x795   : > { %v1729_v36 = vpop.xlane.xlu0 %1728 }
 0x796   : > { %v1731_v37 = vmul.f32 0.00390625, %v1729_v36 }
 0x798   : > { %v5455_v38 = vsub.f32 %v5315_v59, %v1731_v37  ;;  %v5458_v39 = vsub.f32 %v5318_v60, %v1731_v37  ;;  %v1864_v59 = vld [vmem:[%s6212_s8 + $0x2e0] sm:$0xff]  ;;  %v1861_v60 = vld [vmem:[%s6212_s8 + $0x2c8] sm:$0xff] }
 0x799   : > { %v4111_v44 = vcombine.high %v1860_v43, %v1864_v59  ;;  %v4110_v49 = vcombine.low %v1860_v43, %v1864_v59  ;;  %v4112_v50 = vcombine.low %v1861_v60, %v1865_v47  ;;  %v4113_v51 = vcombine.high %v1861_v60, %v1865_v47  ;;  %v1725_v37 = vld [vmem:[%s6210_s6] sm:$0x3] }
 0x79a   : > { %v1734_v40 = vmul.f32 %v5455_v38, %v5455_v38  ;;  %v1735_v41 = vmul.f32 %v5458_v39, %v5458_v39 }
 0x79b   : > { %2604 = vmatprep.subr.bf16.mxu1 %v4111_v44  ;;  %2645 = vmatprep.subr.bf16.mxu0 %v4113_v51 }
 0x79c   : > { %v1736_v42 = vadd.f32 %v1735_v41, %v1734_v40  ;;  %2605 = vmatpush1.bf16.msra.mxu1 %v4110_v49  ;;  %2646 = vmatpush1.bf16.msra.mxu0 %v4112_v50  ;;  %v1726_v40 = vld [vmem:[%s6211_s7] sm:$0x3]  ;;  %v1752_v41 = vrot.slane %v1725_v37, %v5245_v48 }
 0x79d   : > { %2606 = vmatprep.subr.bf16.mxu1 %v4119_v55  ;;  %2647 = vmatprep.subr.bf16.mxu0 %v4121_v57  ;;  %v1765_v44 = vrot.slane %v1726_v40, %v5245_v48  ;;  %v1761_v47 = vrot.slane %v1726_v40, %v5063_v9  ;;  %v4068_v40 = vcombine.low %v1815_v27, %v1819_v28 }
 0x79e   : > { %1737 = vadd.xlane.f32.xlu1 %v1736_v42  ;;  %v1748_v42 = vrot.slane %v1725_v37, %v5063_v9 }
 0x7a0   : > { %2607 = vmatpush1.bf16.msra.mxu1 %v4118_v14  ;;  %2648 = vmatpush1.bf16.msra.mxu0 %v4120_v8  ;;  %v1790_v14 = vld [vmem:[%s6212_s8 + $0x90] sm:$0xff] }
 0x7a1   : > { %2608 = vmatprep.subr.bf16.mxu1 %v4127_v0  ;;  %2649 = vmatprep.subr.bf16.mxu0 %v4129_v2  ;;  %v1798_v2 = vld [vmem:[%s6212_s8 + $0xd0] sm:$0xff] }
 0x7a4   : > { %2609 = vmatpush1.bf16.msra.mxu1 %v4126_v20  ;;  %2650 = vmatpush1.bf16.msra.mxu0 %v4128_v45  ;;  %v4043_v20 = vcombine.high %v1790_v14, %v1794_v61  ;;  %v4045_v45 = vcombine.high %v1791_v62, %v1795_v63  ;;  %v1846_v62 = vld [vmem:[%s6212_s8 + $0x250] sm:$0xff] }
 0x7a5   : > { %2610 = vmatprep.subr.bf16.mxu1 %v4135_v4  ;;  %2651 = vmatprep.subr.bf16.mxu0 %v4137_v17  ;;  %v4042_v4 = vcombine.low %v1790_v14, %v1794_v61  ;;  %v1806_v17 = vld [vmem:[%s6212_s8 + $0x110] sm:$0xff] }
 0x7a6   : > { %v1850_v63 = vld [vmem:[%s6212_s8 + $0x270] sm:$0xff] }
 0x7a8   : > { %2611 = vmatpush1.bf16.msra.mxu1 %v4134_v15  ;;  %2652 = vmatpush1.bf16.msra.mxu0 %v4136_v16  ;;  %v4051_v15 = vcombine.high %v1798_v2, %v1802_v5  ;;  %v4053_v16 = vcombine.high %v1799_v11, %v1803_v12  ;;  %v1854_v11 = vld [vmem:[%s6212_s8 + $0x290] sm:$0xff] }
 0x7a9   : > { %2612 = vmatprep.subr.bf16.mxu1 %v4143_v58  ;;  %2653 = vmatprep.subr.bf16.mxu0 %v4145_v24  ;;  %v4050_v58 = vcombine.low %v1798_v2, %v1802_v5  ;;  %v4061_v24 = vcombine.high %v1807_v19, %v1811_v21  ;;  %v4099_v2 = vcombine.high %v1846_v62, %v1850_v63  ;;  %v1858_v12 = vld [vmem:[%s6212_s8 + $0x2b0] sm:$0xff] }
 0x7aa   : > { %v1862_v19 = vld [vmem:[%s6212_s8 + $0x2d0] sm:$0xff] }
 0x7ab   : > { %v1866_v21 = vld [vmem:[%s6212_s8 + $0x2f0] sm:$0xff] }
 0x7ac   : > { %2613 = vmatpush1.bf16.msra.mxu1 %v4142_v23  ;;  %2654 = vmatpush1.bf16.msra.mxu0 %v4144_v25  ;;  %v4059_v23 = vcombine.high %v1806_v17, %v1810_v18  ;;  %v1814_v25 = vld [vmem:[%s6212_s8 + $0x150] sm:$0xff] }
 0x7ad   : > { %2664 = vmatprep.subr.bf16.mxu1 %v4027_v29  ;;  %2705 = vmatprep.subr.bf16.mxu0 %v4029_v33  ;;  %v4058_v29 = vcombine.low %v1806_v17, %v1810_v18  ;;  %v1822_v33 = vld [vmem:[%s6212_s8 + $0x190] sm:$0xff]  ;;  %v4066_v37 = vcombine.low %v1814_v25, %v1818_v26  ;;  %v4107_v17 = vcombine.high %v1854_v11, %v1858_v12 }
 0x82b   : > { %v1738_v34 = vpop.xlane.xlu1 %1737 }
 0x82c   : > { %v1739_v35 = vmul.f32 0.00390625, %v1738_v34  ;;  %v1826_v34 = vld [vmem:[%s6212_s8 + $0x1b0] sm:$0xff] }
 0x82e   : > { %v1740_v36 = vadd.f32 1e-12, %v1739_v35  ;;  %v1823_v35 = vld [vmem:[%s6212_s8 + $0x198] sm:$0xff] }
 0x830   : > { %4717 = vrsqrt.f32 %v1740_v36  ;;  %v1827_v36 = vld [vmem:[%s6212_s8 + $0x1b8] sm:$0xff] }
 0x83a   : > { %v4718_v43 = vpop.eup %4717 }
 0x83b   : > { %v1742_v59 = vmul.f32 %v4718_v43, %v5455_v38  ;;  %v1743_v60 = vmul.f32 %v4718_v43, %v5458_v39  ;;  %v1786_v38 = vld [vmem:[%s6212_s8 + $0x70] sm:$0xff]  ;;  %v1783_v39 = vld [vmem:[%s6212_s8 + $0x58] sm:$0xff] }
 0x83c   : > { %v4035_v8 = vcombine.high %v1782_v53, %v1786_v38  ;;  %v4037_v57 = vcombine.high %v1783_v39, %v1787_v54  ;;  %v4034_v0 = vcombine.low %v1782_v53, %v1786_v38  ;;  %v4036_v1 = vcombine.low %v1783_v39, %v1787_v54  ;;  %v1830_v43 = vld [vmem:[%s6212_s8 + $0x1d0] sm:$0xff]  ;;  %v1839_v54 = vld [vmem:[%s6212_s8 + $0x218] sm:$0xff] }
 0x83d   : > { %v1756_v49 = vmul.f32 %v1752_v41, %v1743_v60  ;;  %v1755_v50 = vmul.f32 %v1748_v42, %v1742_v59  ;;  %v4075_v41 = vcombine.high %v1822_v33, %v1826_v34  ;;  %v4077_v42 = vcombine.high %v1823_v35, %v1827_v36  ;;  %v1834_v59 = vld [vmem:[%s6212_s8 + $0x1f0] sm:$0xff]  ;;  %v1831_v60 = vld [vmem:[%s6212_s8 + $0x1d8] sm:$0xff] }
 0x83e   : > { %v1838_v38 = vld [vmem:[%s6212_s8 + $0x210] sm:$0xff]  ;;  %v4082_v14 = vcombine.low %v1830_v43, %v1834_v59 }
 0x83f   : > { %v5548_v51 = vadd.f32 %v1765_v44, %v1756_v49  ;;  %v5550_v52 = vadd.f32 %v1761_v47, %v1755_v50  ;;  %v1835_v44 = vld [vmem:[%s6212_s8 + $0x1f8] sm:$0xff]  ;;  %v4074_v47 = vcombine.low %v1822_v33, %v1826_v34  ;;  %v4076_v49 = vcombine.low %v1823_v35, %v1827_v36  ;;  %v1842_v39 = vld [vmem:[%s6212_s8 + $0x230] sm:$0xff] }
 0x840   : > { %v4083_v50 = vcombine.high %v1830_v43, %v1834_v59  ;;  %v4085_v53 = vcombine.high %v1831_v60, %v1835_v44  ;;  %v1878_v35 = vld [vmem:[%s6212_s8 + $0x350] sm:$0xff] }
 0x841   : > { %v1771_v55 = vpack.c.bf16 %v5548_v51, %v5548_v51  ;;  %v5568_v56 = vpack.c.bf16 %v5550_v52, %v5550_v52  ;;  %v1882_v36 = vld [vmem:[%s6212_s8 + $0x370] sm:$0xff] }
 0x842   : > { %v4131_v43 = vcombine.high %v1878_v35, %v1882_v36 }
 0x843   : > { %2614 = vmatprep.mubr.bf16.mxu1 %v1771_v55  ;;  %2655 = vmatprep.mubr.bf16.mxu0 %v1771_v55 }
 0x844   : > { %2615 = vmatmul.mubr.bf16.vlgmr.msra.gmra.mrb[24].mxu1 %v5568_v56  ;;  %2656 = vmatmul.mubr.bf16.vlgmr.msra.gmra.mrb[12].mxu0 %v5568_v56 }
 0x845   : > { %2665 = vmatpush1.bf16.msra.mxu1 %v4026_v31  ;;  %2706 = vmatpush1.bf16.msra.mxu0 %v4028_v32  ;;  %v4067_v31 = vcombine.high %v1814_v25, %v1818_v26  ;;  %v4069_v32 = vcombine.high %v1815_v27, %v1819_v28  ;;  %v4115_v25 = vcombine.high %v1862_v19, %v1866_v21  ;;  %v1870_v27 = vld [vmem:[%s6212_s8 + $0x310] sm:$0xff] }
 0x846   : > { %2696 = vmatprep.mubr.bf16.mxu1 %v1771_v55  ;;  %2737 = vmatprep.mubr.bf16.mxu0 %v1771_v55  ;;  %v1843_v55 = vld [vmem:[%s6212_s8 + $0x238] sm:$0xff]  ;;  %v1874_v28 = vld [vmem:[%s6212_s8 + $0x330] sm:$0xff] }
 0x847   : > { %2666 = vmatprep.subr.bf16.mxu1 %v4035_v8  ;;  %2707 = vmatprep.subr.bf16.mxu0 %v4037_v57  ;;  %v4084_v8 = vcombine.low %v1831_v60, %v1835_v44  ;;  %v4091_v57 = vcombine.high %v1838_v38, %v1842_v39  ;;  %v4093_v61 = vcombine.high %v1839_v54, %v1843_v55  ;;  %v1886_v60 = vld [vmem:[%s6212_s8 + $0x390] sm:$0xff] }
 0x848   : > { %v4123_v33 = vcombine.high %v1870_v27, %v1874_v28  ;;  %v1890_v44 = vld [vmem:[%s6212_s8 + $0x3b0] sm:$0xff] }
 0x849   : > { %2667 = vmatpush1.bf16.msra.mxu1 %v4034_v0  ;;  %2708 = vmatpush1.bf16.msra.mxu0 %v4036_v1  ;;  %v1847_v0 = vld [vmem:[%s6212_s8 + $0x258] sm:$0xff] }
 0x84a   : > { %2668 = vmatprep.subr.bf16.mxu1 %v4043_v20  ;;  %2709 = vmatprep.subr.bf16.mxu0 %v4045_v45  ;;  %v1851_v1 = vld [vmem:[%s6212_s8 + $0x278] sm:$0xff]  ;;  %v4090_v20 = vcombine.low %v1838_v38, %v1842_v39  ;;  %v4092_v45 = vcombine.low %v1839_v54, %v1843_v55  ;;  %v4139_v38 = vcombine.high %v1886_v60, %v1890_v44  ;;  %v1894_v54 = vld [vmem:[%s6212_s8 + $0x3d0] sm:$0xff] }
 0x84b   : > { %v4101_v5 = vcombine.high %v1847_v0, %v1851_v1  ;;  %v1898_v55 = vld [vmem:[%s6212_s8 + $0x3f0] sm:$0xff] }
 0x84d   : > { %2669 = vmatpush1.bf16.msra.mxu1 %v4042_v4  ;;  %2710 = vmatpush1.bf16.msra.mxu0 %v4044_v13  ;;  %v1855_v4 = vld [vmem:[%s6212_s8 + $0x298] sm:$0xff] }
 0x84e   : > { %2670 = vmatprep.subr.bf16.mxu1 %v4051_v15  ;;  %2711 = vmatprep.subr.bf16.mxu0 %v4053_v16  ;;  %v1859_v13 = vld [vmem:[%s6212_s8 + $0x2b8] sm:$0xff]  ;;  %v4098_v15 = vcombine.low %v1846_v62, %v1850_v63  ;;  %v4100_v16 = vcombine.low %v1847_v0, %v1851_v1  ;;  %v4147_v62 = vcombine.high %v1894_v54, %v1898_v55 }
 0x84f   : > { %v4109_v18 = vcombine.high %v1855_v4, %v1859_v13  ;;  %v4146_v0 = vcombine.low %v1894_v54, %v1898_v55  ;;  %v4588_v54 = vld [vmem:[%s6214_s10 + $0x1b4] ss:$8 sps:$4 sm:$0xff]   ;;  %v4583_v55 = vld [vmem:[%s6214_s10 + $0xb0] ss:$8 sps:$4 sm:$0xff]  }
 0x851   : > { %2671 = vmatpush1.bf16.msra.mxu1 %v4050_v58  ;;  %2712 = vmatpush1.bf16.msra.mxu0 %v4052_v22  ;;  %v1863_v58 = vld [vmem:[%s6212_s8 + $0x2d8] sm:$0xff] }
 0x852   : > { %2672 = vmatprep.subr.bf16.mxu1 %v4059_v23  ;;  %2713 = vmatprep.subr.bf16.mxu0 %v4061_v24  ;;  %v1867_v22 = vld [vmem:[%s6212_s8 + $0x2f8] sm:$0xff]  ;;  %v4106_v23 = vcombine.low %v1854_v11, %v1858_v12  ;;  %v4108_v24 = vcombine.low %v1855_v4, %v1859_v13 }
 0x853   : > { %v4117_v26 = vcombine.high %v1863_v58, %v1867_v22  ;;  %v4525_v11 = vld [vmem:[%s6214_s10 + $0x14] ss:$8 sps:$4 sm:$0xff]   ;;  %v4523_v4 = vld [vmem:[%s6214_s10 + $0x10] ss:$8 sps:$4 sm:$0xff]  }
 0x854   : > { %v4528_v12 = vld [vmem:[%s6214_s10 + $0x114] ss:$8 sps:$4 sm:$0xff]   ;;  %v4526_v13 = vld [vmem:[%s6214_s10 + $0x110] ss:$8 sps:$4 sm:$0xff]  }
 0x855   : > { %2673 = vmatpush1.bf16.msra.mxu1 %v4058_v29  ;;  %2714 = vmatpush1.bf16.msra.mxu0 %v4060_v30  ;;  %v1871_v29 = vld [vmem:[%s6212_s8 + $0x318] sm:$0xff] }
 0x856   : > { %2674 = vmatprep.subr.bf16.mxu1 %v4067_v31  ;;  %2715 = vmatprep.subr.bf16.mxu0 %v4069_v32  ;;  %v1875_v30 = vld [vmem:[%s6212_s8 + $0x338] sm:$0xff]  ;;  %v4114_v31 = vcombine.low %v1862_v19, %v1866_v21  ;;  %v4116_v32 = vcombine.low %v1863_v58, %v1867_v22  ;;  %v4543_v22 = vld [vmem:[%s6214_s10 + $0x44] ss:$8 sps:$4 sm:$0xff]  }
 0x857   : > { %v4125_v34 = vcombine.high %v1871_v29, %v1875_v30  ;;  %v4540_v19 = vld [vmem:[%s6214_s10 + $0x134] ss:$8 sps:$4 sm:$0xff]   ;;  %v4535_v21 = vld [vmem:[%s6214_s10 + $0x30] ss:$8 sps:$4 sm:$0xff]  }
 0x858   : > { %v4538_v58 = vld [vmem:[%s6214_s10 + $0x130] ss:$8 sps:$4 sm:$0xff]  }
 0x859   : > { %2675 = vmatpush1.bf16.msra.mxu1 %v4066_v37  ;;  %2716 = vmatpush1.bf16.msra.mxu0 %v4068_v40  ;;  %v1879_v37 = vld [vmem:[%s6212_s8 + $0x358] sm:$0xff] }
 0x85a   : > { %2676 = vmatprep.subr.bf16.mxu1 %v4075_v41  ;;  %2717 = vmatprep.subr.bf16.mxu0 %v4077_v42  ;;  %v1883_v40 = vld [vmem:[%s6212_s8 + $0x378] sm:$0xff]  ;;  %v4122_v41 = vcombine.low %v1870_v27, %v1874_v28  ;;  %v4124_v42 = vcombine.low %v1871_v29, %v1875_v30  ;;  %v4555_v30 = vld [vmem:[%s6214_s10 + $0x64] ss:$8 sps:$4 sm:$0xff]  }
 0x85b   : > { %v4133_v59 = vcombine.high %v1879_v37, %v1883_v40  ;;  %v4552_v27 = vld [vmem:[%s6214_s10 + $0x154] ss:$8 sps:$4 sm:$0xff]   ;;  %v4547_v28 = vld [vmem:[%s6214_s10 + $0x50] ss:$8 sps:$4 sm:$0xff]  }
 0x85c   : > { %v4550_v29 = vld [vmem:[%s6214_s10 + $0x150] ss:$8 sps:$4 sm:$0xff]  }
 0x85d   : > { %2677 = vmatpush1.bf16.msra.mxu1 %v4074_v47  ;;  %2718 = vmatpush1.bf16.msra.mxu0 %v4076_v49  ;;  %v1887_v47 = vld [vmem:[%s6212_s8 + $0x398] sm:$0xff] }
 0x85e   : > { %2678 = vmatprep.subr.bf16.mxu1 %v4083_v50  ;;  %2719 = vmatprep.subr.bf16.mxu0 %v4085_v53  ;;  %v1891_v49 = vld [vmem:[%s6212_s8 + $0x3b8] sm:$0xff]  ;;  %v4130_v50 = vcombine.low %v1878_v35, %v1882_v36  ;;  %v4132_v53 = vcombine.low %v1879_v37, %v1883_v40  ;;  %v4567_v40 = vld [vmem:[%s6214_s10 + $0x84] ss:$8 sps:$4 sm:$0xff]  }
 0x85f   : > { %v4141_v39 = vcombine.high %v1887_v47, %v1891_v49  ;;  %v4564_v35 = vld [vmem:[%s6214_s10 + $0x174] ss:$8 sps:$4 sm:$0xff]   ;;  %v4559_v36 = vld [vmem:[%s6214_s10 + $0x70] ss:$8 sps:$4 sm:$0xff]  }
 0x860   : > { %v4562_v37 = vld [vmem:[%s6214_s10 + $0x170] ss:$8 sps:$4 sm:$0xff]  }
 0x861   : > { %2679 = vmatpush1.bf16.msra.mxu1 %v4082_v14  ;;  %2720 = vmatpush1.bf16.msra.mxu0 %v4084_v8  ;;  %v1895_v14 = vld [vmem:[%s6212_s8 + $0x3d8] sm:$0xff] }
 0x862   : > { %2680 = vmatprep.subr.bf16.mxu1 %v4091_v57  ;;  %2721 = vmatprep.subr.bf16.mxu0 %v4093_v61  ;;  %v1899_v8 = vld [vmem:[%s6212_s8 + $0x3f8] sm:$0xff]  ;;  %v4138_v57 = vcombine.low %v1886_v60, %v1890_v44  ;;  %v4140_v61 = vcombine.low %v1887_v47, %v1891_v49  ;;  %v4579_v49 = vld [vmem:[%s6214_s10 + $0xa4] ss:$8 sps:$4 sm:$0xff]  }
 0x863   : > { %v4149_v63 = vcombine.high %v1895_v14, %v1899_v8  ;;  %v4148_v1 = vcombine.low %v1895_v14, %v1899_v8  ;;  %v4576_v60 = vld [vmem:[%s6214_s10 + $0x194] ss:$8 sps:$4 sm:$0xff]   ;;  %v4571_v44 = vld [vmem:[%s6214_s10 + $0x90] ss:$8 sps:$4 sm:$0xff]   ;;  %v4591_v8 = vld [vmem:[%s6214_s10 + $0xc4] ss:$8 sps:$4 sm:$0xff]  }
 0x864   : > { %v4574_v47 = vld [vmem:[%s6214_s10 + $0x190] ss:$8 sps:$4 sm:$0xff]  }
 0x865   : > { %2681 = vmatpush1.bf16.msra.mxu1 %v4090_v20  ;;  %2722 = vmatpush1.bf16.msra.mxu0 %v4092_v45  ;;  %v4519_v20 = vld [vmem:[%s6214_s10 + $0x4] ss:$8 sps:$4 sm:$0xff]   ;;  %v4586_v14 = vld [vmem:[%s6214_s10 + $0x1b0] ss:$8 sps:$4 sm:$0xff]  }
 0x866   : > { %2682 = vmatprep.subr.bf16.mxu1 %v4099_v2  ;;  %2723 = vmatprep.subr.bf16.mxu0 %v4101_v5  ;;  %v4522_v45 = vld [vmem:[%s6214_s10 + $0x104] ss:$8 sps:$4 sm:$0xff]   ;;  %v4517_v2 = vld [vmem:[%s6214_s10] ss:$8 sps:$4 sm:$0xff]  }
 0x867   : > { %v4520_v5 = vld [vmem:[%s6214_s10 + $0x100] ss:$8 sps:$4 sm:$0xff]  }
 0x869   : > { %2683 = vmatpush1.bf16.msra.mxu1 %v4098_v15  ;;  %2724 = vmatpush1.bf16.msra.mxu0 %v4100_v16  ;;  %v4531_v15 = vld [vmem:[%s6214_s10 + $0x24] ss:$8 sps:$4 sm:$0xff]   ;;  %v4529_v16 = vld [vmem:[%s6214_s10 + $0x20] ss:$8 sps:$4 sm:$0xff]  }
 0x86a   : > { %2684 = vmatprep.subr.bf16.mxu1 %v4107_v17  ;;  %2725 = vmatprep.subr.bf16.mxu0 %v4109_v18  ;;  %v4532_v17 = vld [vmem:[%s6214_s10 + $0x120] ss:$8 sps:$4 sm:$0xff]   ;;  %v4537_v18 = vld [vmem:[%s6214_s10 + $0x34] ss:$8 sps:$4 sm:$0xff]  }
 0x86d   : > { %2685 = vmatpush1.bf16.msra.mxu1 %v4106_v23  ;;  %2726 = vmatpush1.bf16.msra.mxu0 %v4108_v24  ;;  %v4546_v23 = vld [vmem:[%s6214_s10 + $0x144] ss:$8 sps:$4 sm:$0xff]   ;;  %v4541_v24 = vld [vmem:[%s6214_s10 + $0x40] ss:$8 sps:$4 sm:$0xff]  }
 0x86e   : > { %2686 = vmatprep.subr.bf16.mxu1 %v4115_v25  ;;  %2727 = vmatprep.subr.bf16.mxu0 %v4117_v26  ;;  %v4544_v25 = vld [vmem:[%s6214_s10 + $0x140] ss:$8 sps:$4 sm:$0xff]   ;;  %v4549_v26 = vld [vmem:[%s6214_s10 + $0x54] ss:$8 sps:$4 sm:$0xff]  }
 0x871   : > { %2687 = vmatpush1.bf16.msra.mxu1 %v4114_v31  ;;  %2728 = vmatpush1.bf16.msra.mxu0 %v4116_v32  ;;  %v4558_v31 = vld [vmem:[%s6214_s10 + $0x164] ss:$8 sps:$4 sm:$0xff]   ;;  %v4553_v32 = vld [vmem:[%s6214_s10 + $0x60] ss:$8 sps:$4 sm:$0xff]  }
 0x872   : > { %2688 = vmatprep.subr.bf16.mxu1 %v4123_v33  ;;  %2729 = vmatprep.subr.bf16.mxu0 %v4125_v34  ;;  %v4556_v33 = vld [vmem:[%s6214_s10 + $0x160] ss:$8 sps:$4 sm:$0xff]   ;;  %v4561_v34 = vld [vmem:[%s6214_s10 + $0x74] ss:$8 sps:$4 sm:$0xff]  }
 0x875   : > { %2689 = vmatpush1.bf16.msra.mxu1 %v4122_v41  ;;  %2730 = vmatpush1.bf16.msra.mxu0 %v4124_v42  ;;  %v4570_v41 = vld [vmem:[%s6214_s10 + $0x184] ss:$8 sps:$4 sm:$0xff]   ;;  %v4565_v42 = vld [vmem:[%s6214_s10 + $0x80] ss:$8 sps:$4 sm:$0xff]  }
 0x876   : > { %2690 = vmatprep.subr.bf16.mxu1 %v4131_v43  ;;  %2731 = vmatprep.subr.bf16.mxu0 %v4133_v59  ;;  %v4568_v43 = vld [vmem:[%s6214_s10 + $0x180] ss:$8 sps:$4 sm:$0xff]   ;;  %v4573_v59 = vld [vmem:[%s6214_s10 + $0x94] ss:$8 sps:$4 sm:$0xff]  }
 0x879   : > { %2691 = vmatpush1.bf16.msra.mxu1 %v4130_v50  ;;  %2732 = vmatpush1.bf16.msra.mxu0 %v4132_v53  ;;  %v4582_v50 = vld [vmem:[%s6214_s10 + $0x1a4] ss:$8 sps:$4 sm:$0xff]   ;;  %v4577_v53 = vld [vmem:[%s6214_s10 + $0xa0] ss:$8 sps:$4 sm:$0xff]  }
 0x87a   : > { %2692 = vmatprep.subr.bf16.mxu1 %v4139_v38  ;;  %2733 = vmatprep.subr.bf16.mxu0 %v4141_v39  ;;  %v4580_v38 = vld [vmem:[%s6214_s10 + $0x1a0] ss:$8 sps:$4 sm:$0xff]   ;;  %v4585_v39 = vld [vmem:[%s6214_s10 + $0xb4] ss:$8 sps:$4 sm:$0xff]  }
 0x87d   : > { %2693 = vmatpush1.bf16.msra.mxu1 %v4138_v57  ;;  %2734 = vmatpush1.bf16.msra.mxu0 %v4140_v61  ;;  %v4594_v57 = vld [vmem:[%s6214_s10 + $0x1c4] ss:$8 sps:$4 sm:$0xff]   ;;  %v4589_v61 = vld [vmem:[%s6214_s10 + $0xc0] ss:$8 sps:$4 sm:$0xff]  }
 0x87e   : > { %2694 = vmatprep.subr.bf16.mxu1 %v4147_v62  ;;  %2735 = vmatprep.subr.bf16.mxu0 %v4149_v63  ;;  %v4592_v62 = vld [vmem:[%s6214_s10 + $0x1c0] ss:$8 sps:$4 sm:$0xff]   ;;  %v4597_v63 = vld [vmem:[%s6214_s10 + $0xd4] ss:$8 sps:$4 sm:$0xff]  }
 0x881   : > { %2695 = vmatpush1.bf16.msra.mxu1 %v4146_v0  ;;  %2736 = vmatpush1.bf16.msra.mxu0 %v4148_v1  ;;  %v4600_v0 = vld [vmem:[%s6214_s10 + $0x1d4] ss:$8 sps:$4 sm:$0xff]   ;;  %v4595_v1 = vld [vmem:[%s6214_s10 + $0xd0] ss:$8 sps:$4 sm:$0xff]  }
 0x882   : > { %3606 = vmatprep.subr.bf16.mxu1 %v4519_v20  ;;  %3647 = vmatprep.subr.bf16.mxu0 %v4522_v45  ;;  %v4598_v20 = vld [vmem:[%s6214_s10 + $0x1d0] ss:$8 sps:$4 sm:$0xff]   ;;  %v4603_v45 = vld [vmem:[%s6214_s10 + $0xe4] ss:$8 sps:$4 sm:$0xff]  }
 0x884   : > { %2697 = vmatmul.mubr.bf16.vlgmr.msra.gmra.mrb[28].mxu1 %v5568_v56  ;;  %2738 = vmatmul.mubr.bf16.vlgmr.msra.gmra.mrb[16].mxu0 %v5568_v56  ;;  %v4534_v56 = vld [vmem:[%s6214_s10 + $0x124] ss:$8 sps:$4 sm:$0xff]  }
 0x885   : > { %3607 = vmatpush1.bf16.msra.mxu1 %v4517_v2  ;;  %3648 = vmatpush1.bf16.msra.mxu0 %v4520_v5  ;;  %v4606_v2 = vld [vmem:[%s6214_s10 + $0x1e4] ss:$8 sps:$4 sm:$0xff]   ;;  %v4601_v5 = vld [vmem:[%s6214_s10 + $0xe0] ss:$8 sps:$4 sm:$0xff]  }
 0x886   : > { %3608 = vmatprep.subr.bf16.mxu1 %v4525_v11  ;;  %3649 = vmatprep.subr.bf16.mxu0 %v4528_v12  ;;  %v4604_v11 = vld [vmem:[%s6214_s10 + $0x1e0] ss:$8 sps:$4 sm:$0xff]   ;;  %v4609_v12 = vld [vmem:[%s6214_s10 + $0xf4] ss:$8 sps:$4 sm:$0xff]  }
 0x889   : > { %3609 = vmatpush1.bf16.msra.mxu1 %v4523_v4  ;;  %3650 = vmatpush1.bf16.msra.mxu0 %v4526_v13  ;;  %v4612_v4 = vld [vmem:[%s6214_s10 + $0x1f4] ss:$8 sps:$4 sm:$0xff]   ;;  %v4607_v13 = vld [vmem:[%s6214_s10 + $0xf0] ss:$8 sps:$4 sm:$0xff]  }
 0x88a   : > { %3610 = vmatprep.subr.bf16.mxu1 %v4531_v15  ;;  %3651 = vmatprep.subr.bf16.mxu0 %v4534_v56  ;;  %v4610_v15 = vld [vmem:[%s6214_s10 + $0x1f0] ss:$8 sps:$4 sm:$0xff]   ;;  %v4615_v56 = vld [vmem:[%s6214_s10 + $0x204] ss:$8 sps:$4 sm:$0xff]  }
 0x88d   : > { %3611 = vmatpush1.bf16.msra.mxu1 %v4529_v16  ;;  %3652 = vmatpush1.bf16.msra.mxu0 %v4532_v17  ;;  %v4618_v16 = vld [vmem:[%s6214_s10 + $0x304] ss:$8 sps:$4 sm:$0xff]  }
 0x88e   : > { %3612 = vmatprep.subr.bf16.mxu1 %v4537_v18  ;;  %3653 = vmatprep.subr.bf16.mxu0 %v4540_v19  ;;  %v5943_v17 = vld [vmem:[%s6213_s9] sm:$0xff] }
 0x88f   : > { %v1905_v18 = vrot.slane %v5943_v17, %v5063_v9  ;;  %v1913_v19 = vrot.slane %v5943_v17, %v596_v7 }
 0x891   : > { %3613 = vmatpush1.bf16.msra.mxu1 %v4535_v21  ;;  %3654 = vmatpush1.bf16.msra.mxu0 %v4538_v58  ;;  %v1909_v21 = vrot.slane %v5943_v17, %v5245_v48  ;;  %v1917_v58 = vrot.slane %v5943_v17, %v600_v46 }
 0x892   : > { %3614 = vmatprep.subr.bf16.mxu1 %v4543_v22  ;;  %3655 = vmatprep.subr.bf16.mxu0 %v4546_v23 }
 0x895   : > { %3615 = vmatpush1.bf16.msra.mxu1 %v4541_v24  ;;  %3656 = vmatpush1.bf16.msra.mxu0 %v4544_v25 }
 0x896   : > { %3616 = vmatprep.subr.bf16.mxu1 %v4549_v26  ;;  %3657 = vmatprep.subr.bf16.mxu0 %v4552_v27 }
 0x899   : > { %3617 = vmatpush1.bf16.msra.mxu1 %v4547_v28  ;;  %3658 = vmatpush1.bf16.msra.mxu0 %v4550_v29 }
 0x89a   : > { %3618 = vmatprep.subr.bf16.mxu1 %v4555_v30  ;;  %3659 = vmatprep.subr.bf16.mxu0 %v4558_v31 }
 0x89d   : > { %3619 = vmatpush1.bf16.msra.mxu1 %v4553_v32  ;;  %3660 = vmatpush1.bf16.msra.mxu0 %v4556_v33 }
 0x89e   : > { %3620 = vmatprep.subr.bf16.mxu1 %v4561_v34  ;;  %3661 = vmatprep.subr.bf16.mxu0 %v4564_v35 }
 0x8a1   : > { %3621 = vmatpush1.bf16.msra.mxu1 %v4559_v36  ;;  %3662 = vmatpush1.bf16.msra.mxu0 %v4562_v37 }
 0x8a2   : > { %3622 = vmatprep.subr.bf16.mxu1 %v4567_v40  ;;  %3663 = vmatprep.subr.bf16.mxu0 %v4570_v41 }
 0x8a5   : > { %3623 = vmatpush1.bf16.msra.mxu1 %v4565_v42  ;;  %3664 = vmatpush1.bf16.msra.mxu0 %v4568_v43 }
 0x8a6   : > { %3624 = vmatprep.subr.bf16.mxu1 %v4573_v59  ;;  %3665 = vmatprep.subr.bf16.mxu0 %v4576_v60 }
 0x8a9   : > { %3625 = vmatpush1.bf16.msra.mxu1 %v4571_v44  ;;  %3666 = vmatpush1.bf16.msra.mxu0 %v4574_v47 }
 0x8aa   : > { %3626 = vmatprep.subr.bf16.mxu1 %v4579_v49  ;;  %3667 = vmatprep.subr.bf16.mxu0 %v4582_v50 }
 0x8ad   : > { %3627 = vmatpush1.bf16.msra.mxu1 %v4577_v53  ;;  %3668 = vmatpush1.bf16.msra.mxu0 %v4580_v38 }
 0x8ae   : > { %3628 = vmatprep.subr.bf16.mxu1 %v4585_v39  ;;  %3669 = vmatprep.subr.bf16.mxu0 %v4588_v54 }
 0x8b1   : > { %3629 = vmatpush1.bf16.msra.mxu1 %v4583_v55  ;;  %3670 = vmatpush1.bf16.msra.mxu0 %v4586_v14 }
 0x8b2   : > { %3630 = vmatprep.subr.bf16.mxu1 %v4591_v8  ;;  %3671 = vmatprep.subr.bf16.mxu0 %v4594_v57 }
 0x8b5   : > { %3631 = vmatpush1.bf16.msra.mxu1 %v4589_v61  ;;  %3672 = vmatpush1.bf16.msra.mxu0 %v4592_v62 }
 0x8b6   : > { %3632 = vmatprep.subr.bf16.mxu1 %v4597_v63  ;;  %3673 = vmatprep.subr.bf16.mxu0 %v4600_v0 }
 0x8b9   : > { %3633 = vmatpush1.bf16.msra.mxu1 %v4595_v1  ;;  %3674 = vmatpush1.bf16.msra.mxu0 %v4598_v20 }
 0x8ba   : > { %3634 = vmatprep.subr.bf16.mxu1 %v4603_v45  ;;  %3675 = vmatprep.subr.bf16.mxu0 %v4606_v2 }
 0x8bd   : > { %3635 = vmatpush1.bf16.msra.mxu1 %v4601_v5  ;;  %3676 = vmatpush1.bf16.msra.mxu0 %v4604_v11 }
 0x8be   : > { %3636 = vmatprep.subr.bf16.mxu1 %v4609_v12  ;;  %3677 = vmatprep.subr.bf16.mxu0 %v4612_v4 }
 0x8c1   : > { %3637 = vmatpush1.bf16.msra.mxu1 %v4607_v13  ;;  %3678 = vmatpush1.bf16.msra.mxu0 %v4610_v15  ;;  %v4613_v13 = vld [vmem:[%s6214_s10 + $0x200] ss:$8 sps:$4 sm:$0xff]  }
 0x8c2   : > { %3688 = vmatprep.subr.bf16.mxu1 %v4615_v56  ;;  %3729 = vmatprep.subr.bf16.mxu0 %v4618_v16  ;;  %v4616_v16 = vld [vmem:[%s6214_s10 + $0x300] ss:$8 sps:$4 sm:$0xff]  }
 0x917   : > { %v2616_v22 = vpop.f32.mrb[24].mxu1  ;;  %v2657_v23 = vpop.f32.mrb[12].mxu0 }
 0x918   : > { %v2617_v24 = vadd.f32 %v2616_v22, %v1905_v18  ;;  %v2658_v25 = vadd.f32 %v2657_v23, %v1913_v19  ;;  %v2618_v26 = vpop.f32.mrb[25].mxu1  ;;  %v2659_v27 = vpop.f32.mrb[13].mxu0  ;;  %v4621_v19 = vld [vmem:[%s6214_s10 + $0x214] ss:$8 sps:$4 sm:$0xff]   ;;  %v4619_v22 = vld [vmem:[%s6214_s10 + $0x210] ss:$8 sps:$4 sm:$0xff]  }
 0x919   : > { %v2619_v28 = vadd.f32 %v2618_v26, %v1909_v21  ;;  %v2660_v29 = vadd.f32 %v2659_v27, %v1917_v58  ;;  %v2620_v30 = vpop.f32.mrb[26].mxu1  ;;  %v2661_v31 = vpop.f32.mrb[14].mxu0  ;;  %v4624_v58 = vld [vmem:[%s6214_s10 + $0x314] ss:$8 sps:$4 sm:$0xff]   ;;  %v4622_v23 = vld [vmem:[%s6214_s10 + $0x310] ss:$8 sps:$4 sm:$0xff]  }
 0x91a   : > { %v2754_v32 = vmul.f32 0.044715, %v2617_v24  ;;  %v2756_v33 = vmul.f32 0.044715, %v2658_v25  ;;  %v2621_v7 = vpop.f32.mrb[27].mxu1  ;;  %v2662_v34 = vpop.f32.mrb[15].mxu0 }
 0x91b   : > { %v2755_v35 = vmul.f32 0.044715, %v2619_v28  ;;  %v2757_v36 = vmul.f32 0.044715, %v2660_v29  ;;  %v2746_v8 = vmul.f32 0.5, %v2617_v24  ;;  %v2747_v62 = vmul.f32 0.5, %v2619_v28 }
 0x91c   : > { %v2762_v37 = vmul.f32 %v2754_v32, %v2617_v24  ;;  %v2764_v40 = vmul.f32 %v2756_v33, %v2658_v25  ;;  %v2749_v1 = vmul.f32 0.5, %v2660_v29  ;;  %v2748_v5 = vmul.f32 0.5, %v2658_v25  ;;  %v4625_v26 = vld [vmem:[%s6214_s10 + $0x220] ss:$8 sps:$4 sm:$0xff]   ;;  %v4631_v30 = vld [vmem:[%s6214_s10 + $0x230] ss:$8 sps:$4 sm:$0xff]  }
 0x91d   : > { %v2763_v41 = vmul.f32 %v2755_v35, %v2619_v28  ;;  %v2765_v46 = vmul.f32 %v2757_v36, %v2660_v29  ;;  %v4628_v27 = vld [vmem:[%s6214_s10 + $0x320] ss:$8 sps:$4 sm:$0xff]   ;;  %v4634_v31 = vld [vmem:[%s6214_s10 + $0x330] ss:$8 sps:$4 sm:$0xff]   ;;  %v4639_v32 = vld [vmem:[%s6214_s10 + $0x244] ss:$8 sps:$4 sm:$0xff]  }
 0x91e   : > { %v2770_v42 = vmul.f32 %v2762_v37, %v2617_v24  ;;  %v2772_v43 = vmul.f32 %v2764_v40, %v2658_v25  ;;  %v4642_v33 = vld [vmem:[%s6214_s10 + $0x344] ss:$8 sps:$4 sm:$0xff]   ;;  %v4637_v7 = vld [vmem:[%s6214_s10 + $0x240] ss:$8 sps:$4 sm:$0xff]   ;;  %v4645_v35 = vld [vmem:[%s6214_s10 + $0x254] ss:$8 sps:$4 sm:$0xff]  }
 0x91f   : > { %v2771_v59 = vmul.f32 %v2763_v41, %v2619_v28  ;;  %v2773_v60 = vmul.f32 %v2765_v46, %v2660_v29  ;;  %v4640_v34 = vld [vmem:[%s6214_s10 + $0x340] ss:$8 sps:$4 sm:$0xff]   ;;  %v4648_v36 = vld [vmem:[%s6214_s10 + $0x354] ss:$8 sps:$4 sm:$0xff]   ;;  %v4643_v37 = vld [vmem:[%s6214_s10 + $0x250] ss:$8 sps:$4 sm:$0xff]  }
 0x920   : > { %v2778_v44 = vadd.f32 %v2770_v42, %v2617_v24  ;;  %v2780_v47 = vadd.f32 %v2772_v43, %v2658_v25  ;;  %v4627_v24 = vld [vmem:[%s6214_s10 + $0x224] ss:$8 sps:$4 sm:$0xff]   ;;  %v4646_v40 = vld [vmem:[%s6214_s10 + $0x350] ss:$8 sps:$4 sm:$0xff]   ;;  %v4649_v42 = vld [vmem:[%s6214_s10 + $0x260] ss:$8 sps:$4 sm:$0xff]  }
 0x921   : > { %v2779_v49 = vadd.f32 %v2771_v59, %v2619_v28  ;;  %v2781_v50 = vadd.f32 %v2773_v60, %v2660_v29  ;;  %v4630_v25 = vld [vmem:[%s6214_s10 + $0x324] ss:$8 sps:$4 sm:$0xff]   ;;  %v4633_v28 = vld [vmem:[%s6214_s10 + $0x234] ss:$8 sps:$4 sm:$0xff]   ;;  %v4652_v43 = vld [vmem:[%s6214_s10 + $0x360] ss:$8 sps:$4 sm:$0xff]  }
 0x922   : > { %v2786_v53 = vmul.f32 0.7978846, %v2778_v44  ;;  %v2788_v54 = vmul.f32 0.7978846, %v2780_v47  ;;  %v4636_v29 = vld [vmem:[%s6214_s10 + $0x334] ss:$8 sps:$4 sm:$0xff]  }
 0x923   : > { %v2787_v38 = vmul.f32 0.7978846, %v2779_v49  ;;  %v2789_v39 = vmul.f32 0.7978846, %v2781_v50  ;;  %v4651_v41 = vld [vmem:[%s6214_s10 + $0x264] ss:$8 sps:$4 sm:$0xff]  }
 0x924   : > { %4719 = vtanh.f32 %v2786_v53  ;;  %v4654_v46 = vld [vmem:[%s6214_s10 + $0x364] ss:$8 sps:$4 sm:$0xff]   ;;  %v4657_v59 = vld [vmem:[%s6214_s10 + $0x274] ss:$8 sps:$4 sm:$0xff]   ;;  %v4655_v44 = vld [vmem:[%s6214_s10 + $0x270] ss:$8 sps:$4 sm:$0xff]  }
 0x925   : > { %4721 = vtanh.f32 %v2787_v38  ;;  %v4660_v60 = vld [vmem:[%s6214_s10 + $0x374] ss:$8 sps:$4 sm:$0xff]   ;;  %v1928_v47 = vsub.s32 6, %v5054_v6  ;;  %v4658_v49 = vld [vmem:[%s6214_s10 + $0x370] ss:$8 sps:$4 sm:$0xff]   ;;  %v1932_v53 = vsub.s32 7, %v5054_v6 }
 0x926   : > { %4723 = vtanh.f32 %v2789_v39  ;;  %v4663_v50 = vld [vmem:[%s6214_s10 + $0x284] ss:$8 sps:$4 sm:$0xff]   ;;  %v1921_v39 = vrot.slane %v5943_v17, %v604_v3  ;;  %v4669_v3 = vld [vmem:[%s6214_s10 + $0x294] ss:$8 sps:$4 sm:$0xff]  }
 0x927   : > { %4725 = vtanh.f32 %v2788_v54  ;;  %v4666_v38 = vld [vmem:[%s6214_s10 + $0x384] ss:$8 sps:$4 sm:$0xff]   ;;  %v1929_v54 = vrot.slane %v5943_v17, %v1928_v47  ;;  %v4696_v47 = vld [vmem:[%s6214_s10 + $0x3d4] ss:$8 sps:$4 sm:$0xff]  }
 0x92e   : > { %v4720_v55 = vpop.eup %4719 }
 0x92f   : > { %v4722_v14 = vpop.eup %4721  ;;  %v2802_v57 = vadd.f32 1.0, %v4720_v55  ;;  %v4661_v55 = vld [vmem:[%s6214_s10 + $0x280] ss:$8 sps:$4 sm:$0xff]  }
 0x930   : > { %v4724_v61 = vpop.eup %4723  ;;  %v2803_v63 = vadd.f32 1.0, %v4722_v14  ;;  %v4664_v14 = vld [vmem:[%s6214_s10 + $0x380] ss:$8 sps:$4 sm:$0xff]  }
 0x931   : > { %v4726_v0 = vpop.eup %4725  ;;  %v2805_v20 = vadd.f32 1.0, %v4724_v61  ;;  %v2810_v45 = vmul.f32 %v2802_v57, %v2746_v8  ;;  %v1925_v8 = vrot.slane %v5943_v17, %v608_v10  ;;  %v1933_v57 = vrot.slane %v5943_v17, %v1932_v53  ;;  %v4672_v61 = vld [vmem:[%s6214_s10 + $0x394] ss:$8 sps:$4 sm:$0xff]   ;;  %v4667_v10 = vld [vmem:[%s6214_s10 + $0x290] ss:$8 sps:$4 sm:$0xff]  }
 0x932   : > { %v2811_v2 = vmul.f32 %v2803_v63, %v2747_v62  ;;  %v2804_v11 = vadd.f32 1.0, %v4726_v0  ;;  %v4670_v17 = vld [vmem:[%s6214_s10 + $0x390] ss:$8 sps:$4 sm:$0xff]   ;;  %v4699_v53 = vld [vmem:[%s6214_s10 + $0x2e4] ss:$8 sps:$4 sm:$0xff]  }
 0x933   : > { %v2813_v12 = vmul.f32 %v2805_v20, %v2749_v1  ;;  %v2818_v18 = vpack.c.bf16 %v2810_v45, %v2810_v45 }
 0x934   : > { %v2819_v4 = vpack.c.bf16 %v2811_v2, %v2811_v2  ;;  %v2812_v15 = vmul.f32 %v2804_v11, %v2748_v5 }
 0x935   : > { %v2821_v56 = vpack.c.bf16 %v2813_v12, %v2813_v12  ;;  %v4675_v12 = vld [vmem:[%s6214_s10 + $0x2a4] ss:$8 sps:$4 sm:$0xff]  }
 0x936   : > { %3638 = vmatprep.mubr.bf16.mxu1 %v2819_v4  ;;  %v2820_v21 = vpack.c.bf16 %v2812_v15, %v2812_v15  ;;  %v4678_v4 = vld [vmem:[%s6214_s10 + $0x3a4] ss:$8 sps:$4 sm:$0xff]  }
 0x937   : > { %3679 = vmatprep.mubr.bf16.mxu0 %v2821_v56  ;;  %3639 = vmatmul.mubr.bf16.vlgmr.msra.gmra.mrb[32].mxu1 %v2818_v18 }
 0x938   : > { %3680 = vmatmul.mubr.bf16.vlgmr.msra.gmra.mrb[20].mxu0 %v2820_v21  ;;  %3689 = vmatpush1.bf16.msra.mxu1 %v4613_v13 }
 0x939   : > { %3730 = vmatpush1.bf16.msra.mxu0 %v4616_v16  ;;  %3690 = vmatprep.subr.bf16.mxu1 %v4621_v19 }
 0x93a   : > { %3731 = vmatprep.subr.bf16.mxu0 %v4624_v58 }
 0x93c   : > { %3691 = vmatpush1.bf16.msra.mxu1 %v4619_v22  ;;  %v4673_v22 = vld [vmem:[%s6214_s10 + $0x2a0] ss:$8 sps:$4 sm:$0xff]  }
 0x93d   : > { %3732 = vmatpush1.bf16.msra.mxu0 %v4622_v23  ;;  %3692 = vmatprep.subr.bf16.mxu1 %v4627_v24 }
 0x93e   : > { %3733 = vmatprep.subr.bf16.mxu0 %v4630_v25  ;;  %v4676_v25 = vld [vmem:[%s6214_s10 + $0x3a0] ss:$8 sps:$4 sm:$0xff]  }
 0x940   : > { %3693 = vmatpush1.bf16.msra.mxu1 %v4625_v26  ;;  %v4681_v26 = vld [vmem:[%s6214_s10 + $0x2b4] ss:$8 sps:$4 sm:$0xff]  }
 0x941   : > { %3734 = vmatpush1.bf16.msra.mxu0 %v4628_v27  ;;  %3694 = vmatprep.subr.bf16.mxu1 %v4633_v28 }
 0x942   : > { %3735 = vmatprep.subr.bf16.mxu0 %v4636_v29  ;;  %v4684_v29 = vld [vmem:[%s6214_s10 + $0x3b4] ss:$8 sps:$4 sm:$0xff]  }
 0x944   : > { %3695 = vmatpush1.bf16.msra.mxu1 %v4631_v30 }
 0x945   : > { %3736 = vmatpush1.bf16.msra.mxu0 %v4634_v31  ;;  %3696 = vmatprep.subr.bf16.mxu1 %v4639_v32 }
 0x946   : > { %3737 = vmatprep.subr.bf16.mxu0 %v4642_v33 }
 0x948   : > { %3697 = vmatpush1.bf16.msra.mxu1 %v4637_v7  ;;  %v4679_v7 = vld [vmem:[%s6214_s10 + $0x2b0] ss:$8 sps:$4 sm:$0xff]  }
 0x949   : > { %3738 = vmatpush1.bf16.msra.mxu0 %v4640_v34  ;;  %3698 = vmatprep.subr.bf16.mxu1 %v4645_v35  ;;  %v4682_v34 = vld [vmem:[%s6214_s10 + $0x3b0] ss:$8 sps:$4 sm:$0xff]   ;;  %v4687_v35 = vld [vmem:[%s6214_s10 + $0x2c4] ss:$8 sps:$4 sm:$0xff]  }
 0x94a   : > { %3739 = vmatprep.subr.bf16.mxu0 %v4648_v36 }
 0x94c   : > { %3699 = vmatpush1.bf16.msra.mxu1 %v4643_v37 }
 0x94d   : > { %3740 = vmatpush1.bf16.msra.mxu0 %v4646_v40  ;;  %3700 = vmatprep.subr.bf16.mxu1 %v4651_v41  ;;  %v4690_v40 = vld [vmem:[%s6214_s10 + $0x3c4] ss:$8 sps:$4 sm:$0xff]  }
 0x94e   : > { %3741 = vmatprep.subr.bf16.mxu0 %v4654_v46 }
 0x950   : > { %3701 = vmatpush1.bf16.msra.mxu1 %v4649_v42 }
 0x951   : > { %3742 = vmatpush1.bf16.msra.mxu0 %v4652_v43  ;;  %3702 = vmatprep.subr.bf16.mxu1 %v4657_v59  ;;  %v4685_v59 = vld [vmem:[%s6214_s10 + $0x2c0] ss:$8 sps:$4 sm:$0xff]  }
 0x952   : > { %3743 = vmatprep.subr.bf16.mxu0 %v4660_v60  ;;  %v4688_v60 = vld [vmem:[%s6214_s10 + $0x3c0] ss:$8 sps:$4 sm:$0xff]  }
 0x954   : > { %3703 = vmatpush1.bf16.msra.mxu1 %v4655_v44  ;;  %v4693_v44 = vld [vmem:[%s6214_s10 + $0x2d4] ss:$8 sps:$4 sm:$0xff]  }
 0x955   : > { %3744 = vmatpush1.bf16.msra.mxu0 %v4658_v49  ;;  %3704 = vmatprep.subr.bf16.mxu1 %v4663_v50  ;;  %v4691_v49 = vld [vmem:[%s6214_s10 + $0x2d0] ss:$8 sps:$4 sm:$0xff]  }
 0x956   : > { %3745 = vmatprep.subr.bf16.mxu0 %v4666_v38  ;;  %v4694_v50 = vld [vmem:[%s6214_s10 + $0x3d0] ss:$8 sps:$4 sm:$0xff]   ;;  %v4702_v38 = vld [vmem:[%s6214_s10 + $0x3e4] ss:$8 sps:$4 sm:$0xff]  }
 0x957   : > { %v2698_v62 = vpop.f32.mrb[28].mxu1  ;;  %v2739_v63 = vpop.f32.mrb[16].mxu0 }
 0x958   : > { %v6073_v0 = vadd.f32 %v2698_v62, %v1921_v39  ;;  %v6075_v1 = vadd.f32 %v2739_v63, %v1929_v54  ;;  %v2700_v6 = vpop.f32.mrb[29].mxu1  ;;  %v2741_v20 = vpop.f32.mrb[17].mxu0  ;;  %3705 = vmatpush1.bf16.msra.mxu1 %v4661_v55  ;;  %v4697_v39 = vld [vmem:[%s6214_s10 + $0x2e0] ss:$8 sps:$4 sm:$0xff]   ;;  %v4705_v55 = vld [vmem:[%s6214_s10 + $0x2f4] ss:$8 sps:$4 sm:$0xff]  }
 0x959   : > { %v6083_v45 = vadd.f32 %v2700_v6, %v1925_v8  ;;  %v6085_v2 = vadd.f32 %v2741_v20, %v1933_v57  ;;  %3746 = vmatpush1.bf16.msra.mxu0 %v4664_v14  ;;  %v2702_v5 = vpop.f32.mrb[30].mxu1  ;;  %v2743_v11 = vpop.f32.mrb[18].mxu0  ;;  %3706 = vmatprep.subr.bf16.mxu1 %v4669_v3  ;;  %v4700_v54 = vld [vmem:[%s6214_s10 + $0x3e0] ss:$8 sps:$4 sm:$0xff]   ;;  %v4708_v8 = vld [vmem:[%s6214_s10 + $0x3f4] ss:$8 sps:$4 sm:$0xff]  }
 0x95a   : > { %v2758_v13 = vmul.f32 0.044715, %v6073_v0  ;;  %v2760_v15 = vmul.f32 0.044715, %v6075_v1  ;;  %v2703_v56 = vpop.f32.mrb[31].mxu1  ;;  %v2744_v16 = vpop.f32.mrb[19].mxu0  ;;  %3747 = vmatprep.subr.bf16.mxu0 %v4672_v61 }
 0x95b   : > { %v2759_v18 = vmul.f32 0.044715, %v6083_v45  ;;  %v2761_v19 = vmul.f32 0.044715, %v6085_v2  ;;  %v2750_v3 = vmul.f32 0.5, %v6073_v0  ;;  %v2751_v6 = vmul.f32 0.5, %v6083_v45 }
 0x95c   : > { %v2766_v21 = vmul.f32 %v2758_v13, %v6073_v0  ;;  %v2768_v58 = vmul.f32 %v2760_v15, %v6075_v1  ;;  %3707 = vmatpush1.bf16.msra.mxu1 %v4667_v10  ;;  %v4703_v63 = vld [vmem:[%s6214_s10 + $0x2f0] ss:$8 sps:$4 sm:$0xff]   ;;  %v2753_v5 = vmul.f32 0.5, %v6085_v2 }
 0x95d   : > { %v2767_v23 = vmul.f32 %v2759_v18, %v6083_v45  ;;  %v2769_v24 = vmul.f32 %v2761_v19, %v6085_v2  ;;  %3748 = vmatpush1.bf16.msra.mxu0 %v4670_v17  ;;  %3708 = vmatprep.subr.bf16.mxu1 %v4675_v12  ;;  %v4706_v17 = vld [vmem:[%s6214_s10 + $0x3f0] ss:$8 sps:$4 sm:$0xff]  }
 0x95e   : > { %v2774_v27 = vmul.f32 %v2766_v21, %v6073_v0  ;;  %v2776_v28 = vmul.f32 %v2768_v58, %v6075_v1  ;;  %3749 = vmatprep.subr.bf16.mxu0 %v4678_v4  ;;  %v2752_v4 = vmul.f32 0.5, %v6075_v1 }
 0x95f   : > { %v2775_v30 = vmul.f32 %v2767_v23, %v6083_v45  ;;  %v2777_v31 = vmul.f32 %v2769_v24, %v6085_v2 }
 0x960   : > { %v2782_v32 = vadd.f32 %v2774_v27, %v6073_v0  ;;  %v2784_v33 = vadd.f32 %v2776_v28, %v6075_v1  ;;  %3709 = vmatpush1.bf16.msra.mxu1 %v4673_v22 }
 0x961   : > { %3750 = vmatpush1.bf16.msra.mxu0 %v4676_v25  ;;  %3710 = vmatprep.subr.bf16.mxu1 %v4681_v26  ;;  %v2783_v36 = vadd.f32 %v2775_v30, %v6083_v45  ;;  %v2785_v37 = vadd.f32 %v2777_v31, %v6085_v2  ;;  %v2954_v2 = vld [vmem:[%s6215_s11] sm:$0x3] }
 0x962   : > { %3751 = vmatprep.subr.bf16.mxu0 %v4684_v29  ;;  %v2790_v41 = vmul.f32 0.7978846, %v2782_v32  ;;  %v2792_v43 = vmul.f32 0.7978846, %v2784_v33  ;;  %v2959_v21 = vrot.slane %v2954_v2, %v5063_v9  ;;  %v2963_v1 = vrot.slane %v2954_v2, %v5245_v48 }
 0x963   : > { %v2791_v46 = vmul.f32 0.7978846, %v2783_v36  ;;  %v2793_v42 = vmul.f32 0.7978846, %v2785_v37 }
 0x964   : > { %3711 = vmatpush1.bf16.msra.mxu1 %v4679_v7  ;;  %4727 = vtanh.f32 %v2790_v41 }
 0x965   : > { %3752 = vmatpush1.bf16.msra.mxu0 %v4682_v34  ;;  %3712 = vmatprep.subr.bf16.mxu1 %v4687_v35  ;;  %4729 = vtanh.f32 %v2791_v46 }
 0x966   : > { %3753 = vmatprep.subr.bf16.mxu0 %v4690_v40  ;;  %4731 = vtanh.f32 %v2793_v42 }
 0x967   : > { %4733 = vtanh.f32 %v2792_v43 }
 0x968   : > { %3713 = vmatpush1.bf16.msra.mxu1 %v4685_v59 }
 0x969   : > { %3754 = vmatpush1.bf16.msra.mxu0 %v4688_v60  ;;  %3714 = vmatprep.subr.bf16.mxu1 %v4693_v44 }
 0x96a   : > { %3755 = vmatprep.subr.bf16.mxu0 %v4696_v47 }
 0x96c   : > { %3715 = vmatpush1.bf16.msra.mxu1 %v4691_v49 }
 0x96d   : > { %3756 = vmatpush1.bf16.msra.mxu0 %v4694_v50  ;;  %3716 = vmatprep.subr.bf16.mxu1 %v4699_v53 }
 0x96e   : > { %v4728_v14 = vpop.eup %4727  ;;  %3757 = vmatprep.subr.bf16.mxu0 %v4702_v38 }
 0x96f   : > { %v4730_v57 = vpop.eup %4729  ;;  %v2806_v61 = vadd.f32 1.0, %v4728_v14 }
 0x970   : > { %v4732_v62 = vpop.eup %4731  ;;  %3717 = vmatpush1.bf16.msra.mxu1 %v4697_v39  ;;  %v2807_v20 = vadd.f32 1.0, %v4730_v57 }
 0x971   : > { %v4734_v10 = vpop.eup %4733  ;;  %3758 = vmatpush1.bf16.msra.mxu0 %v4700_v54  ;;  %3718 = vmatprep.subr.bf16.mxu1 %v4705_v55  ;;  %v2809_v0 = vadd.f32 1.0, %v4732_v62  ;;  %v2814_v11 = vmul.f32 %v2806_v61, %v2750_v3 }
 0x972   : > { %3759 = vmatprep.subr.bf16.mxu0 %v4708_v8  ;;  %v2815_v12 = vmul.f32 %v2807_v20, %v2751_v6  ;;  %v2808_v13 = vadd.f32 1.0, %v4734_v10 }
 0x973   : > { %v2817_v15 = vmul.f32 %v2809_v0, %v2753_v5  ;;  %v2822_v18 = vpack.c.bf16 %v2814_v11, %v2814_v11 }
 0x974   : > { %3719 = vmatpush1.bf16.msra.mxu1 %v4703_v63  ;;  %v2823_v45 = vpack.c.bf16 %v2815_v12, %v2815_v12  ;;  %v2816_v56 = vmul.f32 %v2808_v13, %v2752_v4 }
 0x975   : > { %3760 = vmatpush1.bf16.msra.mxu0 %v4706_v17  ;;  %v2825_v16 = vpack.c.bf16 %v2817_v15, %v2817_v15 }
 0x976   : > { %3720 = vmatprep.mubr.bf16.mxu1 %v2823_v45  ;;  %v2824_v19 = vpack.c.bf16 %v2816_v56, %v2816_v56 }
 0x977   : > { %3761 = vmatprep.mubr.bf16.mxu0 %v2825_v16  ;;  %3721 = vmatmul.mubr.bf16.vlgmr.msra.gmra.mrb[36].mxu1 %v2822_v18 }
 0x978   : > { %3762 = vmatmul.mubr.bf16.vlgmr.msra.gmra.mrb[24].mxu0 %v2824_v19 }
 0xa0a   : > { %v3640_v58 = vpop.f32.mrb[32].mxu1 }
 0xa0b   : > { %v3641_v22 = vadd.f32 %v3640_v58, %v2959_v21  ;;  %v3681_v23 = vpop.f32.mrb[20].mxu0  ;;  %v3642_v24 = vpop.f32.mrb[33].mxu1 }
 0xa0c   : > { %v3643_v25 = vadd.f32 %v3642_v24, %v2963_v1  ;;  %v3683_v26 = vpop.f32.mrb[21].mxu0  ;;  %v3644_v27 = vpop.f32.mrb[34].mxu1 }
 0xa0d   : > { %v3682_v28 = vadd.f32 %v3681_v23, %v3641_v22  ;;  %v3685_v29 = vpop.f32.mrb[22].mxu0  ;;  %v3645_v30 = vpop.f32.mrb[35].mxu1 }
 0xa0e   : > { %v3684_v31 = vadd.f32 %v3683_v26, %v3643_v25  ;;  %v3686_v32 = vpop.f32.mrb[23].mxu0 }
 0xa4a   : > { %v3722_v33 = vpop.f32.mrb[36].mxu1 }
 0xa4b   : > { %v3723_v7 = vadd.f32 %v3722_v33, %v3682_v28  ;;  %v3763_v34 = vpop.f32.mrb[24].mxu0  ;;  %v3724_v35 = vpop.f32.mrb[37].mxu1 }
 0xa4c   : > { %v3725_v36 = vadd.f32 %v3724_v35, %v3684_v31  ;;  %v3765_v37 = vpop.f32.mrb[25].mxu0  ;;  %v3726_v40 = vpop.f32.mrb[38].mxu1 }
 0xa4d   : > { %v3764_v41 = vadd.f32 %v3763_v34, %v3723_v7  ;;  %v3767_v46 = vpop.f32.mrb[26].mxu0  ;;  %v3727_v42 = vpop.f32.mrb[39].mxu1 }
 0xa4e   : > { %v3766_v43 = vadd.f32 %v3765_v37, %v3725_v36  ;;  %v3768_v59 = vpop.f32.mrb[27].mxu0 }
 0xa4f   : > { %v3770_v60 = vadd.f32 %v3764_v41, %v5550_v52  ;;  %v3772_v52 = vld [vmem:[%s6216_s12] sm:$0x3] }
 0xa50   : > { %v3771_v44 = vadd.f32 %v3766_v43, %v5548_v51  ;;  %v3773_v51 = vld [vmem:[%s6217_s13] sm:$0x3]  ;;  %v3794_v3 = vrot.slane %v3772_v52, %v5063_v9  ;;  %v3798_v61 = vrot.slane %v3772_v52, %v5245_v48 }
 0xa51   : > { %v3807_v63 = vrot.slane %v3773_v51, %v5063_v9  ;;  %v3811_v6 = vrot.slane %v3773_v51, %v5245_v48 }
 0xa52   : > { %v3774_v47 = vadd.f32 %v3771_v44, %v3770_v60 }
 0xa54   : > { %3775 = vadd.xlane.f32.xlu0 %v3774_v47 }
 0xae1   : > { %v3776_v49 = vpop.xlane.xlu0 %3775 }
 0xae2   : > { %v3777_v50 = vmul.f32 0.00390625, %v3776_v49 }
 0xae4   : > { %v3778_v53 = vsub.f32 %v3770_v60, %v3777_v50  ;;  %v3779_v38 = vsub.f32 %v3771_v44, %v3777_v50 }
 0xae6   : > { %v3780_v39 = vmul.f32 %v3778_v53, %v3778_v53  ;;  %v3781_v54 = vmul.f32 %v3779_v38, %v3779_v38 }
 0xae8   : > { %v3782_v55 = vadd.f32 %v3781_v54, %v3780_v39 }
 0xaea   : > { %3783 = vadd.xlane.f32.xlu1 %v3782_v55 }
 0xb77   : > { %v3784_v14 = vpop.xlane.xlu1 %3783 }
 0xb78   : > { %v3785_v8 = vmul.f32 0.00390625, %v3784_v14 }
 0xb7a   : > { %v3786_v57 = vadd.f32 1e-12, %v3785_v8 }
 0xb7c   : > { %4735 = vrsqrt.f32 %v3786_v57 }
 0xb86   : > { %v4736_v62 = vpop.eup %4735 }
 0xb87   : > { %v3788_v20 = vmul.f32 %v4736_v62, %v3778_v53  ;;  %v3789_v10 = vmul.f32 %v4736_v62, %v3779_v38 }
 0xb89   : > { %v3801_v17 = vmul.f32 %v3794_v3, %v3788_v20  ;;  %v3802_v5 = vmul.f32 %v3798_v61, %v3789_v10 }
 0xb8b   : > { %v3814_v0 = vadd.f32 %v3807_v63, %v3801_v17  ;;  %v3815_v11 = vadd.f32 %v3811_v6, %v3802_v5 }
 0xb8d   : > { %3816 = vst [vmem:[%s481_s26] sm:$0xff] %v3814_v0  ;;  %3817 = vst [vmem:[%s481_s26 + $0x8] sm:$0xff] %v3815_v11 }
 0xb8e PF: > { %s24_s29 = sadd.s32 1, %s4743_s29  }
 0xb8f   : > { %p21_p4 = scmp.ge.s32.totalorder %s24_s29, 4  }
 0xb91   :  { %23 = sbr.rel (!%p21_p4) target bundleno = 1 (0x1), region = 109 }

// kernel: bert_qa_forward.5
= control target key start
LH: loop header
LB: loop body
LE: loop exit
PB: predicated region body
PF: predicated region fallthrough
CT: control target
= control target key end

     0   :  { %s5655_s0 = inlined_call_operand.vmem [shape: f32[2,8,256], index: 0, kind: input, shape index: {}]   ;;  %s5656_s1 = inlined_call_operand.vmem [shape: f32[2,1,8], index: 1, kind: input, shape index: {}]   ;;  %s5657_s2 = inlined_call_operand.vmem [shape: bf16[256,768], index: 2, kind: input, shape index: {}]   ;;  %s5658_s3 = inlined_call_operand.vmem [shape: f32[1,768], index: 3, kind: input, shape index: {}]   ;;  %s5659_s4 = inlined_call_operand.hbm [shape: bf16[256,256], index: 4, kind: input, shape index: {}]   ;;  %s5660_s5 = inlined_call_operand.vmem [shape: f32[1,256], index: 5, kind: input, shape index: {}]   ;;  %s5661_s6 = inlined_call_operand.vmem [shape: f32[1,256], index: 6, kind: input, shape index: {}]   ;;  %s5662_s7 = inlined_call_operand.vmem [shape: f32[1,256], index: 7, kind: input, shape index: {}]   ;;  %s5663_s8 = inlined_call_operand.hbm [shape: bf16[256,1024], index: 8, kind: input, shape index: {}]   ;;  %s5664_s9 = inlined_call_operand.vmem [shape: f32[1,1024], index: 9, kind: input, shape index: {}]   ;;  %s5665_s10 = inlined_call_operand.hbm [shape: bf16[1024,256], index: 10, kind: input, shape index: {}]   ;;  %s5666_s11 = inlined_call_operand.vmem [shape: f32[1,256], index: 11, kind: input, shape index: {}]   ;;  %s5667_s12 = inlined_call_operand.vmem [shape: f32[1,256], index: 12, kind: input, shape index: {}]   ;;  %s5668_s13 = inlined_call_operand.vmem [shape: f32[1,256], index: 13, kind: input, shape index: {}]   ;;  %s5669_s14 = inlined_call_operand.vmem [shape: f32[2,8,256], index: 14, kind: output, shape index: {}]  }
   0x1   :  { %5673 = sst [smem:[#allocation10_spill]] %s5668_s13 }
   0x2   :  { %5674 = sst [smem:[#allocation11_spill]] %s5669_s14 }
   0x3   :  { %19 = vsyncpa [#allocation3], 0 }
   0x4   :  { %20 = vsyncpa [#allocation5], 0  ;;  %s5038_s29 = smov 0  }
   0x5 LB: > { %5675 = sst [smem:[#allocation9_spill]] %s4951_s29  ;;  %s4953_s30 = smov [#allocation4]   ;;  %s4951_s29 = sphi %s5038_s29, %s26_s29  }
   0x6   : > { %s401_s15 = sshll.u32 %s4953_s30, 4  ;;  %s5044_s16 = sadd.s32 4294967295, %s4951_s29   ;;  %s5053_s15 = int_to_ptr.vmem [resolvable:$true] %s401_s15 }
   0x7   : > { %p3959_p0 = scmp.ge.s32.totalorder %s4951_s29, 1  ;;  %p361_p1 = scmp.lt.s32.totalorder %s4951_s29, 3 }
   0x8   : > { %p5671_p2 = scmp.eq.s32.totalorder %s5044_s16, 0  ;;  %s4954_s18 = smov [#allocation2]  }
   0x9   : > { %p5049_p3 = pnand %p3959_p0, %p361_p1  ;;  %s379_s19 = sshll.u32 %s4954_s18, 4  ;;  %s5057_s19 = int_to_ptr.vmem [resolvable:$true] %s379_s19 }
   0xa   : > { %s4955_s21 = smov [#allocation6]   ;;  %s4853_s25 = scalar_lea.hbm %s5663_s8, 16384 }
   0xb   : > { %s5676_s17 = scalar_select %p5049_p3, 1, 0 }
   0xc   : > { %p4407_p4 = pneg %p5049_p3  ;;  %s5065_s22 = sshll.u32 %s4955_s21, 4  ;;  %s418_s22 = int_to_ptr.vmem [resolvable:$true] %s5065_s22 }
   0xd   : > { %p4854_p6 = scmp.ne.s32.totalorder %s5663_s8, %s4853_s25  ;;  %p4860_p10 = scmp.lt.u32.totalorder %s4853_s25, %s5663_s8 }
   0xe   : > { %p5061_p5 = pnand %p5671_p2, %p4407_p4 }
  0x10   : > { %p5075_p7 = pneg %p5061_p5 }
  0x12   : > { %p4856_p8 = pnand %p5075_p7, %p4854_p6 }
  0x14   : > { %p4857_p9 = pneg %p4856_p8 }
  0x16   : > { %p4862_p11 = pnand %p4860_p10, %p4857_p9 }
  0x18   : > { %4865 = shalt.err (!%p4862_p11)
}
  0x19   : > { %s4866_s21 = scalar_lea.vmem %s5053_s15, 16384  ;;  %p4874_p1 = scmp.lt.s32.totalorder %s5053_s15, %s5053_s15 }
  0x1a   : > { %p4867_p12 = scmp.ne.s32.totalorder %s5053_s15, %s4866_s21  ;;  %p4875_p4 = scmp.lt.s32.totalorder %s4866_s21, %s4866_s21 }
  0x1c   : > { %p4869_p13 = pnand %p4867_p12, %p5075_p7  ;;  %p4876_p6 = por %p4875_p4, %p4874_p1 }
  0x1e   : > { %p4870_p0 = pneg %p4869_p13 }
  0x20   : > { %p4877_p8 = pnand %p4876_p6, %p4870_p0 }
  0x22   : > { %4880 = shalt.err (!%p4877_p8)
}
  0x23   : > { %s4956_s23 = smov 512   ;;  %s4957_s24 = smov 32  }
  0x24   : > { %4413 = dma.hbm_to_vmem [thread:$0]  (!%p5061_p5), %s5663_s8, 16384, %s5053_s15, [#allocation5], %s4956_s23, %s4956_s23, %s4957_s24  }
  0x25   : > { %s4881_s18 = scalar_lea.hbm %s5659_s4, 4096 }
  0x26   : > { %p4882_p9 = scmp.ne.s32.totalorder %s5659_s4, %s4881_s18  ;;  %p4888_p12 = scmp.lt.u32.totalorder %s4881_s18, %s5659_s4 }
  0x28   : > { %p4884_p10 = pnand %p4882_p9, %p5075_p7 }
  0x2a   : > { %p4885_p11 = pneg %p4884_p10 }
  0x2c   : > { %p4890_p13 = pnand %p4888_p12, %p4885_p11 }
  0x2e   : > { %4893 = shalt.err (!%p4890_p13)
}
  0x2f   : > { %s4894_s15 = scalar_lea.vmem %s5057_s19, 4096  ;;  %p4902_p6 = scmp.lt.s32.totalorder %s5057_s19, %s5057_s19 }
  0x30   : > { %p4895_p0 = scmp.ne.s32.totalorder %s5057_s19, %s4894_s15  ;;  %p4903_p8 = scmp.lt.s32.totalorder %s4894_s15, %s4894_s15 }
  0x32   : > { %p4897_p1 = pnand %p4895_p0, %p5075_p7  ;;  %p4904_p9 = por %p4903_p8, %p4902_p6 }
  0x34   : > { %p4898_p4 = pneg %p4897_p1 }
  0x36   : > { %p4905_p10 = pnand %p4904_p9, %p4898_p4 }
  0x38   : > { %4908 = shalt.err (!%p4905_p10)
}
  0x39   : > { %s4958_s14 = smov 128   ;;  %s4959_s13 = smov 8  }
  0x3a   : > { %4410 = dma.hbm_to_vmem [thread:$0]  (!%p5061_p5), %s5659_s4, 4096, %s5057_s19, [#allocation3], %s4958_s14, %s4958_s14, %s4959_s13  }
  0x3b   : > { %s4909_s26 = scalar_lea.hbm %s5665_s10, 16384 }
  0x3c   : > { %p4910_p11 = scmp.ne.s32.totalorder %s5665_s10, %s4909_s26  ;;  %p4916_p0 = scmp.lt.u32.totalorder %s4909_s26, %s5665_s10 }
  0x3e   : > { %p4912_p12 = pnand %p4910_p11, %p5075_p7 }
  0x40   : > { %p4913_p13 = pneg %p4912_p12 }
  0x42   : > { %p4918_p1 = pnand %p4916_p0, %p4913_p13 }
  0x44   : > { %4921 = shalt.err (!%p4918_p1)
}
  0x45   : > { %s4922_s15 = scalar_lea.vmem %s418_s22, 16384  ;;  %p4930_p9 = scmp.lt.s32.totalorder %s418_s22, %s418_s22 }
  0x46   : > { %p4923_p4 = scmp.ne.s32.totalorder %s418_s22, %s4922_s15  ;;  %p4931_p10 = scmp.lt.s32.totalorder %s4922_s15, %s4922_s15 }
  0x48   : > { %p4925_p6 = pnand %p4923_p4, %p5075_p7  ;;  %p4932_p2 = por %p4931_p10, %p4930_p9 }
  0x4a   : > { %p4926_p8 = pneg %p4925_p6 }
  0x4c   : > { %p4933_p3 = pnand %p4932_p2, %p4926_p8 }
  0x4e   : > { %4936 = shalt.err (!%p4933_p3)
}
  0x4f   : > { %4416 = dma.hbm_to_vmem [thread:$0]  (!%p5061_p5), %s5665_s10, 16384, %s418_s22, [#allocation5], %s4958_s14, %s4958_s14, %s4959_s13  }
  0x50   : > { %p5679_p11 = scmp.ne.s32.totalorder %s5676_s17, 0 }
  0x51   : > { %p5680_p12 = scmp.eq.s32.totalorder (!%p5679_p11), %s5044_s16, 0 }
  0x52   : > { %456 = sbr.rel (%p5679_p11) target bundleno = 3047 (0xbe7), region = 76 }
  0x59   : > { %4942 = dma.done.wait (%p5680_p12), [#allocation3], 4096   ;;  %p5681_p7 = pmov %p5680_p12 }
  0x5b   : > { %4944 = vsyncadd (%p5681_p7), [#allocation3], 4294963200  ;;  %p5682_p13 = pmov %p5681_p7 }
  0x5c   : > { %p5683_p2 = pmov %p5681_p7 }
  0x5d   : > { %4946 = dma.done.wait (%p5682_p13), [#allocation5], 32768  }
  0x5e   : > { %4948 = vsyncadd (%p5683_p2), [#allocation5], 4294934528  ;;  %v4441_v0 = vld [vmem:[%s5657_s2 + $0xc] ss:$24 sps:$4 sm:$0xff]   ;;  %v4443_v1 = vld [vmem:[%s5657_s2 + $0x8] ss:$24 sps:$4 sm:$0xff]  }
  0x5f   : > { %1181 = vmatprep.subr.bf16.mxu1 %v4441_v0  ;;  %v4444_v2 = vld [vmem:[%s5657_s2 + $0x3c] ss:$24 sps:$4 sm:$0xff]   ;;  %v4448_v4 = vld [vmem:[%s5657_s2 + $0x38] ss:$24 sps:$4 sm:$0xff]   ;;  %v4450_v6 = vld [vmem:[%s5657_s2 + $0x6c] ss:$24 sps:$4 sm:$0xff]  }
  0x60   : > { %1182 = vmatpush1.bf16.msra.mxu1 %v4443_v1  ;;  %v4446_v3 = vld [vmem:[%s5657_s2 + $0x4] ss:$24 sps:$4 sm:$0xff]   ;;  %v4449_v5 = vld [vmem:[%s5657_s2] ss:$24 sps:$4 sm:$0xff]   ;;  %v4452_v7 = vld [vmem:[%s5657_s2 + $0x34] ss:$24 sps:$4 sm:$0xff]  }
  0x61   : > { %1183 = vmatprep.subr.bf16.mxu1 %v4444_v2  ;;  %1140 = vmatprep.subr.bf16.mxu0 %v4446_v3  ;;  %v4455_v8 = vld [vmem:[%s5657_s2 + $0x30] ss:$24 sps:$4 sm:$0xff]   ;;  %v4456_v10 = vld [vmem:[%s5657_s2 + $0x9c] ss:$24 sps:$4 sm:$0xff]   ;;  %v4461_v12 = vld [vmem:[%s5657_s2 + $0x60] ss:$24 sps:$4 sm:$0xff]  }
  0x62   : > { %1141 = vmatpush1.bf16.msra.mxu0 %v4449_v5  ;;  %v4454_v9 = vld [vmem:[%s5657_s2 + $0x68] ss:$24 sps:$4 sm:$0xff]   ;;  %v4458_v11 = vld [vmem:[%s5657_s2 + $0x64] ss:$24 sps:$4 sm:$0xff]   ;;  %v4460_v13 = vld [vmem:[%s5657_s2 + $0x98] ss:$24 sps:$4 sm:$0xff]   ;;  %v630_v5 = vlaneseq }
  0x63   : > { %1142 = vmatprep.subr.bf16.mxu0 %v4452_v7  ;;  %v4464_v14 = vld [vmem:[%s5657_s2 + $0x94] ss:$24 sps:$4 sm:$0xff]   ;;  %v4466_v16 = vld [vmem:[%s5657_s2 + $0xc8] ss:$24 sps:$4 sm:$0xff]   ;;  %v4470_v18 = vld [vmem:[%s5657_s2 + $0xc4] ss:$24 sps:$4 sm:$0xff]  }
  0x64   : > { %1184 = vmatpush1.bf16.msra.mxu1 %v4448_v4  ;;  %v4462_v15 = vld [vmem:[%s5657_s2 + $0xcc] ss:$24 sps:$4 sm:$0xff]   ;;  %v4467_v17 = vld [vmem:[%s5657_s2 + $0x90] ss:$24 sps:$4 sm:$0xff]   ;;  %v4468_v19 = vld [vmem:[%s5657_s2 + $0xfc] ss:$24 sps:$4 sm:$0xff]  }
  0x65   : > { %1185 = vmatprep.subr.bf16.mxu1 %v4450_v6  ;;  %v4473_v20 = vld [vmem:[%s5657_s2 + $0xc0] ss:$24 sps:$4 sm:$0xff]   ;;  %v4476_v22 = vld [vmem:[%s5657_s2 + $0xf4] ss:$24 sps:$4 sm:$0xff]   ;;  %v4479_v25 = vld [vmem:[%s5657_s2 + $0xf0] ss:$24 sps:$4 sm:$0xff]  }
  0x66   : > { %1143 = vmatpush1.bf16.msra.mxu0 %v4455_v8  ;;  %v4472_v21 = vld [vmem:[%s5657_s2 + $0xf8] ss:$24 sps:$4 sm:$0xff]   ;;  %v4474_v23 = vld [vmem:[%s5657_s2 + $0x12c] ss:$24 sps:$4 sm:$0xff]   ;;  %v4478_v24 = vld [vmem:[%s5657_s2 + $0x128] ss:$24 sps:$4 sm:$0xff]  }
  0x67   : > { %1144 = vmatprep.subr.bf16.mxu0 %v4458_v11  ;;  %v4482_v26 = vld [vmem:[%s5657_s2 + $0x124] ss:$24 sps:$4 sm:$0xff]   ;;  %v4485_v28 = vld [vmem:[%s5657_s2 + $0x120] ss:$24 sps:$4 sm:$0xff]   ;;  %v4488_v30 = vld [vmem:[%s5657_s2 + $0x154] ss:$24 sps:$4 sm:$0xff]  }
  0x68   : > { %1186 = vmatpush1.bf16.msra.mxu1 %v4454_v9  ;;  %v4480_v27 = vld [vmem:[%s5657_s2 + $0x15c] ss:$24 sps:$4 sm:$0xff]   ;;  %v4484_v29 = vld [vmem:[%s5657_s2 + $0x158] ss:$24 sps:$4 sm:$0xff]   ;;  %p513_p3 = scmp.lt.s32.totalorder %s5044_s16, 1  ;;  %v4960_v4 = vmov 0.0  }
  0x69   : > { %1187 = vmatprep.subr.bf16.mxu1 %v4456_v10  ;;  %v4486_v31 = vld [vmem:[%s5657_s2 + $0x18c] ss:$24 sps:$4 sm:$0xff]   ;;  %v4490_v32 = vld [vmem:[%s5657_s2 + $0x188] ss:$24 sps:$4 sm:$0xff]   ;;  %v4492_v35 = vld [vmem:[%s5657_s2 + $0x1bc] ss:$24 sps:$4 sm:$0xff]  }
  0x6a   : > { %1145 = vmatpush1.bf16.msra.mxu0 %v4461_v12  ;;  %v4491_v33 = vld [vmem:[%s5657_s2 + $0x150] ss:$24 sps:$4 sm:$0xff]   ;;  %v4494_v34 = vld [vmem:[%s5657_s2 + $0x184] ss:$24 sps:$4 sm:$0xff]   ;;  %s5688_s16 = smov (!%p513_p3, %s5044_s16), 1  ;;  %vm4961_vm0 = vmmov 0  }
  0x6b   : > { %1146 = vmatprep.subr.bf16.mxu0 %v4464_v14  ;;  %v4497_v36 = vld [vmem:[%s5657_s2 + $0x180] ss:$24 sps:$4 sm:$0xff]   ;;  %v4500_v38 = vld [vmem:[%s5657_s2 + $0x1b4] ss:$24 sps:$4 sm:$0xff]   ;;  %s4361_s27 = sshll.u32 %s5688_s16, 4  ;;  %v5369_v6 = vshrl.u32 %v630_v5, 7  ;;  %s520_s13 = scalar_lea.vmem %s5656_s1, %s5688_s16 }
  0x6c   : > { %1188 = vmatpush1.bf16.msra.mxu1 %v4460_v13  ;;  %v4496_v37 = vld [vmem:[%s5657_s2 + $0x1b8] ss:$24 sps:$4 sm:$0xff]   ;;  %v4498_v39 = vld [vmem:[%s5657_s2 + $0x1ec] ss:$24 sps:$4 sm:$0xff]   ;;  %v4502_v40 = vld [vmem:[%s5657_s2 + $0x1e8] ss:$24 sps:$4 sm:$0xff]   ;;  %s5284_s22 = scalar_lea.vmem %s5655_s0, %s4361_s27 }
  0x6d   : > { %1189 = vmatprep.subr.bf16.mxu1 %v4462_v15  ;;  %v4503_v41 = vld [vmem:[%s5657_s2 + $0x1b0] ss:$24 sps:$4 sm:$0xff]   ;;  %v4506_v42 = vld [vmem:[%s5657_s2 + $0x1e4] ss:$24 sps:$4 sm:$0xff]   ;;  %v4509_v46 = vld [vmem:[%s5657_s2 + $0x1e0] ss:$24 sps:$4 sm:$0xff]  }
  0x6e   : > { %1147 = vmatpush1.bf16.msra.mxu0 %v4467_v17  ;;  %v4504_v43 = vld [vmem:[%s5657_s2 + $0x21c] ss:$24 sps:$4 sm:$0xff]   ;;  %v4508_v44 = vld [vmem:[%s5657_s2 + $0x218] ss:$24 sps:$4 sm:$0xff]   ;;  %v5296_v45 = vld [vmem:[%s5284_s22 + $0x8] sm:$0xff]  ;;  %v640_v7 = vsub.s32 2, %v5369_v6 }
  0x6f   : > { %1148 = vmatprep.subr.bf16.mxu0 %v4470_v18  ;;  %v531_v47 = vpack.c.bf16 %v5296_v45, %v5296_v45  ;;  %v4510_v48 = vld [vmem:[%s5657_s2 + $0x24c] ss:$24 sps:$4 sm:$0xff]   ;;  %v4515_v50 = vld [vmem:[%s5657_s2 + $0x210] ss:$24 sps:$4 sm:$0xff]   ;;  %v4516_v53 = vld [vmem:[%s5657_s2 + $0x27c] ss:$24 sps:$4 sm:$0xff]  }
  0x70   : > { %1190 = vmatpush1.bf16.msra.mxu1 %v4466_v16  ;;  %v4512_v49 = vld [vmem:[%s5657_s2 + $0x214] ss:$24 sps:$4 sm:$0xff]   ;;  %v4514_v51 = vld [vmem:[%s5657_s2 + $0x248] ss:$24 sps:$4 sm:$0xff]   ;;  %v4518_v52 = vld [vmem:[%s5657_s2 + $0x244] ss:$24 sps:$4 sm:$0xff]  }
  0x71   : > { %1191 = vmatprep.subr.bf16.mxu1 %v4468_v19  ;;  %1213 = vmatprep.mubr.bf16.mxu1 %v531_v47  ;;  %v4521_v54 = vld [vmem:[%s5657_s2 + $0x240] ss:$24 sps:$4 sm:$0xff]   ;;  %v4524_v56 = vld [vmem:[%s5657_s2 + $0x274] ss:$24 sps:$4 sm:$0xff]   ;;  %v4527_v58 = vld [vmem:[%s5657_s2 + $0x270] ss:$24 sps:$4 sm:$0xff]  }
  0x72   : > { %1149 = vmatpush1.bf16.msra.mxu0 %v4473_v20  ;;  %1172 = vmatprep.mubr.bf16.mxu0 %v531_v47  ;;  %v4520_v55 = vld [vmem:[%s5657_s2 + $0x278] ss:$24 sps:$4 sm:$0xff]   ;;  %v4522_v57 = vld [vmem:[%s5657_s2 + $0x2ac] ss:$24 sps:$4 sm:$0xff]   ;;  %v4526_v59 = vld [vmem:[%s5657_s2 + $0x2a8] ss:$24 sps:$4 sm:$0xff]  }
  0x73   : > { %1150 = vmatprep.subr.bf16.mxu0 %v4476_v22  ;;  %v4530_v60 = vld [vmem:[%s5657_s2 + $0x2a4] ss:$24 sps:$4 sm:$0xff]   ;;  %v4533_v62 = vld [vmem:[%s5657_s2 + $0x2a0] ss:$24 sps:$4 sm:$0xff]   ;;  %v4534_v1 = vld [vmem:[%s5657_s2 + $0x2d4] ss:$24 sps:$4 sm:$0xff]  }
  0x74   : > { %1192 = vmatpush1.bf16.msra.mxu1 %v4472_v21  ;;  %v4528_v61 = vld [vmem:[%s5657_s2 + $0x2dc] ss:$24 sps:$4 sm:$0xff]   ;;  %v4532_v63 = vld [vmem:[%s5657_s2 + $0x2d8] ss:$24 sps:$4 sm:$0xff]   ;;  %v5352_v0 = vld [vmem:[%s5284_s22] sm:$0xff]  ;;  %v5378_v9 = vsub.s32 0, %v5369_v6 }
  0x75   : > { %1193 = vmatprep.subr.bf16.mxu1 %v4474_v23  ;;  %v4536_v2 = vld [vmem:[%s5657_s2 + $0x2d0] ss:$24 sps:$4 sm:$0xff]   ;;  %v5362_v3 = vpack.c.bf16 %v5352_v0, %v5352_v0  ;;  %v5375_v8 = vld [vmem:[%s5658_s3] sm:$0x3f]  ;;  %vm1314_vm1 = vcmask 64512   ;;  %vm1330_vm2 = vcmask 1043456  }
  0x76   : > { %1151 = vmatpush1.bf16.msra.mxu0 %v4479_v25  ;;  %v641_v10 = vrot.slane %v5375_v8, %v640_v7  ;;  %v633_v12 = vrot.slane %v5375_v8, %v5378_v9  ;;  %v4539_v25 = vld [vmem:[%s5657_s2 + $0x14] ss:$24 sps:$4 sm:$0xff]   ;;  %s5684_s17 = sld [smem:[#allocation10_spill]]  ;;  %s5685_s24 = sld [smem:[#allocation11_spill]] }
  0x77   : > { %1152 = vmatprep.subr.bf16.mxu0 %v4482_v26  ;;  %v4542_v26 = vld [vmem:[%s5657_s2 + $0x44] ss:$24 sps:$4 sm:$0xff]  }
  0x78   : > { %1194 = vmatpush1.bf16.msra.mxu1 %v4478_v24  ;;  %v4537_v24 = vld [vmem:[%s5657_s2 + $0x10] ss:$24 sps:$4 sm:$0xff]  }
  0x79   : > { %1195 = vmatprep.subr.bf16.mxu1 %v4480_v27  ;;  %v4540_v27 = vld [vmem:[%s5657_s2 + $0x40] ss:$24 sps:$4 sm:$0xff]  }
  0x7a   : > { %1153 = vmatpush1.bf16.msra.mxu0 %v4485_v28  ;;  %v4545_v28 = vld [vmem:[%s5657_s2 + $0x74] ss:$24 sps:$4 sm:$0xff]  }
  0x7b   : > { %1154 = vmatprep.subr.bf16.mxu0 %v4488_v30  ;;  %v4548_v30 = vld [vmem:[%s5657_s2 + $0xa4] ss:$24 sps:$4 sm:$0xff]  }
  0x7c   : > { %1196 = vmatpush1.bf16.msra.mxu1 %v4484_v29  ;;  %v4543_v29 = vld [vmem:[%s5657_s2 + $0x70] ss:$24 sps:$4 sm:$0xff]   ;;  %s525_s25 = scalar_lea.vmem %s5685_s24, %s4361_s27 }
  0x7d   : > { %1197 = vmatprep.subr.bf16.mxu1 %v4486_v31  ;;  %v4546_v31 = vld [vmem:[%s5657_s2 + $0xa0] ss:$24 sps:$4 sm:$0xff]  }
  0x7e   : > { %1155 = vmatpush1.bf16.msra.mxu0 %v4491_v33  ;;  %v4549_v33 = vld [vmem:[%s5657_s2 + $0xd0] ss:$24 sps:$4 sm:$0xff]  }
  0x7f   : > { %1156 = vmatprep.subr.bf16.mxu0 %v4494_v34  ;;  %v4554_v34 = vld [vmem:[%s5657_s2 + $0x104] ss:$24 sps:$4 sm:$0xff]  }
  0x80   : > { %1198 = vmatpush1.bf16.msra.mxu1 %v4490_v32  ;;  %v4551_v32 = vld [vmem:[%s5657_s2 + $0xd4] ss:$24 sps:$4 sm:$0xff]  }
  0x81   : > { %1199 = vmatprep.subr.bf16.mxu1 %v4492_v35  ;;  %v4552_v35 = vld [vmem:[%s5657_s2 + $0x100] ss:$24 sps:$4 sm:$0xff]  }
  0x82   : > { %1157 = vmatpush1.bf16.msra.mxu0 %v4497_v36  ;;  %v4557_v36 = vld [vmem:[%s5657_s2 + $0x134] ss:$24 sps:$4 sm:$0xff]  }
  0x83   : > { %1158 = vmatprep.subr.bf16.mxu0 %v4500_v38  ;;  %v4560_v38 = vld [vmem:[%s5657_s2 + $0x164] ss:$24 sps:$4 sm:$0xff]  }
  0x84   : > { %1200 = vmatpush1.bf16.msra.mxu1 %v4496_v37  ;;  %v4555_v37 = vld [vmem:[%s5657_s2 + $0x130] ss:$24 sps:$4 sm:$0xff]  }
  0x85   : > { %1201 = vmatprep.subr.bf16.mxu1 %v4498_v39  ;;  %v4558_v39 = vld [vmem:[%s5657_s2 + $0x160] ss:$24 sps:$4 sm:$0xff]  }
  0x86   : > { %1159 = vmatpush1.bf16.msra.mxu0 %v4503_v41  ;;  %v4561_v41 = vld [vmem:[%s5657_s2 + $0x190] ss:$24 sps:$4 sm:$0xff]  }
  0x87   : > { %1160 = vmatprep.subr.bf16.mxu0 %v4506_v42  ;;  %v4566_v42 = vld [vmem:[%s5657_s2 + $0x1c4] ss:$24 sps:$4 sm:$0xff]  }
  0x88   : > { %1202 = vmatpush1.bf16.msra.mxu1 %v4502_v40  ;;  %v4563_v40 = vld [vmem:[%s5657_s2 + $0x194] ss:$24 sps:$4 sm:$0xff]  }
  0x89   : > { %1203 = vmatprep.subr.bf16.mxu1 %v4504_v43  ;;  %v4564_v43 = vld [vmem:[%s5657_s2 + $0x1c0] ss:$24 sps:$4 sm:$0xff]  }
  0x8a   : > { %1161 = vmatpush1.bf16.msra.mxu0 %v4509_v46  ;;  %v4567_v46 = vld [vmem:[%s5657_s2 + $0x1f0] ss:$24 sps:$4 sm:$0xff]  }
  0x8b   : > { %1162 = vmatprep.subr.bf16.mxu0 %v4512_v49  ;;  %v4575_v49 = vld [vmem:[%s5657_s2 + $0x254] ss:$24 sps:$4 sm:$0xff]  }
  0x8c   : > { %1204 = vmatpush1.bf16.msra.mxu1 %v4508_v44  ;;  %v4569_v44 = vld [vmem:[%s5657_s2 + $0x1f4] ss:$24 sps:$4 sm:$0xff]  }
  0x8d   : > { %1205 = vmatprep.subr.bf16.mxu1 %v4510_v48  ;;  %v4570_v48 = vld [vmem:[%s5657_s2 + $0x220] ss:$24 sps:$4 sm:$0xff]  }
  0x8e   : > { %1163 = vmatpush1.bf16.msra.mxu0 %v4515_v50  ;;  %v4573_v50 = vld [vmem:[%s5657_s2 + $0x250] ss:$24 sps:$4 sm:$0xff]  }
  0x8f   : > { %1164 = vmatprep.subr.bf16.mxu0 %v4518_v52  ;;  %v4576_v52 = vld [vmem:[%s5657_s2 + $0x280] ss:$24 sps:$4 sm:$0xff]  }
  0x90   : > { %1206 = vmatpush1.bf16.msra.mxu1 %v4514_v51  ;;  %v4578_v51 = vld [vmem:[%s5657_s2 + $0x284] ss:$24 sps:$4 sm:$0xff]  }
  0x91   : > { %1207 = vmatprep.subr.bf16.mxu1 %v4516_v53  ;;  %v4581_v53 = vld [vmem:[%s5657_s2 + $0x2b4] ss:$24 sps:$4 sm:$0xff]  }
  0x92   : > { %1165 = vmatpush1.bf16.msra.mxu0 %v4521_v54  ;;  %v4579_v54 = vld [vmem:[%s5657_s2 + $0x2b0] ss:$24 sps:$4 sm:$0xff]  }
  0x93   : > { %1166 = vmatprep.subr.bf16.mxu0 %v4524_v56  ;;  %v4582_v56 = vld [vmem:[%s5657_s2 + $0x2e0] ss:$24 sps:$4 sm:$0xff]  }
  0x94   : > { %1208 = vmatpush1.bf16.msra.mxu1 %v4520_v55  ;;  %v4584_v55 = vld [vmem:[%s5657_s2 + $0x2e4] ss:$24 sps:$4 sm:$0xff]  }
  0x95   : > { %1209 = vmatprep.subr.bf16.mxu1 %v4522_v57 }
  0x96   : > { %1167 = vmatpush1.bf16.msra.mxu0 %v4527_v58  ;;  %v5493_v58 = vld [vmem:[%s520_s13] ss:$0 sm:$0xff] }
  0x97   : > { %1168 = vmatprep.subr.bf16.mxu0 %v4530_v60 }
  0x98   : > { %1210 = vmatpush1.bf16.msra.mxu1 %v4526_v59 }
  0x99   : > { %1211 = vmatprep.subr.bf16.mxu1 %v4528_v61 }
  0x9a   : > { %1169 = vmatpush1.bf16.msra.mxu0 %v4533_v62 }
  0x9b   : > { %1170 = vmatprep.subr.bf16.mxu0 %v4534_v1 }
  0x9c   : > { %1212 = vmatpush1.bf16.msra.mxu1 %v4532_v63 }
  0x9d   : > { %4371 = vmatprep.subr.bf16.mxu1 %v4960_v4 }
  0x9e   : > { %1171 = vmatpush1.bf16.msra.mxu0 %v4536_v2 }
  0x9f   : > { %1214 = vmatmul.mubr.bf16.vlgmr.msra.gmra.mrb[0].mxu1 %v5362_v3  ;;  %1222 = vmatprep.subr.bf16.mxu0 %v4539_v25 }
  0xa0   : > { %4373 = vmatprep.mubr.msk.bf16.mxu1 %vm4961_vm0, %v4960_v4 }
  0xa1   : > { %1173 = vmatmul.mubr.bf16.vlgmr.msra.gmra.mrb[0].mxu0 %v5362_v3 }
  0xa2   : > { %1254 = vmatprep.mubr.bf16.mxu0 %v531_v47  ;;  %1223 = vmatpush1.bf16.msra.mxu0 %v4537_v24  ;;  %v4572_v47 = vld [vmem:[%s5657_s2 + $0x224] ss:$24 sps:$4 sm:$0xff]  }
  0xa3   : > { %1224 = vmatprep.subr.bf16.mxu0 %v4542_v26 }
  0xa6   : > { %1225 = vmatpush1.bf16.msra.mxu0 %v4540_v27 }
  0xa7   : > { %1226 = vmatprep.subr.bf16.mxu0 %v4545_v28  ;;  %v4585_v28 = vld [vmem:[#allocation2] ss:$8 sps:$4 sm:$0xff]  }
  0xaa   : > { %1227 = vmatpush1.bf16.msra.mxu0 %v4543_v29  ;;  %v4587_v29 = vld [vmem:[#allocation2 + $0x4] ss:$8 sps:$4 sm:$0xff]  }
  0xab   : > { %1228 = vmatprep.subr.bf16.mxu0 %v4548_v30  ;;  %v4590_v30 = vld [vmem:[#allocation2 + $0x14] ss:$8 sps:$4 sm:$0xff]  }
  0xae   : > { %1229 = vmatpush1.bf16.msra.mxu0 %v4546_v31  ;;  %v4588_v31 = vld [vmem:[#allocation2 + $0x10] ss:$8 sps:$4 sm:$0xff]  }
  0xaf   : > { %1230 = vmatprep.subr.bf16.mxu0 %v4551_v32  ;;  %v4593_v32 = vld [vmem:[#allocation2 + $0x24] ss:$8 sps:$4 sm:$0xff]  }
  0xb2   : > { %1231 = vmatpush1.bf16.msra.mxu0 %v4549_v33  ;;  %v4591_v33 = vld [vmem:[#allocation2 + $0x20] ss:$8 sps:$4 sm:$0xff]  }
  0xb3   : > { %1232 = vmatprep.subr.bf16.mxu0 %v4554_v34  ;;  %v4596_v34 = vld [vmem:[#allocation2 + $0x34] ss:$8 sps:$4 sm:$0xff]  }
  0xb6   : > { %1233 = vmatpush1.bf16.msra.mxu0 %v4552_v35  ;;  %v4594_v35 = vld [vmem:[#allocation2 + $0x30] ss:$8 sps:$4 sm:$0xff]  }
  0xb7   : > { %1234 = vmatprep.subr.bf16.mxu0 %v4557_v36  ;;  %v4599_v36 = vld [vmem:[#allocation2 + $0x44] ss:$8 sps:$4 sm:$0xff]  }
  0xba   : > { %1235 = vmatpush1.bf16.msra.mxu0 %v4555_v37  ;;  %v4597_v37 = vld [vmem:[#allocation2 + $0x40] ss:$8 sps:$4 sm:$0xff]  }
  0xbb   : > { %1236 = vmatprep.subr.bf16.mxu0 %v4560_v38  ;;  %v4602_v38 = vld [vmem:[#allocation2 + $0x54] ss:$8 sps:$4 sm:$0xff]  }
  0xbe   : > { %1237 = vmatpush1.bf16.msra.mxu0 %v4558_v39  ;;  %v4600_v39 = vld [vmem:[#allocation2 + $0x50] ss:$8 sps:$4 sm:$0xff]  }
  0xbf   : > { %1238 = vmatprep.subr.bf16.mxu0 %v4563_v40  ;;  %v4605_v40 = vld [vmem:[#allocation2 + $0x64] ss:$8 sps:$4 sm:$0xff]  }
  0xc2   : > { %1239 = vmatpush1.bf16.msra.mxu0 %v4561_v41  ;;  %v4603_v41 = vld [vmem:[#allocation2 + $0x60] ss:$8 sps:$4 sm:$0xff]  }
  0xc3   : > { %1240 = vmatprep.subr.bf16.mxu0 %v4566_v42  ;;  %v4608_v42 = vld [vmem:[#allocation2 + $0x74] ss:$8 sps:$4 sm:$0xff]  }
  0xc6   : > { %1241 = vmatpush1.bf16.msra.mxu0 %v4564_v43  ;;  %v4606_v43 = vld [vmem:[#allocation2 + $0x70] ss:$8 sps:$4 sm:$0xff]  }
  0xc7   : > { %1242 = vmatprep.subr.bf16.mxu0 %v4569_v44 }
  0xca   : > { %1243 = vmatpush1.bf16.msra.mxu0 %v4567_v46  ;;  %v644_v46 = vsub.s32 3, %v5369_v6 }
  0xcb   : > { %1244 = vmatprep.subr.bf16.mxu0 %v4572_v47 }
  0xcc   : > { %v645_v47 = vrot.slane %v5375_v8, %v644_v46 }
  0xce   : > { %1245 = vmatpush1.bf16.msra.mxu0 %v4570_v48  ;;  %v5512_v48 = vsub.s32 1, %v5369_v6 }
  0xcf   : > { %1246 = vmatprep.subr.bf16.mxu0 %v4575_v49 }
  0xd2   : > { %1247 = vmatpush1.bf16.msra.mxu0 %v4573_v50 }
  0xd3   : > { %1248 = vmatprep.subr.bf16.mxu0 %v4578_v51 }
  0xd6   : > { %1249 = vmatpush1.bf16.msra.mxu0 %v4576_v52  ;;  %v637_v52 = vrot.slane %v5375_v8, %v5512_v48 }
  0xd7   : > { %1250 = vmatprep.subr.bf16.mxu0 %v4581_v53 }
  0xda   : > { %1251 = vmatpush1.bf16.msra.mxu0 %v4579_v54 }
  0xdb   : > { %1252 = vmatprep.subr.bf16.mxu0 %v4584_v55 }
  0xde   : > { %1253 = vmatpush1.bf16.msra.mxu0 %v4582_v56 }
  0xdf   : > { %1712 = vmatprep.subr.bf16.mxu0 %v4587_v29  ;;  %v4617_v29 = vld [vmem:[#allocation2 + $0xa4] ss:$8 sps:$4 sm:$0xff]  }
  0xe1   : > { %1255 = vmatmul.mubr.bf16.vlgmr.msra.gmra.mrb[4].mxu0 %v5362_v3  ;;  %v648_v3 = vsub.s32 4, %v5369_v6 }
  0xe2   : > { %1713 = vmatpush1.bf16.msra.mxu0 %v4585_v28  ;;  %v4612_v28 = vld [vmem:[#allocation2 + $0x90] ss:$8 sps:$4 sm:$0xff]  }
  0xe3   : > { %1714 = vmatprep.subr.bf16.mxu0 %v4590_v30  ;;  %v4615_v30 = vld [vmem:[#allocation2 + $0xa0] ss:$8 sps:$4 sm:$0xff]  }
  0xe6   : > { %1715 = vmatpush1.bf16.msra.mxu0 %v4588_v31  ;;  %v4620_v31 = vld [vmem:[#allocation2 + $0xb4] ss:$8 sps:$4 sm:$0xff]  }
  0xe7   : > { %1716 = vmatprep.subr.bf16.mxu0 %v4593_v32  ;;  %v4618_v32 = vld [vmem:[#allocation2 + $0xb0] ss:$8 sps:$4 sm:$0xff]  }
  0xea   : > { %1717 = vmatpush1.bf16.msra.mxu0 %v4591_v33  ;;  %v4623_v33 = vld [vmem:[#allocation2 + $0xc4] ss:$8 sps:$4 sm:$0xff]  }
  0xeb   : > { %1718 = vmatprep.subr.bf16.mxu0 %v4596_v34  ;;  %v4621_v34 = vld [vmem:[#allocation2 + $0xc0] ss:$8 sps:$4 sm:$0xff]  }
  0xee   : > { %1719 = vmatpush1.bf16.msra.mxu0 %v4594_v35  ;;  %v4626_v35 = vld [vmem:[#allocation2 + $0xd4] ss:$8 sps:$4 sm:$0xff]  }
  0xef   : > { %1720 = vmatprep.subr.bf16.mxu0 %v4599_v36  ;;  %v4624_v36 = vld [vmem:[#allocation2 + $0xd0] ss:$8 sps:$4 sm:$0xff]  }
  0xf2   : > { %1721 = vmatpush1.bf16.msra.mxu0 %v4597_v37  ;;  %v4629_v37 = vld [vmem:[#allocation2 + $0xe4] ss:$8 sps:$4 sm:$0xff]  }
  0xf3   : > { %1722 = vmatprep.subr.bf16.mxu0 %v4602_v38  ;;  %v4627_v38 = vld [vmem:[#allocation2 + $0xe0] ss:$8 sps:$4 sm:$0xff]  }
  0xf6   : > { %1723 = vmatpush1.bf16.msra.mxu0 %v4600_v39  ;;  %v4632_v39 = vld [vmem:[#allocation2 + $0xf4] ss:$8 sps:$4 sm:$0xff]  }
  0xf7   : > { %1724 = vmatprep.subr.bf16.mxu0 %v4605_v40  ;;  %v4630_v40 = vld [vmem:[#allocation2 + $0xf0] ss:$8 sps:$4 sm:$0xff]  }
  0xfa   : > { %1725 = vmatpush1.bf16.msra.mxu0 %v4603_v41 }
  0xfb   : > { %1726 = vmatprep.subr.bf16.mxu0 %v4608_v42 }
  0xfe   : > { %1727 = vmatpush1.bf16.msra.mxu0 %v4606_v43 }
 0x172   : > { %v1215_v11 = vpop.f32.mrb[0].mxu1 }
 0x173   : > { %v1216_v13 = vadd.f32 %v1215_v11, %v641_v10  ;;  %v5385_v14 = vpop.f32.mrb[1].mxu1  ;;  %v652_v10 = vsub.s32 5, %v5369_v6 }
 0x174   : > { %v1219_v15 = vpop.f32.mrb[2].mxu1  ;;  %v1174_v18 = vpop.f32.mrb[0].mxu0  ;;  %v1218_v50 = vadd.f32 %v5385_v14, %v645_v47  ;;  %v4962_v14 = vmov 0  }
 0x175   : > { %v1264_v16 = vpack.c.bf16 %v1216_v13, %v1216_v13  ;;  %v1220_v17 = vpop.f32.mrb[3].mxu1  ;;  %v1175_v19 = vadd.f32 %v1174_v18, %v633_v12  ;;  %v5387_v20 = vpop.f32.mrb[1].mxu0  ;;  %v649_v12 = vrot.slane %v5375_v8, %v648_v3  ;;  %v653_v13 = vrot.slane %v5375_v8, %v652_v10  ;;  %1744 = vmatprep.mubr.bf16.mxu0 %v4962_v14 }
 0x176   : > { %v1178_v21 = vpop.f32.mrb[2].mxu0  ;;  %v1392_v54 = vpack.c.bf16 %v1218_v50, %v1218_v50  ;;  %v1177_v55 = vadd.f32 %v5387_v20, %v637_v52 }
 0x177   : > { %4372 = vmatpush3.bf16.xpose.msra.mxu1 %v1264_v16  ;;  %v1179_v22 = vpop.f32.mrb[3].mxu0  ;;  %v1263_v23 = vpack.c.bf16 %v1175_v19, %v1175_v19 }
 0x178   : > { %4377 = vmatprep.subr.bf16.mxu1 %v4960_v4  ;;  %v1391_v56 = vpack.c.bf16 %v1177_v55, %v1177_v55 }
 0x17e   : > { %4374 = vmatmul.mubr.bf16.vlgmr.msra.gmra.mrb[4].mxu1 %v1263_v23 }
 0x17f   : > { %4379 = vmatprep.mubr.msk.bf16.mxu1 %vm4961_vm0, %v4960_v4 }
 0x1b4   : > { %v1256_v15 = vpop.f32.mrb[4].mxu0 }
 0x1b5   : > { %v1257_v16 = vadd.f32 %v1256_v15, %v649_v12  ;;  %v1258_v17 = vpop.f32.mrb[5].mxu0 }
 0x1b6   : > { %v1259_v18 = vadd.f32 %v1258_v17, %v653_v13  ;;  %v1260_v19 = vpop.f32.mrb[6].mxu0  ;;  %v4611_v17 = vld [vmem:[#allocation2 + $0x84] ss:$8 sps:$4 sm:$0xff]  }
 0x1b7   : > { %v1265_v21 = vpack.c.bf16 %v1257_v16, %v1257_v16  ;;  %v1261_v22 = vpop.f32.mrb[7].mxu0 }
 0x1b8   : > { %v1393_v23 = vpack.c.bf16 %v1259_v18, %v1259_v18 }
 0x1b9   : > { %v1332_v24 = vsel %vm1330_vm2, %v1265_v21, 0 }
 0x1ba   : > { %v1452_v25 = vsel %vm1330_vm2, %v1393_v23, 0  ;;  %4378 = vmatpush3.bf16.msra.mxu1 %v1332_v24 }
 0x1bb   : > { %4383 = vmatprep.subr.bf16.mxu1 %v4960_v4 }
 0x251   : > { %v1300_v57 = vpop.f32.mrb[4].mxu1 }
 0x252   : > { %v1306_v59 = vmul.f32 0.088388346, %v1300_v57  ;;  %v4375_v60 = vpop.f32.mrb[5].mxu1 }
 0x253   : > { %v1303_v61 = vpop.f32.mrb[6].mxu1 }
 0x254   : > { %v4376_v62 = vpop.f32.mrb[7].mxu1  ;;  %v1313_v63 = vadd.f32 %v5493_v58, %v1306_v59 }
 0x256   : > { %v1315_v1 = vsel %vm1314_vm1, %v1313_v63, -inf }
 0x257   : > { %1316 = vmax.xlane.f32.xlu0 %v1315_v1 }
 0x2e4   : > { %v1317_v2 = vpop.xlane.xlu0 %1316 }
 0x2e5   : > { %v1318_v5 = vsub.f32 %v1313_v63, %v1317_v2 }
 0x2e7   : > { %v1319_v11 = vmul.f32 1.442695, %v1318_v5 }
 0x2e9   : > { %4825 = vpow2.f32 %v1319_v11 }
 0x2f3   : > { %v4826_v26 = vpop.eup %4825 }
 0x2f4   : > { %v1321_v27 = vsel %vm1314_vm1, %v4826_v26, 0.0 }
 0x2f5   : > { %1322 = vadd.xlane.f32.xlu0 %v1321_v27  ;;  %v4614_v27 = vld [vmem:[#allocation2 + $0x94] ss:$8 sps:$4 sm:$0xff]  }
 0x382   : > { %v1323_v44 = vpop.xlane.xlu0 %1322 }
 0x383   : > { %4827 = vrcp.f32 %v1323_v44 }
 0x38d   : > { %v4828_v49 = vpop.eup %4827 }
 0x38e   : > { %v1325_v51 = vmul.f32 %v4828_v49, %v4826_v26  ;;  %v1753_v49 = vld [vmem:[%s5660_s5] sm:$0x3] }
 0x38f   : > { %v1758_v50 = vrot.slane %v1753_v49, %v5378_v9  ;;  %v1762_v52 = vrot.slane %v1753_v49, %v5512_v48 }
 0x390   : > { %v1326_v53 = vpack.c.bf16 %v1325_v51, %v1325_v51 }
 0x392   : > { %4380 = vmatmul.mubr.msk.bf16.vlgmr.msra.gmra.mrb[8].mxu1 %vm1314_vm1, %v1326_v53 }
 0x393   : > { %4384 = vmatpush3.bf16.xpose.msra.mxu1 %v1392_v54  ;;  %4385 = vmatprep.mubr.msk.bf16.mxu1 %vm4961_vm0, %v4960_v4 }
 0x394   : > { %4389 = vmatprep.subr.bf16.mxu1 %v4960_v4 }
 0x39a   : > { %4386 = vmatmul.mubr.bf16.vlgmr.msra.gmra.mrb[12].mxu1 %v1391_v56 }
 0x39b   : > { %4390 = vmatpush3.bf16.msra.mxu1 %v1452_v25  ;;  %4391 = vmatprep.mubr.msk.bf16.mxu1 %vm4961_vm0, %v4960_v4  ;;  %v4609_v25 = vld [vmem:[#allocation2 + $0x80] ss:$8 sps:$4 sm:$0xff]  }
 0x39c   : > { %1591 = vmatprep.subr.bf16.mxu1 %v4611_v17  ;;  %v1832_v17 = vld [vmem:[#allocation4 + $0x80] sm:$0xff] }
 0x465   : > { %v1368_v8 = vpop.f32.mrb[8].mxu1 }
 0x466   : > { %v1374_v57 = vpack.c.bf16 %v1368_v8, %v1368_v8  ;;  %v4381_v59 = vpop.f32.mrb[9].mxu1 }
 0x467   : > { %v1371_v60 = vpop.f32.mrb[10].mxu1 }
 0x468   : > { %v4382_v61 = vpop.f32.mrb[11].mxu1  ;;  %1745 = vmatmul.mubr.bf16.vlgmr.msra.gmra.mrb[8].mxu0 %v1374_v57 }
 0x46d   : > { %v1428_v62 = vpop.f32.mrb[12].mxu1 }
 0x46e   : > { %v1434_v63 = vmul.f32 0.088388346, %v1428_v62  ;;  %v4387_v1 = vpop.f32.mrb[13].mxu1  ;;  %v1816_v62 = vld [vmem:[#allocation4] sm:$0xff] }
 0x46f   : > { %v1431_v20 = vpop.f32.mrb[14].mxu1  ;;  %v1817_v1 = vld [vmem:[#allocation4 + $0x8] sm:$0xff] }
 0x470   : > { %v4388_v2 = vpop.f32.mrb[15].mxu1  ;;  %v1435_v5 = vadd.f32 %v5493_v58, %v1434_v63  ;;  %v1820_v63 = vld [vmem:[#allocation4 + $0x20] sm:$0xff] }
 0x471   : > { %v4103_v20 = vcombine.low %v1816_v62, %v1820_v63  ;;  %v4104_v2 = vcombine.high %v1816_v62, %v1820_v63  ;;  %v1876_v62 = vld [vmem:[#allocation4 + $0x1e0] sm:$0xff]  ;;  %v1873_v63 = vld [vmem:[#allocation4 + $0x1c8] sm:$0xff] }
 0x472   : > { %v1436_v11 = vsel %vm1314_vm1, %v1435_v5, -inf }
 0x473   : > { %1437 = vmax.xlane.f32.xlu1 %v1436_v11  ;;  %v1824_v11 = vld [vmem:[#allocation4 + $0x40] sm:$0xff] }
 0x500   : > { %v1438_v12 = vpop.xlane.xlu1 %1437 }
 0x501   : > { %v1439_v4 = vsub.f32 %v1435_v5, %v1438_v12  ;;  %v1821_v5 = vld [vmem:[#allocation4 + $0x28] sm:$0xff]  ;;  %v1828_v12 = vld [vmem:[#allocation4 + $0x60] sm:$0xff] }
 0x503   : > { %v1440_v13 = vmul.f32 1.442695, %v1439_v4  ;;  %v4105_v4 = vcombine.low %v1817_v1, %v1821_v5 }
 0x505   : > { %4829 = vpow2.f32 %v1440_v13  ;;  %v4106_v13 = vcombine.high %v1817_v1, %v1821_v5  ;;  %v1877_v1 = vld [vmem:[#allocation4 + $0x1e8] sm:$0xff] }
 0x507   : > { %2667 = vmatprep.subr.bf16.mxu0 %v4106_v13  ;;  %v1881_v13 = vld [vmem:[#allocation4 + $0x208] sm:$0xff] }
 0x508   : > { %2668 = vmatpush1.bf16.msra.mxu0 %v4105_v4  ;;  %v1884_v4 = vld [vmem:[#allocation4 + $0x220] sm:$0xff] }
 0x50f   : > { %v4830_v15 = vpop.eup %4829 }
 0x510   : > { %v1442_v16 = vsel %vm1314_vm1, %v4830_v15, 0.0 }
 0x511   : > { %1443 = vadd.xlane.f32.xlu1 %v1442_v16  ;;  %v1829_v16 = vld [vmem:[#allocation4 + $0x68] sm:$0xff] }
 0x53b   : > { %v1746_v18 = vpop.f32.mrb[8].mxu0 }
 0x53c   : > { %v1748_v19 = vpop.f32.mrb[9].mxu0 }
 0x53d   : > { %v1750_v21 = vpop.f32.mrb[10].mxu0 }
 0x53e   : > { %v1751_v22 = vpop.f32.mrb[11].mxu0  ;;  %v1837_v21 = vld [vmem:[#allocation4 + $0xa8] sm:$0xff] }
 0x53f   : > { %v4111_v22 = vcombine.low %v1824_v11, %v1828_v12 }
 0x59e   : > { %v1444_v23 = vpop.xlane.xlu1 %1443 }
 0x59f   : > { %4831 = vrcp.f32 %v1444_v23 }
 0x5a9   : > { %v4832_v58 = vpop.eup %4831 }
 0x5aa   : > { %v1446_v24 = vmul.f32 %v4832_v58, %v4830_v15  ;;  %v4112_v15 = vcombine.high %v1824_v11, %v1828_v12  ;;  %v4162_v11 = vcombine.high %v1873_v63, %v1877_v1  ;;  %v1880_v12 = vld [vmem:[#allocation4 + $0x200] sm:$0xff] }
 0x5ac   : > { %v1447_v26 = vpack.c.bf16 %v1446_v24, %v1446_v24 }
 0x5ae   : > { %4392 = vmatmul.mubr.msk.bf16.vlgmr.msra.gmra.mrb[16].mxu1 %vm1314_vm1, %v1447_v26  ;;  %v1844_v26 = vld [vmem:[#allocation4 + $0xe0] sm:$0xff] }
 0x5af   : > { %1592 = vmatpush1.bf16.msra.mxu1 %v4609_v25  ;;  %1623 = vmatprep.mubr.bf16.mxu1 %v4962_v14  ;;  %v1840_v25 = vld [vmem:[#allocation4 + $0xc0] sm:$0xff] }
 0x5b0   : > { %1593 = vmatprep.subr.bf16.mxu1 %v4614_v27  ;;  %v1841_v27 = vld [vmem:[#allocation4 + $0xc8] sm:$0xff] }
 0x5b3   : > { %1594 = vmatpush1.bf16.msra.mxu1 %v4612_v28  ;;  %v1845_v28 = vld [vmem:[#allocation4 + $0xe8] sm:$0xff] }
 0x5b4   : > { %1595 = vmatprep.subr.bf16.mxu1 %v4617_v29 }
 0x5b7   : > { %1596 = vmatpush1.bf16.msra.mxu1 %v4615_v30 }
 0x5b8   : > { %1597 = vmatprep.subr.bf16.mxu1 %v4620_v31  ;;  %v4128_v31 = vcombine.high %v1840_v25, %v1844_v26 }
 0x5bb   : > { %1598 = vmatpush1.bf16.msra.mxu1 %v4618_v32  ;;  %v4130_v32 = vcombine.high %v1841_v27, %v1845_v28 }
 0x5bc   : > { %1599 = vmatprep.subr.bf16.mxu1 %v4623_v33  ;;  %v1848_v33 = vld [vmem:[#allocation4 + $0x100] sm:$0xff] }
 0x5bf   : > { %1600 = vmatpush1.bf16.msra.mxu1 %v4621_v34  ;;  %v1852_v34 = vld [vmem:[#allocation4 + $0x120] sm:$0xff] }
 0x5c0   : > { %1601 = vmatprep.subr.bf16.mxu1 %v4626_v35  ;;  %v1849_v35 = vld [vmem:[#allocation4 + $0x108] sm:$0xff] }
 0x5c3   : > { %1602 = vmatpush1.bf16.msra.mxu1 %v4624_v36  ;;  %v1853_v36 = vld [vmem:[#allocation4 + $0x128] sm:$0xff] }
 0x5c4   : > { %1603 = vmatprep.subr.bf16.mxu1 %v4629_v37  ;;  %v4127_v37 = vcombine.low %v1840_v25, %v1844_v26  ;;  %v4137_v49 = vcombine.low %v1849_v35, %v1853_v36  ;;  %v1896_v26 = vld [vmem:[#allocation4 + $0x280] sm:$0xff] }
 0x5c7   : > { %1604 = vmatpush1.bf16.msra.mxu1 %v4627_v38  ;;  %v4129_v38 = vcombine.low %v1841_v27, %v1845_v28  ;;  %v1900_v27 = vld [vmem:[#allocation4 + $0x2a0] sm:$0xff]  ;;  %v1897_v28 = vld [vmem:[#allocation4 + $0x288] sm:$0xff] }
 0x5c8   : > { %1605 = vmatprep.subr.bf16.mxu1 %v4632_v39  ;;  %v4136_v39 = vcombine.high %v1848_v33, %v1852_v34 }
 0x5cb   : > { %1606 = vmatpush1.bf16.msra.mxu1 %v4630_v40  ;;  %v4138_v40 = vcombine.high %v1849_v35, %v1853_v36 }
 0x5cc   : > { %2626 = vmatprep.subr.bf16.mxu1 %v4104_v2 }
 0x681   : > { %v1488_v41 = vpop.f32.mrb[16].mxu1 }
 0x682   : > { %v1494_v42 = vpack.c.bf16 %v1488_v41, %v1488_v41  ;;  %v4393_v43 = vpop.f32.mrb[17].mxu1  ;;  %v1856_v41 = vld [vmem:[#allocation4 + $0x140] sm:$0xff] }
 0x683   : > { %v1491_v44 = vpop.f32.mrb[18].mxu1  ;;  %v1857_v43 = vld [vmem:[#allocation4 + $0x148] sm:$0xff] }
 0x684   : > { %v4394_v47 = vpop.f32.mrb[19].mxu1  ;;  %1624 = vmatmul.mubr.bf16.vlgmr.msra.gmra.mrb[20].mxu1 %v1494_v42  ;;  %v1860_v42 = vld [vmem:[#allocation4 + $0x160] sm:$0xff]  ;;  %v1861_v44 = vld [vmem:[#allocation4 + $0x168] sm:$0xff] }
 0x685   : > { %2627 = vmatpush1.bf16.msra.mxu1 %v4103_v20  ;;  %v4135_v47 = vcombine.low %v1848_v33, %v1852_v34  ;;  %v4183_v34 = vcombine.low %v1896_v26, %v1900_v27 }
 0x686   : > { %2628 = vmatprep.subr.bf16.mxu1 %v4112_v15  ;;  %v1885_v15 = vld [vmem:[#allocation4 + $0x228] sm:$0xff] }
 0x689   : > { %2629 = vmatpush1.bf16.msra.mxu1 %v4111_v22  ;;  %v1893_v22 = vld [vmem:[#allocation4 + $0x268] sm:$0xff] }
 0x757   : > { %v1625_v51 = vpop.f32.mrb[20].mxu1 }
 0x758   : > { %v1747_v53 = vadd.f32 %v1746_v18, %v1625_v51  ;;  %v1627_v54 = vpop.f32.mrb[21].mxu1  ;;  %v1836_v18 = vld [vmem:[#allocation4 + $0xa0] sm:$0xff]  ;;  %v4146_v51 = vcombine.high %v1857_v43, %v1861_v44 }
 0x759   : > { %v1749_v55 = vadd.f32 %v1748_v19, %v1627_v54  ;;  %v1629_v56 = vpop.f32.mrb[22].mxu1  ;;  %v1833_v19 = vld [vmem:[#allocation4 + $0x88] sm:$0xff]  ;;  %v4120_v58 = vcombine.high %v1832_v17, %v1836_v18  ;;  %v4119_v29 = vcombine.low %v1832_v17, %v1836_v18  ;;  %v4168_v17 = vcombine.high %v1880_v12, %v1884_v4  ;;  %v1888_v18 = vld [vmem:[#allocation4 + $0x240] sm:$0xff] }
 0x75a   : > { %v1765_v14 = vadd.f32 %v1758_v50, %v1747_v53  ;;  %v1630_v8 = vpop.f32.mrb[23].mxu1  ;;  %v4122_v24 = vcombine.high %v1833_v19, %v1837_v21  ;;  %v4121_v30 = vcombine.low %v1833_v19, %v1837_v21  ;;  %v4144_v50 = vcombine.high %v1856_v41, %v1860_v42  ;;  %v1868_v53 = vld [vmem:[#allocation4 + $0x1a0] sm:$0xff]  ;;  %v1865_v54 = vld [vmem:[#allocation4 + $0x188] sm:$0xff] }
 0x75b   : > { %v1766_v57 = vadd.f32 %v1762_v52, %v1749_v55  ;;  %2630 = vmatprep.subr.bf16.mxu1 %v4120_v58  ;;  %v1864_v52 = vld [vmem:[#allocation4 + $0x180] sm:$0xff]  ;;  %v1869_v55 = vld [vmem:[#allocation4 + $0x1a8] sm:$0xff]  ;;  %v4143_v56 = vcombine.low %v1856_v41, %v1860_v42  ;;  %v4169_v58 = vcombine.low %v1881_v13, %v1885_v15 }
 0x75c   : > { %v5534_v59 = vadd.f32 %v1765_v14, %v5352_v0  ;;  %v1825_v0 = vld [vmem:[#allocation4 + $0x48] sm:$0xff]  ;;  %2631 = vmatpush1.bf16.msra.mxu1 %v4119_v29  ;;  %v4145_v14 = vcombine.low %v1857_v43, %v1861_v44  ;;  %v4152_v8 = vcombine.high %v1864_v52, %v1868_v53  ;;  %v4151_v20 = vcombine.low %v1864_v52, %v1868_v53  ;;  %v1892_v19 = vld [vmem:[#allocation4 + $0x260] sm:$0xff] }
 0x75d   : > { %v5537_v60 = vadd.f32 %v1766_v57, %v5296_v45  ;;  %v4114_v45 = vcombine.high %v1825_v0, %v1829_v16  ;;  %v4113_v23 = vcombine.low %v1825_v0, %v1829_v16  ;;  %2632 = vmatprep.subr.bf16.mxu1 %v4128_v31  ;;  %v4154_v57 = vcombine.high %v1865_v54, %v1869_v55  ;;  %v1889_v21 = vld [vmem:[#allocation4 + $0x248] sm:$0xff]  ;;  %v1904_v43 = vld [vmem:[#allocation4 + $0x2c0] sm:$0xff] }
 0x75e   : > { %v4153_v2 = vcombine.low %v1865_v54, %v1869_v55  ;;  %v4161_v16 = vcombine.low %v1873_v63, %v1877_v1  ;;  %v4178_v25 = vcombine.high %v1889_v21, %v1893_v22  ;;  %v1901_v29 = vld [vmem:[#allocation4 + $0x2a8] sm:$0xff]  ;;  %v4177_v31 = vcombine.low %v1889_v21, %v1893_v22  ;;  %v1908_v44 = vld [vmem:[#allocation4 + $0x2e0] sm:$0xff] }
 0x75f   : > { %v1771_v61 = vadd.f32 %v5537_v60, %v5534_v59  ;;  %2669 = vmatprep.subr.bf16.mxu0 %v4114_v45  ;;  %v4170_v45 = vcombine.high %v1881_v13, %v1885_v15  ;;  %v4186_v33 = vcombine.high %v1897_v28, %v1901_v29  ;;  %v4185_v35 = vcombine.low %v1897_v28, %v1901_v29  ;;  %v1916_v53 = vld [vmem:[#allocation4 + $0x320] sm:$0xff]  ;;  %v1913_v54 = vld [vmem:[#allocation4 + $0x308] sm:$0xff]  ;;  %v1819_v28 = vld [vmem:[#allocation4 + $0x18] sm:$0xff] }
 0x760   : > { %2670 = vmatpush1.bf16.msra.mxu0 %v4113_v23  ;;  %2633 = vmatpush1.bf16.msra.mxu1 %v4127_v37  ;;  %v4167_v23 = vcombine.low %v1880_v12, %v1884_v4  ;;  %v1921_v63 = vld [vmem:[#allocation4 + $0x348] sm:$0xff]  ;;  %v1928_v12 = vld [vmem:[#allocation4 + $0x380] sm:$0xff] }
 0x761   : > { %1772 = vadd.xlane.f32.xlu0 %v1771_v61  ;;  %2671 = vmatprep.subr.bf16.mxu0 %v4122_v24  ;;  %v1872_v61 = vld [vmem:[#allocation4 + $0x1c0] sm:$0xff]  ;;  %v4176_v24 = vcombine.high %v1888_v18, %v1892_v19  ;;  %v1929_v13 = vld [vmem:[#allocation4 + $0x388] sm:$0xff] }
 0x762   : > { %2634 = vmatprep.subr.bf16.mxu1 %v4136_v39  ;;  %v4160_v5 = vcombine.high %v1872_v61, %v1876_v62  ;;  %v4159_v0 = vcombine.low %v1872_v61, %v1876_v62  ;;  %v1920_v61 = vld [vmem:[#allocation4 + $0x340] sm:$0xff]  ;;  %v1937_v21 = vld [vmem:[#allocation4 + $0x3c8] sm:$0xff] }
 0x763   : > { %v1924_v62 = vld [vmem:[#allocation4 + $0x360] sm:$0xff] }
 0x764   : > { %2672 = vmatpush1.bf16.msra.mxu0 %v4121_v30  ;;  %2635 = vmatpush1.bf16.msra.mxu1 %v4135_v47  ;;  %v4175_v30 = vcombine.low %v1888_v18, %v1892_v19  ;;  %v1905_v47 = vld [vmem:[#allocation4 + $0x2c8] sm:$0xff]  ;;  %v4208_v1 = vcombine.high %v1920_v61, %v1924_v62  ;;  %v1932_v4 = vld [vmem:[#allocation4 + $0x3a0] sm:$0xff] }
 0x765   : > { %2673 = vmatprep.subr.bf16.mxu0 %v4130_v32  ;;  %2636 = vmatprep.subr.bf16.mxu1 %v4144_v50  ;;  %v4184_v32 = vcombine.high %v1896_v26, %v1900_v27  ;;  %v1909_v50 = vld [vmem:[#allocation4 + $0x2e8] sm:$0xff]  ;;  %v4216_v15 = vcombine.high %v1928_v12, %v1932_v4  ;;  %v1936_v18 = vld [vmem:[#allocation4 + $0x3c0] sm:$0xff]  ;;  %v1818_v26 = vld [vmem:[#allocation4 + $0x10] sm:$0xff] }
 0x766   : > { %v4193_v52 = vcombine.low %v1905_v47, %v1909_v50  ;;  %v1940_v19 = vld [vmem:[#allocation4 + $0x3e0] sm:$0xff]  ;;  %v1822_v27 = vld [vmem:[#allocation4 + $0x30] sm:$0xff] }
 0x767   : > { %v4224_v22 = vcombine.high %v1936_v18, %v1940_v19  ;;  %v4108_v29 = vcombine.high %v1818_v26, %v1822_v27 }
 0x768   : > { %2674 = vmatpush1.bf16.msra.mxu0 %v4129_v38  ;;  %2637 = vmatpush1.bf16.msra.mxu1 %v4143_v56  ;;  %v1917_v56 = vld [vmem:[#allocation4 + $0x328] sm:$0xff] }
 0x769   : > { %2675 = vmatprep.subr.bf16.mxu0 %v4138_v40  ;;  %2638 = vmatprep.subr.bf16.mxu1 %v4152_v8  ;;  %v4201_v8 = vcombine.low %v1913_v54, %v1917_v56 }
 0x76c   : > { %2676 = vmatpush1.bf16.msra.mxu0 %v4137_v49  ;;  %2639 = vmatpush1.bf16.msra.mxu1 %v4151_v20  ;;  %v4192_v49 = vcombine.high %v1904_v43, %v1908_v44  ;;  %v1925_v20 = vld [vmem:[#allocation4 + $0x368] sm:$0xff] }
 0x76d   : > { %2677 = vmatprep.subr.bf16.mxu0 %v4146_v51  ;;  %2640 = vmatprep.subr.bf16.mxu1 %v4160_v5  ;;  %v4191_v51 = vcombine.low %v1904_v43, %v1908_v44  ;;  %v4209_v5 = vcombine.low %v1921_v63, %v1925_v20 }
 0x770   : > { %2678 = vmatpush1.bf16.msra.mxu0 %v4145_v14  ;;  %2641 = vmatpush1.bf16.msra.mxu1 %v4159_v0  ;;  %v1933_v0 = vld [vmem:[#allocation4 + $0x3a8] sm:$0xff] }
 0x771   : > { %2679 = vmatprep.subr.bf16.mxu0 %v4154_v57  ;;  %2642 = vmatprep.subr.bf16.mxu1 %v4168_v17  ;;  %v4202_v57 = vcombine.high %v1913_v54, %v1917_v56  ;;  %v4217_v17 = vcombine.low %v1929_v13, %v1933_v0  ;;  %v1830_v54 = vld [vmem:[#allocation4 + $0x70] sm:$0xff]  ;;  %v1831_v56 = vld [vmem:[#allocation4 + $0x78] sm:$0xff] }
 0x774   : > { %2680 = vmatpush1.bf16.msra.mxu0 %v4153_v2  ;;  %2643 = vmatpush1.bf16.msra.mxu1 %v4167_v23  ;;  %v4207_v2 = vcombine.low %v1920_v61, %v1924_v62  ;;  %v1941_v23 = vld [vmem:[#allocation4 + $0x3e8] sm:$0xff]  ;;  %v1838_v61 = vld [vmem:[#allocation4 + $0xb0] sm:$0xff]  ;;  %v1835_v62 = vld [vmem:[#allocation4 + $0x98] sm:$0xff] }
 0x775   : > { %2681 = vmatprep.subr.bf16.mxu0 %v4162_v11  ;;  %2644 = vmatprep.subr.bf16.mxu1 %v4176_v24  ;;  %v4210_v11 = vcombine.high %v1921_v63, %v1925_v20  ;;  %v4226_v24 = vcombine.high %v1937_v21, %v1941_v23  ;;  %v1839_v63 = vld [vmem:[#allocation4 + $0xb8] sm:$0xff] }
 0x778   : > { %2682 = vmatpush1.bf16.msra.mxu0 %v4161_v16  ;;  %2645 = vmatpush1.bf16.msra.mxu1 %v4175_v30  ;;  %v4215_v16 = vcombine.low %v1928_v12, %v1932_v4  ;;  %v1823_v30 = vld [vmem:[#allocation4 + $0x38] sm:$0xff]  ;;  %v1846_v12 = vld [vmem:[#allocation4 + $0xf0] sm:$0xff] }
 0x779   : > { %2683 = vmatprep.subr.bf16.mxu0 %v4170_v45  ;;  %2646 = vmatprep.subr.bf16.mxu1 %v4184_v32  ;;  %v4218_v45 = vcombine.high %v1929_v13, %v1933_v0  ;;  %v4109_v32 = vcombine.low %v1819_v28, %v1823_v30  ;;  %v1843_v4 = vld [vmem:[#allocation4 + $0xd8] sm:$0xff]  ;;  %v4125_v0 = vcombine.low %v1835_v62, %v1839_v63 }
 0x77a   : > { %v1847_v13 = vld [vmem:[#allocation4 + $0xf8] sm:$0xff] }
 0x77c   : > { %2684 = vmatpush1.bf16.msra.mxu0 %v4169_v58  ;;  %2647 = vmatpush1.bf16.msra.mxu1 %v4183_v34  ;;  %v4223_v58 = vcombine.low %v1936_v18, %v1940_v19  ;;  %v1854_v18 = vld [vmem:[#allocation4 + $0x130] sm:$0xff]  ;;  %v1851_v19 = vld [vmem:[#allocation4 + $0x118] sm:$0xff] }
 0x77d   : > { %2685 = vmatprep.subr.bf16.mxu0 %v4178_v25  ;;  %2648 = vmatprep.subr.bf16.mxu1 %v4192_v49  ;;  %v4225_v25 = vcombine.low %v1937_v21, %v1941_v23  ;;  %v1855_v21 = vld [vmem:[#allocation4 + $0x138] sm:$0xff]  ;;  %v4133_v23 = vcombine.low %v1843_v4, %v1847_v13 }
 0x780   : > { %2686 = vmatpush1.bf16.msra.mxu0 %v4177_v31  ;;  %2649 = vmatpush1.bf16.msra.mxu1 %v4191_v51  ;;  %v4107_v31 = vcombine.low %v1818_v26, %v1822_v27  ;;  %v1862_v26 = vld [vmem:[#allocation4 + $0x170] sm:$0xff]  ;;  %v1859_v27 = vld [vmem:[#allocation4 + $0x158] sm:$0xff] }
 0x781   : > { %2687 = vmatprep.subr.bf16.mxu0 %v4186_v33  ;;  %v4110_v33 = vcombine.high %v1819_v28, %v1823_v30  ;;  %v1863_v28 = vld [vmem:[#allocation4 + $0x178] sm:$0xff]  ;;  %v4141_v30 = vcombine.low %v1851_v19, %v1855_v21 }
 0x784   : > { %2688 = vmatpush1.bf16.msra.mxu0 %v4185_v35 }
 0x7ee   : > { %v1773_v36 = vpop.xlane.xlu0 %1772 }
 0x7ef   : > { %v1775_v37 = vmul.f32 0.00390625, %v1773_v36 }
 0x7f1   : > { %v5542_v38 = vsub.f32 %v5534_v59, %v1775_v37  ;;  %v5545_v39 = vsub.f32 %v5537_v60, %v1775_v37  ;;  %v4194_v59 = vcombine.high %v1905_v47, %v1909_v50  ;;  %v1912_v60 = vld [vmem:[#allocation4 + $0x300] sm:$0xff] }
 0x7f2   : > { %v4200_v55 = vcombine.high %v1912_v60, %v1916_v53  ;;  %v4199_v14 = vcombine.low %v1912_v60, %v1916_v53  ;;  %v1769_v37 = vld [vmem:[%s5661_s6] sm:$0x3]  ;;  %v1826_v53 = vld [vmem:[#allocation4 + $0x50] sm:$0xff] }
 0x7f3   : > { %v1778_v40 = vmul.f32 %v5542_v38, %v5542_v38  ;;  %v1779_v41 = vmul.f32 %v5545_v39, %v5545_v39  ;;  %2689 = vmatprep.subr.bf16.mxu0 %v4194_v59 }
 0x7f4   : > { %2690 = vmatpush1.bf16.msra.mxu0 %v4193_v52  ;;  %2650 = vmatprep.subr.bf16.mxu1 %v4200_v55  ;;  %v1827_v55 = vld [vmem:[#allocation4 + $0x58] sm:$0xff] }
 0x7f5   : > { %v1780_v42 = vadd.f32 %v1779_v41, %v1778_v40  ;;  %2691 = vmatprep.subr.bf16.mxu0 %v4202_v57  ;;  %2651 = vmatpush1.bf16.msra.mxu1 %v4199_v14  ;;  %v1770_v40 = vld [vmem:[%s5662_s7] sm:$0x3]  ;;  %v1796_v41 = vrot.slane %v1769_v37, %v5512_v48  ;;  %v4118_v57 = vcombine.high %v1827_v55, %v1831_v56 }
 0x7f6   : > { %2652 = vmatprep.subr.bf16.mxu1 %v4208_v1  ;;  %v1809_v49 = vrot.slane %v1770_v40, %v5512_v48  ;;  %v1805_v50 = vrot.slane %v1770_v40, %v5378_v9  ;;  %v4115_v1 = vcombine.low %v1826_v53, %v1830_v54  ;;  %v4117_v20 = vcombine.low %v1827_v55, %v1831_v56  ;;  %v1886_v55 = vld [vmem:[#allocation4 + $0x230] sm:$0xff]  ;;  %v1883_v56 = vld [vmem:[#allocation4 + $0x218] sm:$0xff] }
 0x7f7   : > { %1781 = vadd.xlane.f32.xlu1 %v1780_v42  ;;  %v1792_v42 = vrot.slane %v1769_v37, %v5378_v9  ;;  %v4149_v40 = vcombine.low %v1859_v27, %v1863_v28 }
 0x7f8   : > { %2692 = vmatpush1.bf16.msra.mxu0 %v4201_v8  ;;  %v4116_v8 = vcombine.high %v1826_v53, %v1830_v54  ;;  %v1882_v54 = vld [vmem:[#allocation4 + $0x210] sm:$0xff] }
 0x7f9   : > { %2693 = vmatprep.subr.bf16.mxu0 %v4210_v11  ;;  %2653 = vmatpush1.bf16.msra.mxu1 %v4207_v2  ;;  %v1842_v11 = vld [vmem:[#allocation4 + $0xd0] sm:$0xff] }
 0x7fa   : > { %2654 = vmatprep.subr.bf16.mxu1 %v4216_v15 }
 0x7fc   : > { %2694 = vmatpush1.bf16.msra.mxu0 %v4209_v5  ;;  %v4126_v5 = vcombine.high %v1835_v62, %v1839_v63  ;;  %v1890_v62 = vld [vmem:[#allocation4 + $0x250] sm:$0xff] }
 0x7fd   : > { %2695 = vmatprep.subr.bf16.mxu0 %v4218_v45  ;;  %2655 = vmatpush1.bf16.msra.mxu1 %v4215_v16  ;;  %v4132_v16 = vcombine.high %v1842_v11, %v1846_v12  ;;  %v1850_v45 = vld [vmem:[#allocation4 + $0x110] sm:$0xff] }
 0x7fe   : > { %2656 = vmatprep.subr.bf16.mxu1 %v4224_v22  ;;  %v4131_v22 = vcombine.low %v1842_v11, %v1846_v12  ;;  %v1894_v63 = vld [vmem:[#allocation4 + $0x270] sm:$0xff] }
 0x7ff   : > { %v4180_v11 = vcombine.high %v1890_v62, %v1894_v63 }
 0x800   : > { %2696 = vmatpush1.bf16.msra.mxu0 %v4217_v17  ;;  %v4134_v17 = vcombine.high %v1843_v4, %v1847_v13  ;;  %v1898_v4 = vld [vmem:[#allocation4 + $0x290] sm:$0xff] }
 0x801   : > { %2697 = vmatprep.subr.bf16.mxu0 %v4226_v24  ;;  %2657 = vmatpush1.bf16.msra.mxu1 %v4223_v58  ;;  %v4140_v58 = vcombine.high %v1850_v45, %v1854_v18  ;;  %v4142_v24 = vcombine.high %v1851_v19, %v1855_v21  ;;  %v1902_v13 = vld [vmem:[#allocation4 + $0x2b0] sm:$0xff] }
 0x802   : > { %2708 = vmatprep.subr.bf16.mxu1 %v4108_v29  ;;  %v4139_v29 = vcombine.low %v1850_v45, %v1854_v18  ;;  %v4188_v45 = vcombine.high %v1898_v4, %v1902_v13  ;;  %v1906_v19 = vld [vmem:[#allocation4 + $0x2d0] sm:$0xff] }
 0x803   : > { %v1910_v21 = vld [vmem:[#allocation4 + $0x2f0] sm:$0xff] }
 0x804   : > { %2698 = vmatpush1.bf16.msra.mxu0 %v4225_v25  ;;  %v1858_v25 = vld [vmem:[#allocation4 + $0x150] sm:$0xff] }
 0x805   : > { %2749 = vmatprep.subr.bf16.mxu0 %v4110_v33  ;;  %v1866_v33 = vld [vmem:[#allocation4 + $0x190] sm:$0xff]  ;;  %v4147_v37 = vcombine.low %v1858_v25, %v1862_v26 }
 0x884   : > { %v1782_v34 = vpop.xlane.xlu1 %1781 }
 0x885   : > { %v1783_v35 = vmul.f32 0.00390625, %v1782_v34  ;;  %v1870_v34 = vld [vmem:[#allocation4 + $0x1b0] sm:$0xff] }
 0x887   : > { %v1784_v36 = vadd.f32 1e-12, %v1783_v35  ;;  %v1867_v35 = vld [vmem:[#allocation4 + $0x198] sm:$0xff] }
 0x889   : > { %4833 = vrsqrt.f32 %v1784_v36  ;;  %v1871_v36 = vld [vmem:[#allocation4 + $0x1b8] sm:$0xff] }
 0x893   : > { %v4834_v43 = vpop.eup %4833 }
 0x894   : > { %v1786_v44 = vmul.f32 %v4834_v43, %v5542_v38  ;;  %v1787_v47 = vmul.f32 %v4834_v43, %v5545_v39  ;;  %v1834_v39 = vld [vmem:[#allocation4 + $0x90] sm:$0xff] }
 0x895   : > { %v4124_v2 = vcombine.high %v1834_v39, %v1838_v61  ;;  %v4123_v15 = vcombine.low %v1834_v39, %v1838_v61  ;;  %v1874_v43 = vld [vmem:[#allocation4 + $0x1d0] sm:$0xff] }
 0x896   : > { %v1800_v51 = vmul.f32 %v1796_v41, %v1787_v47  ;;  %v1799_v52 = vmul.f32 %v1792_v42, %v1786_v44  ;;  %v4156_v41 = vcombine.high %v1866_v33, %v1870_v34  ;;  %v4158_v42 = vcombine.high %v1867_v35, %v1871_v36  ;;  %v1878_v44 = vld [vmem:[#allocation4 + $0x1f0] sm:$0xff]  ;;  %v1875_v47 = vld [vmem:[#allocation4 + $0x1d8] sm:$0xff] }
 0x897   : > { %v4163_v39 = vcombine.low %v1874_v43, %v1878_v44 }
 0x898   : > { %v5563_v59 = vadd.f32 %v1809_v49, %v1800_v51  ;;  %v5565_v60 = vadd.f32 %v1805_v50, %v1799_v52  ;;  %v1879_v49 = vld [vmem:[#allocation4 + $0x1f8] sm:$0xff]  ;;  %v4155_v50 = vcombine.low %v1866_v33, %v1870_v34  ;;  %v4157_v51 = vcombine.low %v1867_v35, %v1871_v36  ;;  %v1922_v35 = vld [vmem:[#allocation4 + $0x350] sm:$0xff] }
 0x899   : > { %v4164_v52 = vcombine.high %v1874_v43, %v1878_v44  ;;  %v4166_v53 = vcombine.high %v1875_v47, %v1879_v49  ;;  %v1926_v36 = vld [vmem:[#allocation4 + $0x370] sm:$0xff] }
 0x89a   : > { %v1815_v14 = vpack.c.bf16 %v5563_v59, %v5563_v59  ;;  %v5571_v38 = vpack.c.bf16 %v5565_v60, %v5565_v60  ;;  %v4212_v43 = vcombine.high %v1922_v35, %v1926_v36 }
 0x89c   : > { %2658 = vmatprep.mubr.bf16.mxu1 %v1815_v14  ;;  %2699 = vmatprep.mubr.bf16.mxu0 %v1815_v14 }
 0x89d   : > { %2659 = vmatmul.mubr.bf16.vlgmr.msra.gmra.mrb[24].mxu1 %v5571_v38  ;;  %2700 = vmatmul.mubr.bf16.vlgmr.msra.gmra.mrb[12].mxu0 %v5571_v38 }
 0x89e   : > { %2709 = vmatpush1.bf16.msra.mxu1 %v4107_v31  ;;  %2750 = vmatpush1.bf16.msra.mxu0 %v4109_v32  ;;  %v4148_v31 = vcombine.high %v1858_v25, %v1862_v26  ;;  %v4150_v32 = vcombine.high %v1859_v27, %v1863_v28  ;;  %v4196_v25 = vcombine.high %v1906_v19, %v1910_v21  ;;  %v1914_v27 = vld [vmem:[#allocation4 + $0x310] sm:$0xff] }
 0x89f   : > { %2740 = vmatprep.mubr.bf16.mxu1 %v1815_v14  ;;  %2781 = vmatprep.mubr.bf16.mxu0 %v1815_v14  ;;  %v1887_v14 = vld [vmem:[#allocation4 + $0x238] sm:$0xff]  ;;  %v1918_v28 = vld [vmem:[#allocation4 + $0x330] sm:$0xff] }
 0x8a0   : > { %2710 = vmatprep.subr.bf16.mxu1 %v4116_v8  ;;  %2751 = vmatprep.subr.bf16.mxu0 %v4118_v57  ;;  %v4165_v8 = vcombine.low %v1875_v47, %v1879_v49  ;;  %v4172_v57 = vcombine.high %v1882_v54, %v1886_v55  ;;  %v4174_v61 = vcombine.high %v1883_v56, %v1887_v14  ;;  %v1930_v47 = vld [vmem:[#allocation4 + $0x390] sm:$0xff] }
 0x8a1   : > { %v4204_v33 = vcombine.high %v1914_v27, %v1918_v28  ;;  %v1934_v49 = vld [vmem:[#allocation4 + $0x3b0] sm:$0xff] }
 0x8a2   : > { %2711 = vmatpush1.bf16.msra.mxu1 %v4115_v1  ;;  %2752 = vmatpush1.bf16.msra.mxu0 %v4117_v20  ;;  %v1891_v1 = vld [vmem:[#allocation4 + $0x258] sm:$0xff] }
 0x8a3   : > { %2712 = vmatprep.subr.bf16.mxu1 %v4124_v2  ;;  %2753 = vmatprep.subr.bf16.mxu0 %v4126_v5  ;;  %v1895_v20 = vld [vmem:[#allocation4 + $0x278] sm:$0xff]  ;;  %v4171_v2 = vcombine.low %v1882_v54, %v1886_v55  ;;  %v4173_v5 = vcombine.low %v1883_v56, %v1887_v14  ;;  %v4220_v54 = vcombine.high %v1930_v47, %v1934_v49  ;;  %v1938_v56 = vld [vmem:[#allocation4 + $0x3d0] sm:$0xff] }
 0x8a4   : > { %v4182_v12 = vcombine.high %v1891_v1, %v1895_v20  ;;  %v1942_v14 = vld [vmem:[#allocation4 + $0x3f0] sm:$0xff] }
 0x8a6   : > { %2713 = vmatpush1.bf16.msra.mxu1 %v4123_v15  ;;  %2754 = vmatpush1.bf16.msra.mxu0 %v4125_v0  ;;  %v1899_v15 = vld [vmem:[#allocation4 + $0x298] sm:$0xff] }
 0x8a7   : > { %2714 = vmatprep.subr.bf16.mxu1 %v4132_v16  ;;  %2755 = vmatprep.subr.bf16.mxu0 %v4134_v17  ;;  %v1903_v0 = vld [vmem:[#allocation4 + $0x2b8] sm:$0xff]  ;;  %v4179_v16 = vcombine.low %v1890_v62, %v1894_v63  ;;  %v4181_v17 = vcombine.low %v1891_v1, %v1895_v20  ;;  %v4228_v62 = vcombine.high %v1938_v56, %v1942_v14 }
 0x8a8   : > { %v4190_v18 = vcombine.high %v1899_v15, %v1903_v0  ;;  %v4227_v1 = vcombine.low %v1938_v56, %v1942_v14  ;;  %v4704_v56 = vld [vmem:[#allocation6 + $0x1b4] ss:$8 sps:$4 sm:$0xff]   ;;  %v4699_v14 = vld [vmem:[#allocation6 + $0xb0] ss:$8 sps:$4 sm:$0xff]  }
 0x8aa   : > { %2715 = vmatpush1.bf16.msra.mxu1 %v4131_v22  ;;  %2756 = vmatpush1.bf16.msra.mxu0 %v4133_v23  ;;  %v1907_v22 = vld [vmem:[#allocation4 + $0x2d8] sm:$0xff] }
 0x8ab   : > { %2716 = vmatprep.subr.bf16.mxu1 %v4140_v58  ;;  %2757 = vmatprep.subr.bf16.mxu0 %v4142_v24  ;;  %v1911_v23 = vld [vmem:[#allocation4 + $0x2f8] sm:$0xff]  ;;  %v4187_v58 = vcombine.low %v1898_v4, %v1902_v13  ;;  %v4189_v24 = vcombine.low %v1899_v15, %v1903_v0 }
 0x8ac   : > { %v4198_v26 = vcombine.high %v1907_v22, %v1911_v23  ;;  %v4641_v4 = vld [vmem:[#allocation6 + $0x14] ss:$8 sps:$4 sm:$0xff]   ;;  %v4639_v15 = vld [vmem:[#allocation6 + $0x10] ss:$8 sps:$4 sm:$0xff]  }
 0x8ad   : > { %v4644_v13 = vld [vmem:[#allocation6 + $0x114] ss:$8 sps:$4 sm:$0xff]   ;;  %v4642_v0 = vld [vmem:[#allocation6 + $0x110] ss:$8 sps:$4 sm:$0xff]  }
 0x8ae   : > { %2717 = vmatpush1.bf16.msra.mxu1 %v4139_v29  ;;  %2758 = vmatpush1.bf16.msra.mxu0 %v4141_v30  ;;  %v1915_v29 = vld [vmem:[#allocation4 + $0x318] sm:$0xff] }
 0x8af   : > { %2718 = vmatprep.subr.bf16.mxu1 %v4148_v31  ;;  %2759 = vmatprep.subr.bf16.mxu0 %v4150_v32  ;;  %v1919_v30 = vld [vmem:[#allocation4 + $0x338] sm:$0xff]  ;;  %v4195_v31 = vcombine.low %v1906_v19, %v1910_v21  ;;  %v4197_v32 = vcombine.low %v1907_v22, %v1911_v23  ;;  %v4659_v23 = vld [vmem:[#allocation6 + $0x44] ss:$8 sps:$4 sm:$0xff]  }
 0x8b0   : > { %v4206_v34 = vcombine.high %v1915_v29, %v1919_v30  ;;  %v4653_v19 = vld [vmem:[#allocation6 + $0x34] ss:$8 sps:$4 sm:$0xff]   ;;  %v4651_v22 = vld [vmem:[#allocation6 + $0x30] ss:$8 sps:$4 sm:$0xff]  }
 0x8b1   : > { %v4656_v21 = vld [vmem:[#allocation6 + $0x134] ss:$8 sps:$4 sm:$0xff]  }
 0x8b2   : > { %2719 = vmatpush1.bf16.msra.mxu1 %v4147_v37  ;;  %2760 = vmatpush1.bf16.msra.mxu0 %v4149_v40  ;;  %v1923_v37 = vld [vmem:[#allocation4 + $0x358] sm:$0xff] }
 0x8b3   : > { %2720 = vmatprep.subr.bf16.mxu1 %v4156_v41  ;;  %2761 = vmatprep.subr.bf16.mxu0 %v4158_v42  ;;  %v1927_v40 = vld [vmem:[#allocation4 + $0x378] sm:$0xff]  ;;  %v4203_v41 = vcombine.low %v1914_v27, %v1918_v28  ;;  %v4205_v42 = vcombine.low %v1915_v29, %v1919_v30  ;;  %v4671_v30 = vld [vmem:[#allocation6 + $0x64] ss:$8 sps:$4 sm:$0xff]  }
 0x8b4   : > { %v4214_v44 = vcombine.high %v1923_v37, %v1927_v40  ;;  %v4668_v27 = vld [vmem:[#allocation6 + $0x154] ss:$8 sps:$4 sm:$0xff]   ;;  %v4663_v28 = vld [vmem:[#allocation6 + $0x50] ss:$8 sps:$4 sm:$0xff]  }
 0x8b5   : > { %v4666_v29 = vld [vmem:[#allocation6 + $0x150] ss:$8 sps:$4 sm:$0xff]  }
 0x8b6   : > { %2721 = vmatpush1.bf16.msra.mxu1 %v4155_v50  ;;  %2762 = vmatpush1.bf16.msra.mxu0 %v4157_v51  ;;  %v1931_v50 = vld [vmem:[#allocation4 + $0x398] sm:$0xff] }
 0x8b7   : > { %2722 = vmatprep.subr.bf16.mxu1 %v4164_v52  ;;  %2763 = vmatprep.subr.bf16.mxu0 %v4166_v53  ;;  %v1935_v51 = vld [vmem:[#allocation4 + $0x3b8] sm:$0xff]  ;;  %v4211_v52 = vcombine.low %v1922_v35, %v1926_v36  ;;  %v4213_v53 = vcombine.low %v1923_v37, %v1927_v40  ;;  %v4683_v40 = vld [vmem:[#allocation6 + $0x84] ss:$8 sps:$4 sm:$0xff]  }
 0x8b8   : > { %v4222_v55 = vcombine.high %v1931_v50, %v1935_v51  ;;  %v4680_v35 = vld [vmem:[#allocation6 + $0x174] ss:$8 sps:$4 sm:$0xff]   ;;  %v4675_v36 = vld [vmem:[#allocation6 + $0x70] ss:$8 sps:$4 sm:$0xff]  }
 0x8b9   : > { %v4678_v37 = vld [vmem:[#allocation6 + $0x170] ss:$8 sps:$4 sm:$0xff]  }
 0x8ba   : > { %2723 = vmatpush1.bf16.msra.mxu1 %v4163_v39  ;;  %2764 = vmatpush1.bf16.msra.mxu0 %v4165_v8  ;;  %v1939_v39 = vld [vmem:[#allocation4 + $0x3d8] sm:$0xff] }
 0x8bb   : > { %2724 = vmatprep.subr.bf16.mxu1 %v4172_v57  ;;  %2765 = vmatprep.subr.bf16.mxu0 %v4174_v61  ;;  %v1943_v8 = vld [vmem:[#allocation4 + $0x3f8] sm:$0xff]  ;;  %v4219_v57 = vcombine.low %v1930_v47, %v1934_v49  ;;  %v4221_v61 = vcombine.low %v1931_v50, %v1935_v51  ;;  %v4695_v51 = vld [vmem:[#allocation6 + $0xa4] ss:$8 sps:$4 sm:$0xff]  }
 0x8bc   : > { %v4230_v63 = vcombine.high %v1939_v39, %v1943_v8  ;;  %v4229_v20 = vcombine.low %v1939_v39, %v1943_v8  ;;  %v4692_v47 = vld [vmem:[#allocation6 + $0x194] ss:$8 sps:$4 sm:$0xff]   ;;  %v4687_v49 = vld [vmem:[#allocation6 + $0x90] ss:$8 sps:$4 sm:$0xff]   ;;  %v4707_v8 = vld [vmem:[#allocation6 + $0xc4] ss:$8 sps:$4 sm:$0xff]  }
 0x8bd   : > { %v4690_v50 = vld [vmem:[#allocation6 + $0x190] ss:$8 sps:$4 sm:$0xff]  }
 0x8be   : > { %2725 = vmatpush1.bf16.msra.mxu1 %v4171_v2  ;;  %2766 = vmatpush1.bf16.msra.mxu0 %v4173_v5  ;;  %v4635_v2 = vld [vmem:[#allocation6 + $0x4] ss:$8 sps:$4 sm:$0xff]   ;;  %v4702_v39 = vld [vmem:[#allocation6 + $0x1b0] ss:$8 sps:$4 sm:$0xff]  }
 0x8bf   : > { %2726 = vmatprep.subr.bf16.mxu1 %v4180_v11  ;;  %2767 = vmatprep.subr.bf16.mxu0 %v4182_v12  ;;  %v4638_v5 = vld [vmem:[#allocation6 + $0x104] ss:$8 sps:$4 sm:$0xff]   ;;  %v4633_v11 = vld [vmem:[#allocation6] ss:$8 sps:$4 sm:$0xff]  }
 0x8c0   : > { %v4636_v12 = vld [vmem:[#allocation6 + $0x100] ss:$8 sps:$4 sm:$0xff]  }
 0x8c2   : > { %2727 = vmatpush1.bf16.msra.mxu1 %v4179_v16  ;;  %2768 = vmatpush1.bf16.msra.mxu0 %v4181_v17  ;;  %v4647_v16 = vld [vmem:[#allocation6 + $0x24] ss:$8 sps:$4 sm:$0xff]  }
 0x8c3   : > { %2728 = vmatprep.subr.bf16.mxu1 %v4188_v45  ;;  %2769 = vmatprep.subr.bf16.mxu0 %v4190_v18  ;;  %v4650_v17 = vld [vmem:[#allocation6 + $0x124] ss:$8 sps:$4 sm:$0xff]   ;;  %v4645_v45 = vld [vmem:[#allocation6 + $0x20] ss:$8 sps:$4 sm:$0xff]  }
 0x8c4   : > { %v4648_v18 = vld [vmem:[#allocation6 + $0x120] ss:$8 sps:$4 sm:$0xff]  }
 0x8c6   : > { %2729 = vmatpush1.bf16.msra.mxu1 %v4187_v58  ;;  %2770 = vmatpush1.bf16.msra.mxu0 %v4189_v24  ;;  %v4662_v58 = vld [vmem:[#allocation6 + $0x144] ss:$8 sps:$4 sm:$0xff]   ;;  %v4657_v24 = vld [vmem:[#allocation6 + $0x40] ss:$8 sps:$4 sm:$0xff]  }
 0x8c7   : > { %2730 = vmatprep.subr.bf16.mxu1 %v4196_v25  ;;  %2771 = vmatprep.subr.bf16.mxu0 %v4198_v26  ;;  %v4660_v25 = vld [vmem:[#allocation6 + $0x140] ss:$8 sps:$4 sm:$0xff]   ;;  %v4665_v26 = vld [vmem:[#allocation6 + $0x54] ss:$8 sps:$4 sm:$0xff]  }
 0x8ca   : > { %2731 = vmatpush1.bf16.msra.mxu1 %v4195_v31  ;;  %2772 = vmatpush1.bf16.msra.mxu0 %v4197_v32  ;;  %v4674_v31 = vld [vmem:[#allocation6 + $0x164] ss:$8 sps:$4 sm:$0xff]   ;;  %v4669_v32 = vld [vmem:[#allocation6 + $0x60] ss:$8 sps:$4 sm:$0xff]  }
 0x8cb   : > { %2732 = vmatprep.subr.bf16.mxu1 %v4204_v33  ;;  %2773 = vmatprep.subr.bf16.mxu0 %v4206_v34  ;;  %v4672_v33 = vld [vmem:[#allocation6 + $0x160] ss:$8 sps:$4 sm:$0xff]   ;;  %v4677_v34 = vld [vmem:[#allocation6 + $0x74] ss:$8 sps:$4 sm:$0xff]  }
 0x8ce   : > { %2733 = vmatpush1.bf16.msra.mxu1 %v4203_v41  ;;  %2774 = vmatpush1.bf16.msra.mxu0 %v4205_v42  ;;  %v4686_v41 = vld [vmem:[#allocation6 + $0x184] ss:$8 sps:$4 sm:$0xff]   ;;  %v4681_v42 = vld [vmem:[#allocation6 + $0x80] ss:$8 sps:$4 sm:$0xff]  }
 0x8cf   : > { %2734 = vmatprep.subr.bf16.mxu1 %v4212_v43  ;;  %2775 = vmatprep.subr.bf16.mxu0 %v4214_v44  ;;  %v4684_v43 = vld [vmem:[#allocation6 + $0x180] ss:$8 sps:$4 sm:$0xff]   ;;  %v4689_v44 = vld [vmem:[#allocation6 + $0x94] ss:$8 sps:$4 sm:$0xff]  }
 0x8d2   : > { %2735 = vmatpush1.bf16.msra.mxu1 %v4211_v52  ;;  %2776 = vmatpush1.bf16.msra.mxu0 %v4213_v53  ;;  %v4698_v52 = vld [vmem:[#allocation6 + $0x1a4] ss:$8 sps:$4 sm:$0xff]   ;;  %v4693_v53 = vld [vmem:[#allocation6 + $0xa0] ss:$8 sps:$4 sm:$0xff]  }
 0x8d3   : > { %2736 = vmatprep.subr.bf16.mxu1 %v4220_v54  ;;  %2777 = vmatprep.subr.bf16.mxu0 %v4222_v55  ;;  %v4696_v54 = vld [vmem:[#allocation6 + $0x1a0] ss:$8 sps:$4 sm:$0xff]   ;;  %v4701_v55 = vld [vmem:[#allocation6 + $0xb4] ss:$8 sps:$4 sm:$0xff]  }
 0x8d6   : > { %2737 = vmatpush1.bf16.msra.mxu1 %v4219_v57  ;;  %2778 = vmatpush1.bf16.msra.mxu0 %v4221_v61  ;;  %v4710_v57 = vld [vmem:[#allocation6 + $0x1c4] ss:$8 sps:$4 sm:$0xff]   ;;  %v4705_v61 = vld [vmem:[#allocation6 + $0xc0] ss:$8 sps:$4 sm:$0xff]  }
 0x8d7   : > { %2738 = vmatprep.subr.bf16.mxu1 %v4228_v62  ;;  %2779 = vmatprep.subr.bf16.mxu0 %v4230_v63  ;;  %v4708_v62 = vld [vmem:[#allocation6 + $0x1c0] ss:$8 sps:$4 sm:$0xff]   ;;  %v4713_v63 = vld [vmem:[#allocation6 + $0xd4] ss:$8 sps:$4 sm:$0xff]  }
 0x8da   : > { %2739 = vmatpush1.bf16.msra.mxu1 %v4227_v1  ;;  %2780 = vmatpush1.bf16.msra.mxu0 %v4229_v20  ;;  %v4716_v1 = vld [vmem:[#allocation6 + $0x1d4] ss:$8 sps:$4 sm:$0xff]   ;;  %v4711_v20 = vld [vmem:[#allocation6 + $0xd0] ss:$8 sps:$4 sm:$0xff]  }
 0x8db   : > { %3650 = vmatprep.subr.bf16.mxu1 %v4635_v2  ;;  %3691 = vmatprep.subr.bf16.mxu0 %v4638_v5  ;;  %v4714_v2 = vld [vmem:[#allocation6 + $0x1d0] ss:$8 sps:$4 sm:$0xff]   ;;  %v4719_v5 = vld [vmem:[#allocation6 + $0xe4] ss:$8 sps:$4 sm:$0xff]  }
 0x8dd   : > { %2741 = vmatmul.mubr.bf16.vlgmr.msra.gmra.mrb[28].mxu1 %v5571_v38  ;;  %2782 = vmatmul.mubr.bf16.vlgmr.msra.gmra.mrb[16].mxu0 %v5571_v38  ;;  %v4654_v38 = vld [vmem:[#allocation6 + $0x130] ss:$8 sps:$4 sm:$0xff]  }
 0x8de   : > { %3651 = vmatpush1.bf16.msra.mxu1 %v4633_v11  ;;  %3692 = vmatpush1.bf16.msra.mxu0 %v4636_v12  ;;  %v4722_v11 = vld [vmem:[#allocation6 + $0x1e4] ss:$8 sps:$4 sm:$0xff]   ;;  %v4717_v12 = vld [vmem:[#allocation6 + $0xe0] ss:$8 sps:$4 sm:$0xff]  }
 0x8df   : > { %3652 = vmatprep.subr.bf16.mxu1 %v4641_v4  ;;  %3693 = vmatprep.subr.bf16.mxu0 %v4644_v13  ;;  %v4720_v4 = vld [vmem:[#allocation6 + $0x1e0] ss:$8 sps:$4 sm:$0xff]   ;;  %v4725_v13 = vld [vmem:[#allocation6 + $0xf4] ss:$8 sps:$4 sm:$0xff]  }
 0x8e2   : > { %3653 = vmatpush1.bf16.msra.mxu1 %v4639_v15  ;;  %3694 = vmatpush1.bf16.msra.mxu0 %v4642_v0  ;;  %v4728_v15 = vld [vmem:[#allocation6 + $0x1f4] ss:$8 sps:$4 sm:$0xff]   ;;  %v4723_v0 = vld [vmem:[#allocation6 + $0xf0] ss:$8 sps:$4 sm:$0xff]  }
 0x8e3   : > { %3654 = vmatprep.subr.bf16.mxu1 %v4647_v16  ;;  %3695 = vmatprep.subr.bf16.mxu0 %v4650_v17  ;;  %v4726_v16 = vld [vmem:[#allocation6 + $0x1f0] ss:$8 sps:$4 sm:$0xff]   ;;  %v4731_v17 = vld [vmem:[#allocation6 + $0x204] ss:$8 sps:$4 sm:$0xff]  }
 0x8e6   : > { %3655 = vmatpush1.bf16.msra.mxu1 %v4645_v45  ;;  %3696 = vmatpush1.bf16.msra.mxu0 %v4648_v18  ;;  %v4734_v45 = vld [vmem:[#allocation6 + $0x304] ss:$8 sps:$4 sm:$0xff]  }
 0x8e7   : > { %3656 = vmatprep.subr.bf16.mxu1 %v4653_v19  ;;  %3697 = vmatprep.subr.bf16.mxu0 %v4656_v21  ;;  %v5580_v18 = vld [vmem:[%s5664_s9] sm:$0xff] }
 0x8e8   : > { %v1949_v19 = vrot.slane %v5580_v18, %v5378_v9  ;;  %v1957_v21 = vrot.slane %v5580_v18, %v640_v7 }
 0x8ea   : > { %3657 = vmatpush1.bf16.msra.mxu1 %v4651_v22  ;;  %3698 = vmatpush1.bf16.msra.mxu0 %v4654_v38  ;;  %v1953_v22 = vrot.slane %v5580_v18, %v5512_v48  ;;  %v1961_v38 = vrot.slane %v5580_v18, %v644_v46 }
 0x8eb   : > { %3658 = vmatprep.subr.bf16.mxu1 %v4659_v23  ;;  %3699 = vmatprep.subr.bf16.mxu0 %v4662_v58 }
 0x8ee   : > { %3659 = vmatpush1.bf16.msra.mxu1 %v4657_v24  ;;  %3700 = vmatpush1.bf16.msra.mxu0 %v4660_v25 }
 0x8ef   : > { %3660 = vmatprep.subr.bf16.mxu1 %v4665_v26  ;;  %3701 = vmatprep.subr.bf16.mxu0 %v4668_v27 }
 0x8f2   : > { %3661 = vmatpush1.bf16.msra.mxu1 %v4663_v28  ;;  %3702 = vmatpush1.bf16.msra.mxu0 %v4666_v29 }
 0x8f3   : > { %3662 = vmatprep.subr.bf16.mxu1 %v4671_v30  ;;  %3703 = vmatprep.subr.bf16.mxu0 %v4674_v31 }
 0x8f6   : > { %3663 = vmatpush1.bf16.msra.mxu1 %v4669_v32  ;;  %3704 = vmatpush1.bf16.msra.mxu0 %v4672_v33 }
 0x8f7   : > { %3664 = vmatprep.subr.bf16.mxu1 %v4677_v34  ;;  %3705 = vmatprep.subr.bf16.mxu0 %v4680_v35 }
 0x8fa   : > { %3665 = vmatpush1.bf16.msra.mxu1 %v4675_v36  ;;  %3706 = vmatpush1.bf16.msra.mxu0 %v4678_v37 }
 0x8fb   : > { %3666 = vmatprep.subr.bf16.mxu1 %v4683_v40  ;;  %3707 = vmatprep.subr.bf16.mxu0 %v4686_v41 }
 0x8fe   : > { %3667 = vmatpush1.bf16.msra.mxu1 %v4681_v42  ;;  %3708 = vmatpush1.bf16.msra.mxu0 %v4684_v43 }
 0x8ff   : > { %3668 = vmatprep.subr.bf16.mxu1 %v4689_v44  ;;  %3709 = vmatprep.subr.bf16.mxu0 %v4692_v47 }
 0x902   : > { %3669 = vmatpush1.bf16.msra.mxu1 %v4687_v49  ;;  %3710 = vmatpush1.bf16.msra.mxu0 %v4690_v50 }
 0x903   : > { %3670 = vmatprep.subr.bf16.mxu1 %v4695_v51  ;;  %3711 = vmatprep.subr.bf16.mxu0 %v4698_v52 }
 0x906   : > { %3671 = vmatpush1.bf16.msra.mxu1 %v4693_v53  ;;  %3712 = vmatpush1.bf16.msra.mxu0 %v4696_v54 }
 0x907   : > { %3672 = vmatprep.subr.bf16.mxu1 %v4701_v55  ;;  %3713 = vmatprep.subr.bf16.mxu0 %v4704_v56 }
 0x90a   : > { %3673 = vmatpush1.bf16.msra.mxu1 %v4699_v14  ;;  %3714 = vmatpush1.bf16.msra.mxu0 %v4702_v39 }
 0x90b   : > { %3674 = vmatprep.subr.bf16.mxu1 %v4707_v8  ;;  %3715 = vmatprep.subr.bf16.mxu0 %v4710_v57 }
 0x90e   : > { %3675 = vmatpush1.bf16.msra.mxu1 %v4705_v61  ;;  %3716 = vmatpush1.bf16.msra.mxu0 %v4708_v62 }
 0x90f   : > { %3676 = vmatprep.subr.bf16.mxu1 %v4713_v63  ;;  %3717 = vmatprep.subr.bf16.mxu0 %v4716_v1 }
 0x912   : > { %3677 = vmatpush1.bf16.msra.mxu1 %v4711_v20  ;;  %3718 = vmatpush1.bf16.msra.mxu0 %v4714_v2 }
 0x913   : > { %3678 = vmatprep.subr.bf16.mxu1 %v4719_v5  ;;  %3719 = vmatprep.subr.bf16.mxu0 %v4722_v11 }
 0x916   : > { %3679 = vmatpush1.bf16.msra.mxu1 %v4717_v12  ;;  %3720 = vmatpush1.bf16.msra.mxu0 %v4720_v4 }
 0x917   : > { %3680 = vmatprep.subr.bf16.mxu1 %v4725_v13  ;;  %3721 = vmatprep.subr.bf16.mxu0 %v4728_v15 }
 0x91a   : > { %3681 = vmatpush1.bf16.msra.mxu1 %v4723_v0  ;;  %3722 = vmatpush1.bf16.msra.mxu0 %v4726_v16  ;;  %v4729_v0 = vld [vmem:[#allocation6 + $0x200] ss:$8 sps:$4 sm:$0xff]  }
 0x91b   : > { %3732 = vmatprep.subr.bf16.mxu1 %v4731_v17  ;;  %3773 = vmatprep.subr.bf16.mxu0 %v4734_v45  ;;  %v4732_v45 = vld [vmem:[#allocation6 + $0x300] ss:$8 sps:$4 sm:$0xff]  }
 0x970   : > { %v2660_v23 = vpop.f32.mrb[24].mxu1  ;;  %v2701_v58 = vpop.f32.mrb[12].mxu0 }
 0x971   : > { %v2661_v24 = vadd.f32 %v2660_v23, %v1949_v19  ;;  %v2702_v25 = vadd.f32 %v2701_v58, %v1957_v21  ;;  %v2662_v26 = vpop.f32.mrb[25].mxu1  ;;  %v2703_v27 = vpop.f32.mrb[13].mxu0  ;;  %v4737_v21 = vld [vmem:[#allocation6 + $0x214] ss:$8 sps:$4 sm:$0xff]   ;;  %v4735_v23 = vld [vmem:[#allocation6 + $0x210] ss:$8 sps:$4 sm:$0xff]  }
 0x972   : > { %v2663_v28 = vadd.f32 %v2662_v26, %v1953_v22  ;;  %v2704_v29 = vadd.f32 %v2703_v27, %v1961_v38  ;;  %v2664_v30 = vpop.f32.mrb[26].mxu1  ;;  %v2705_v31 = vpop.f32.mrb[14].mxu0  ;;  %v4740_v38 = vld [vmem:[#allocation6 + $0x314] ss:$8 sps:$4 sm:$0xff]   ;;  %v4738_v58 = vld [vmem:[#allocation6 + $0x310] ss:$8 sps:$4 sm:$0xff]  }
 0x973   : > { %v2798_v32 = vmul.f32 0.044715, %v2661_v24  ;;  %v2800_v33 = vmul.f32 0.044715, %v2702_v25  ;;  %v2665_v7 = vpop.f32.mrb[27].mxu1  ;;  %v2706_v34 = vpop.f32.mrb[15].mxu0 }
 0x974   : > { %v2799_v35 = vmul.f32 0.044715, %v2663_v28  ;;  %v2801_v36 = vmul.f32 0.044715, %v2704_v29  ;;  %v2790_v8 = vmul.f32 0.5, %v2661_v24  ;;  %v2791_v62 = vmul.f32 0.5, %v2663_v28 }
 0x975   : > { %v2806_v37 = vmul.f32 %v2798_v32, %v2661_v24  ;;  %v2808_v40 = vmul.f32 %v2800_v33, %v2702_v25  ;;  %v2793_v20 = vmul.f32 0.5, %v2704_v29  ;;  %v2792_v12 = vmul.f32 0.5, %v2702_v25  ;;  %v4741_v26 = vld [vmem:[#allocation6 + $0x220] ss:$8 sps:$4 sm:$0xff]   ;;  %v4747_v30 = vld [vmem:[#allocation6 + $0x230] ss:$8 sps:$4 sm:$0xff]  }
 0x976   : > { %v2807_v41 = vmul.f32 %v2799_v35, %v2663_v28  ;;  %v2809_v46 = vmul.f32 %v2801_v36, %v2704_v29  ;;  %v4744_v27 = vld [vmem:[#allocation6 + $0x320] ss:$8 sps:$4 sm:$0xff]   ;;  %v4750_v31 = vld [vmem:[#allocation6 + $0x330] ss:$8 sps:$4 sm:$0xff]   ;;  %v4755_v32 = vld [vmem:[#allocation6 + $0x244] ss:$8 sps:$4 sm:$0xff]  }
 0x977   : > { %v2814_v42 = vmul.f32 %v2806_v37, %v2661_v24  ;;  %v2816_v43 = vmul.f32 %v2808_v40, %v2702_v25  ;;  %v4758_v33 = vld [vmem:[#allocation6 + $0x344] ss:$8 sps:$4 sm:$0xff]   ;;  %v4753_v7 = vld [vmem:[#allocation6 + $0x240] ss:$8 sps:$4 sm:$0xff]   ;;  %v4761_v35 = vld [vmem:[#allocation6 + $0x254] ss:$8 sps:$4 sm:$0xff]  }
 0x978   : > { %v2815_v44 = vmul.f32 %v2807_v41, %v2663_v28  ;;  %v2817_v47 = vmul.f32 %v2809_v46, %v2704_v29  ;;  %v4756_v34 = vld [vmem:[#allocation6 + $0x340] ss:$8 sps:$4 sm:$0xff]   ;;  %v4764_v36 = vld [vmem:[#allocation6 + $0x354] ss:$8 sps:$4 sm:$0xff]   ;;  %v4759_v37 = vld [vmem:[#allocation6 + $0x250] ss:$8 sps:$4 sm:$0xff]  }
 0x979   : > { %v2822_v49 = vadd.f32 %v2814_v42, %v2661_v24  ;;  %v2824_v50 = vadd.f32 %v2816_v43, %v2702_v25  ;;  %v4743_v24 = vld [vmem:[#allocation6 + $0x224] ss:$8 sps:$4 sm:$0xff]   ;;  %v4762_v40 = vld [vmem:[#allocation6 + $0x350] ss:$8 sps:$4 sm:$0xff]   ;;  %v4765_v42 = vld [vmem:[#allocation6 + $0x260] ss:$8 sps:$4 sm:$0xff]  }
 0x97a   : > { %v2823_v51 = vadd.f32 %v2815_v44, %v2663_v28  ;;  %v2825_v52 = vadd.f32 %v2817_v47, %v2704_v29  ;;  %v4746_v25 = vld [vmem:[#allocation6 + $0x324] ss:$8 sps:$4 sm:$0xff]   ;;  %v4749_v28 = vld [vmem:[#allocation6 + $0x234] ss:$8 sps:$4 sm:$0xff]   ;;  %v4768_v43 = vld [vmem:[#allocation6 + $0x360] ss:$8 sps:$4 sm:$0xff]  }
 0x97b   : > { %v2830_v53 = vmul.f32 0.7978846, %v2822_v49  ;;  %v2832_v56 = vmul.f32 0.7978846, %v2824_v50  ;;  %v4752_v29 = vld [vmem:[#allocation6 + $0x334] ss:$8 sps:$4 sm:$0xff]  }
 0x97c   : > { %v2831_v54 = vmul.f32 0.7978846, %v2823_v51  ;;  %v2833_v55 = vmul.f32 0.7978846, %v2825_v52  ;;  %v4767_v41 = vld [vmem:[#allocation6 + $0x264] ss:$8 sps:$4 sm:$0xff]  }
 0x97d   : > { %4835 = vtanh.f32 %v2830_v53  ;;  %v4770_v46 = vld [vmem:[#allocation6 + $0x364] ss:$8 sps:$4 sm:$0xff]   ;;  %v4773_v44 = vld [vmem:[#allocation6 + $0x274] ss:$8 sps:$4 sm:$0xff]   ;;  %v4771_v49 = vld [vmem:[#allocation6 + $0x270] ss:$8 sps:$4 sm:$0xff]  }
 0x97e   : > { %4837 = vtanh.f32 %v2831_v54  ;;  %v4776_v47 = vld [vmem:[#allocation6 + $0x374] ss:$8 sps:$4 sm:$0xff]   ;;  %v1972_v50 = vsub.s32 6, %v5369_v6  ;;  %v4774_v51 = vld [vmem:[#allocation6 + $0x370] ss:$8 sps:$4 sm:$0xff]   ;;  %v1976_v53 = vsub.s32 7, %v5369_v6 }
 0x97f   : > { %4839 = vtanh.f32 %v2833_v55  ;;  %v4779_v52 = vld [vmem:[#allocation6 + $0x284] ss:$8 sps:$4 sm:$0xff]   ;;  %v1965_v55 = vrot.slane %v5580_v18, %v648_v3 }
 0x980   : > { %4841 = vtanh.f32 %v2832_v56  ;;  %v4782_v54 = vld [vmem:[#allocation6 + $0x384] ss:$8 sps:$4 sm:$0xff]   ;;  %v1973_v56 = vrot.slane %v5580_v18, %v1972_v50  ;;  %v4812_v50 = vld [vmem:[#allocation6 + $0x3d4] ss:$8 sps:$4 sm:$0xff]  }
 0x987   : > { %v4836_v14 = vpop.eup %4835 }
 0x988   : > { %v4838_v39 = vpop.eup %4837  ;;  %v2846_v57 = vadd.f32 1.0, %v4836_v14  ;;  %v4777_v14 = vld [vmem:[#allocation6 + $0x280] ss:$8 sps:$4 sm:$0xff]  }
 0x989   : > { %v4840_v61 = vpop.eup %4839  ;;  %v2847_v63 = vadd.f32 1.0, %v4838_v39  ;;  %v4780_v39 = vld [vmem:[#allocation6 + $0x380] ss:$8 sps:$4 sm:$0xff]  }
 0x98a   : > { %v4842_v1 = vpop.eup %4841  ;;  %v2849_v2 = vadd.f32 1.0, %v4840_v61  ;;  %v2854_v5 = vmul.f32 %v2846_v57, %v2790_v8  ;;  %v1969_v8 = vrot.slane %v5580_v18, %v652_v10  ;;  %v1977_v57 = vrot.slane %v5580_v18, %v1976_v53  ;;  %v4785_v61 = vld [vmem:[#allocation6 + $0x294] ss:$8 sps:$4 sm:$0xff]   ;;  %v4815_v53 = vld [vmem:[#allocation6 + $0x2e4] ss:$8 sps:$4 sm:$0xff]  }
 0x98b   : > { %v2855_v11 = vmul.f32 %v2847_v63, %v2791_v62  ;;  %v2848_v4 = vadd.f32 1.0, %v4842_v1  ;;  %v4788_v62 = vld [vmem:[#allocation6 + $0x394] ss:$8 sps:$4 sm:$0xff]  }
 0x98c   : > { %v2857_v13 = vmul.f32 %v2849_v2, %v2793_v20  ;;  %v2862_v19 = vpack.c.bf16 %v2854_v5, %v2854_v5 }
 0x98d   : > { %v2863_v15 = vpack.c.bf16 %v2855_v11, %v2855_v11  ;;  %v2856_v16 = vmul.f32 %v2848_v4, %v2792_v12  ;;  %v4783_v11 = vld [vmem:[#allocation6 + $0x290] ss:$8 sps:$4 sm:$0xff]  }
 0x98e   : > { %v2865_v17 = vpack.c.bf16 %v2857_v13, %v2857_v13  ;;  %v4786_v12 = vld [vmem:[#allocation6 + $0x390] ss:$8 sps:$4 sm:$0xff]   ;;  %v4791_v13 = vld [vmem:[#allocation6 + $0x2a4] ss:$8 sps:$4 sm:$0xff]  }
 0x98f   : > { %3682 = vmatprep.mubr.bf16.mxu1 %v2863_v15  ;;  %v2864_v22 = vpack.c.bf16 %v2856_v16, %v2856_v16  ;;  %v4794_v15 = vld [vmem:[#allocation6 + $0x3a4] ss:$8 sps:$4 sm:$0xff]  }
 0x990   : > { %3723 = vmatprep.mubr.bf16.mxu0 %v2865_v17  ;;  %3683 = vmatmul.mubr.bf16.vlgmr.msra.gmra.mrb[32].mxu1 %v2862_v19 }
 0x991   : > { %3724 = vmatmul.mubr.bf16.vlgmr.msra.gmra.mrb[20].mxu0 %v2864_v22  ;;  %3733 = vmatpush1.bf16.msra.mxu1 %v4729_v0 }
 0x992   : > { %3774 = vmatpush1.bf16.msra.mxu0 %v4732_v45  ;;  %3734 = vmatprep.subr.bf16.mxu1 %v4737_v21 }
 0x993   : > { %3775 = vmatprep.subr.bf16.mxu0 %v4740_v38 }
 0x995   : > { %3735 = vmatpush1.bf16.msra.mxu1 %v4735_v23  ;;  %v4789_v23 = vld [vmem:[#allocation6 + $0x2a0] ss:$8 sps:$4 sm:$0xff]  }
 0x996   : > { %3776 = vmatpush1.bf16.msra.mxu0 %v4738_v58  ;;  %3736 = vmatprep.subr.bf16.mxu1 %v4743_v24 }
 0x997   : > { %3777 = vmatprep.subr.bf16.mxu0 %v4746_v25  ;;  %v4792_v25 = vld [vmem:[#allocation6 + $0x3a0] ss:$8 sps:$4 sm:$0xff]  }
 0x999   : > { %3737 = vmatpush1.bf16.msra.mxu1 %v4741_v26  ;;  %v4797_v26 = vld [vmem:[#allocation6 + $0x2b4] ss:$8 sps:$4 sm:$0xff]  }
 0x99a   : > { %3778 = vmatpush1.bf16.msra.mxu0 %v4744_v27  ;;  %3738 = vmatprep.subr.bf16.mxu1 %v4749_v28 }
 0x99b   : > { %3779 = vmatprep.subr.bf16.mxu0 %v4752_v29  ;;  %v4800_v29 = vld [vmem:[#allocation6 + $0x3b4] ss:$8 sps:$4 sm:$0xff]  }
 0x99d   : > { %3739 = vmatpush1.bf16.msra.mxu1 %v4747_v30 }
 0x99e   : > { %3780 = vmatpush1.bf16.msra.mxu0 %v4750_v31  ;;  %3740 = vmatprep.subr.bf16.mxu1 %v4755_v32 }
 0x99f   : > { %3781 = vmatprep.subr.bf16.mxu0 %v4758_v33 }
 0x9a1   : > { %3741 = vmatpush1.bf16.msra.mxu1 %v4753_v7  ;;  %v4795_v7 = vld [vmem:[#allocation6 + $0x2b0] ss:$8 sps:$4 sm:$0xff]  }
 0x9a2   : > { %3782 = vmatpush1.bf16.msra.mxu0 %v4756_v34  ;;  %3742 = vmatprep.subr.bf16.mxu1 %v4761_v35  ;;  %v4798_v34 = vld [vmem:[#allocation6 + $0x3b0] ss:$8 sps:$4 sm:$0xff]   ;;  %v4803_v35 = vld [vmem:[#allocation6 + $0x2c4] ss:$8 sps:$4 sm:$0xff]  }
 0x9a3   : > { %3783 = vmatprep.subr.bf16.mxu0 %v4764_v36 }
 0x9a5   : > { %3743 = vmatpush1.bf16.msra.mxu1 %v4759_v37 }
 0x9a6   : > { %3784 = vmatpush1.bf16.msra.mxu0 %v4762_v40  ;;  %3744 = vmatprep.subr.bf16.mxu1 %v4767_v41  ;;  %v4806_v40 = vld [vmem:[#allocation6 + $0x3c4] ss:$8 sps:$4 sm:$0xff]  }
 0x9a7   : > { %3785 = vmatprep.subr.bf16.mxu0 %v4770_v46 }
 0x9a9   : > { %3745 = vmatpush1.bf16.msra.mxu1 %v4765_v42 }
 0x9aa   : > { %3786 = vmatpush1.bf16.msra.mxu0 %v4768_v43  ;;  %3746 = vmatprep.subr.bf16.mxu1 %v4773_v44  ;;  %v4801_v44 = vld [vmem:[#allocation6 + $0x2c0] ss:$8 sps:$4 sm:$0xff]  }
 0x9ab   : > { %3787 = vmatprep.subr.bf16.mxu0 %v4776_v47  ;;  %v4804_v47 = vld [vmem:[#allocation6 + $0x3c0] ss:$8 sps:$4 sm:$0xff]  }
 0x9ad   : > { %3747 = vmatpush1.bf16.msra.mxu1 %v4771_v49  ;;  %v4809_v49 = vld [vmem:[#allocation6 + $0x2d4] ss:$8 sps:$4 sm:$0xff]  }
 0x9ae   : > { %3788 = vmatpush1.bf16.msra.mxu0 %v4774_v51  ;;  %3748 = vmatprep.subr.bf16.mxu1 %v4779_v52  ;;  %v4807_v51 = vld [vmem:[#allocation6 + $0x2d0] ss:$8 sps:$4 sm:$0xff]  }
 0x9af   : > { %3789 = vmatprep.subr.bf16.mxu0 %v4782_v54  ;;  %v4810_v52 = vld [vmem:[#allocation6 + $0x3d0] ss:$8 sps:$4 sm:$0xff]   ;;  %v4818_v54 = vld [vmem:[#allocation6 + $0x3e4] ss:$8 sps:$4 sm:$0xff]  }
 0x9b0   : > { %v2742_v63 = vpop.f32.mrb[28].mxu1  ;;  %v2783_v1 = vpop.f32.mrb[16].mxu0 }
 0x9b1   : > { %v5602_v20 = vadd.f32 %v2742_v63, %v1965_v55  ;;  %v5604_v3 = vadd.f32 %v2783_v1, %v1973_v56  ;;  %v2744_v2 = vpop.f32.mrb[29].mxu1  ;;  %v2785_v5 = vpop.f32.mrb[17].mxu0  ;;  %3749 = vmatpush1.bf16.msra.mxu1 %v4777_v14  ;;  %v4813_v55 = vld [vmem:[#allocation6 + $0x2e0] ss:$8 sps:$4 sm:$0xff]   ;;  %v4821_v14 = vld [vmem:[#allocation6 + $0x2f4] ss:$8 sps:$4 sm:$0xff]  }
 0x9b2   : > { %v5606_v4 = vadd.f32 %v2744_v2, %v1969_v8  ;;  %v5608_v6 = vadd.f32 %v2785_v5, %v1977_v57  ;;  %3790 = vmatpush1.bf16.msra.mxu0 %v4780_v39  ;;  %v2746_v10 = vpop.f32.mrb[30].mxu1  ;;  %v2787_v18 = vpop.f32.mrb[18].mxu0  ;;  %3750 = vmatprep.subr.bf16.mxu1 %v4785_v61  ;;  %v4816_v56 = vld [vmem:[#allocation6 + $0x3e0] ss:$8 sps:$4 sm:$0xff]   ;;  %v4824_v8 = vld [vmem:[#allocation6 + $0x3f4] ss:$8 sps:$4 sm:$0xff]  }
 0x9b3   : > { %v2802_v0 = vmul.f32 0.044715, %v5602_v20  ;;  %v2804_v16 = vmul.f32 0.044715, %v5604_v3  ;;  %v2747_v17 = vpop.f32.mrb[31].mxu1  ;;  %v2788_v45 = vpop.f32.mrb[19].mxu0  ;;  %3791 = vmatprep.subr.bf16.mxu0 %v4788_v62 }
 0x9b4   : > { %v2803_v19 = vmul.f32 0.044715, %v5606_v4  ;;  %v2805_v21 = vmul.f32 0.044715, %v5608_v6  ;;  %v2794_v61 = vmul.f32 0.5, %v5602_v20  ;;  %v2795_v2 = vmul.f32 0.5, %v5606_v4 }
 0x9b5   : > { %v2810_v22 = vmul.f32 %v2802_v0, %v5602_v20  ;;  %v2812_v38 = vmul.f32 %v2804_v16, %v5604_v3  ;;  %3751 = vmatpush1.bf16.msra.mxu1 %v4783_v11  ;;  %v4819_v1 = vld [vmem:[#allocation6 + $0x2f0] ss:$8 sps:$4 sm:$0xff]   ;;  %v2797_v10 = vmul.f32 0.5, %v5608_v6  ;;  %v2796_v0 = vmul.f32 0.5, %v5604_v3 }
 0x9b6   : > { %v2811_v58 = vmul.f32 %v2803_v19, %v5606_v4  ;;  %v2813_v24 = vmul.f32 %v2805_v21, %v5608_v6  ;;  %3792 = vmatpush1.bf16.msra.mxu0 %v4786_v12  ;;  %3752 = vmatprep.subr.bf16.mxu1 %v4791_v13  ;;  %v4822_v12 = vld [vmem:[#allocation6 + $0x3f0] ss:$8 sps:$4 sm:$0xff]  }
 0x9b7   : > { %v2818_v27 = vmul.f32 %v2810_v22, %v5602_v20  ;;  %v2820_v28 = vmul.f32 %v2812_v38, %v5604_v3  ;;  %3793 = vmatprep.subr.bf16.mxu0 %v4794_v15 }
 0x9b8   : > { %v2819_v30 = vmul.f32 %v2811_v58, %v5606_v4  ;;  %v2821_v31 = vmul.f32 %v2813_v24, %v5608_v6 }
 0x9b9   : > { %v2826_v32 = vadd.f32 %v2818_v27, %v5602_v20  ;;  %v2828_v33 = vadd.f32 %v2820_v28, %v5604_v3  ;;  %3753 = vmatpush1.bf16.msra.mxu1 %v4789_v23 }
 0x9ba   : > { %3794 = vmatpush1.bf16.msra.mxu0 %v4792_v25  ;;  %3754 = vmatprep.subr.bf16.mxu1 %v4797_v26  ;;  %v2827_v36 = vadd.f32 %v2819_v30, %v5606_v4  ;;  %v2829_v37 = vadd.f32 %v2821_v31, %v5608_v6  ;;  %v2998_v6 = vld [vmem:[%s5666_s11] sm:$0x3] }
 0x9bb   : > { %3795 = vmatprep.subr.bf16.mxu0 %v4800_v29  ;;  %v2834_v41 = vmul.f32 0.7978846, %v2826_v32  ;;  %v2836_v43 = vmul.f32 0.7978846, %v2828_v33  ;;  %v3003_v22 = vrot.slane %v2998_v6, %v5378_v9  ;;  %v3007_v3 = vrot.slane %v2998_v6, %v5512_v48 }
 0x9bc   : > { %v2835_v46 = vmul.f32 0.7978846, %v2827_v36  ;;  %v2837_v42 = vmul.f32 0.7978846, %v2829_v37 }
 0x9bd   : > { %3755 = vmatpush1.bf16.msra.mxu1 %v4795_v7  ;;  %4843 = vtanh.f32 %v2834_v41 }
 0x9be   : > { %3796 = vmatpush1.bf16.msra.mxu0 %v4798_v34  ;;  %3756 = vmatprep.subr.bf16.mxu1 %v4803_v35  ;;  %4845 = vtanh.f32 %v2835_v46 }
 0x9bf   : > { %3797 = vmatprep.subr.bf16.mxu0 %v4806_v40  ;;  %4847 = vtanh.f32 %v2837_v42 }
 0x9c0   : > { %4849 = vtanh.f32 %v2836_v43 }
 0x9c1   : > { %3757 = vmatpush1.bf16.msra.mxu1 %v4801_v44 }
 0x9c2   : > { %3798 = vmatpush1.bf16.msra.mxu0 %v4804_v47  ;;  %3758 = vmatprep.subr.bf16.mxu1 %v4809_v49 }
 0x9c3   : > { %3799 = vmatprep.subr.bf16.mxu0 %v4812_v50 }
 0x9c5   : > { %3759 = vmatpush1.bf16.msra.mxu1 %v4807_v51 }
 0x9c6   : > { %3800 = vmatpush1.bf16.msra.mxu0 %v4810_v52  ;;  %3760 = vmatprep.subr.bf16.mxu1 %v4815_v53 }
 0x9c7   : > { %v4844_v39 = vpop.eup %4843  ;;  %3801 = vmatprep.subr.bf16.mxu0 %v4818_v54 }
 0x9c8   : > { %v4846_v57 = vpop.eup %4845  ;;  %v2850_v62 = vadd.f32 1.0, %v4844_v39 }
 0x9c9   : > { %v4848_v63 = vpop.eup %4847  ;;  %3761 = vmatpush1.bf16.msra.mxu1 %v4813_v55  ;;  %v2851_v5 = vadd.f32 1.0, %v4846_v57 }
 0x9ca   : > { %v4850_v11 = vpop.eup %4849  ;;  %3802 = vmatpush1.bf16.msra.mxu0 %v4816_v56  ;;  %3762 = vmatprep.subr.bf16.mxu1 %v4821_v14  ;;  %v2853_v18 = vadd.f32 1.0, %v4848_v63  ;;  %v2858_v13 = vmul.f32 %v2850_v62, %v2794_v61 }
 0x9cb   : > { %3803 = vmatprep.subr.bf16.mxu0 %v4824_v8  ;;  %v2859_v15 = vmul.f32 %v2851_v5, %v2795_v2  ;;  %v2852_v20 = vadd.f32 1.0, %v4850_v11 }
 0x9cc   : > { %v2861_v16 = vmul.f32 %v2853_v18, %v2797_v10  ;;  %v2866_v19 = vpack.c.bf16 %v2858_v13, %v2858_v13 }
 0x9cd   : > { %3763 = vmatpush1.bf16.msra.mxu1 %v4819_v1  ;;  %v2867_v17 = vpack.c.bf16 %v2859_v15, %v2859_v15  ;;  %v2860_v45 = vmul.f32 %v2852_v20, %v2796_v0 }
 0x9ce   : > { %3804 = vmatpush1.bf16.msra.mxu0 %v4822_v12  ;;  %v2869_v4 = vpack.c.bf16 %v2861_v16, %v2861_v16 }
 0x9cf   : > { %3764 = vmatprep.mubr.bf16.mxu1 %v2867_v17  ;;  %v2868_v21 = vpack.c.bf16 %v2860_v45, %v2860_v45 }
 0x9d0   : > { %3805 = vmatprep.mubr.bf16.mxu0 %v2869_v4  ;;  %3765 = vmatmul.mubr.bf16.vlgmr.msra.gmra.mrb[36].mxu1 %v2866_v19 }
 0x9d1   : > { %3806 = vmatmul.mubr.bf16.vlgmr.msra.gmra.mrb[24].mxu0 %v2868_v21 }
 0xa63   : > { %v3684_v38 = vpop.f32.mrb[32].mxu1 }
 0xa64   : > { %v3685_v23 = vadd.f32 %v3684_v38, %v3003_v22  ;;  %v3725_v58 = vpop.f32.mrb[20].mxu0  ;;  %v3686_v24 = vpop.f32.mrb[33].mxu1 }
 0xa65   : > { %v3687_v25 = vadd.f32 %v3686_v24, %v3007_v3  ;;  %v3727_v26 = vpop.f32.mrb[21].mxu0  ;;  %v3688_v27 = vpop.f32.mrb[34].mxu1 }
 0xa66   : > { %v3726_v28 = vadd.f32 %v3725_v58, %v3685_v23  ;;  %v3729_v29 = vpop.f32.mrb[22].mxu0  ;;  %v3689_v30 = vpop.f32.mrb[35].mxu1 }
 0xa67   : > { %v3728_v31 = vadd.f32 %v3727_v26, %v3687_v25  ;;  %v3730_v32 = vpop.f32.mrb[23].mxu0 }
 0xaa3   : > { %v3766_v33 = vpop.f32.mrb[36].mxu1 }
 0xaa4   : > { %v3767_v7 = vadd.f32 %v3766_v33, %v3726_v28  ;;  %v3807_v34 = vpop.f32.mrb[24].mxu0  ;;  %v3768_v35 = vpop.f32.mrb[37].mxu1 }
 0xaa5   : > { %v3769_v36 = vadd.f32 %v3768_v35, %v3728_v31  ;;  %v3809_v37 = vpop.f32.mrb[25].mxu0  ;;  %v3770_v40 = vpop.f32.mrb[38].mxu1 }
 0xaa6   : > { %v3808_v41 = vadd.f32 %v3807_v34, %v3767_v7  ;;  %v3811_v46 = vpop.f32.mrb[26].mxu0  ;;  %v3771_v42 = vpop.f32.mrb[39].mxu1 }
 0xaa7   : > { %v3810_v43 = vadd.f32 %v3809_v37, %v3769_v36  ;;  %v3812_v44 = vpop.f32.mrb[27].mxu0 }
 0xaa8   : > { %v3814_v47 = vadd.f32 %v3808_v41, %v5565_v60  ;;  %v3816_v60 = vld [vmem:[%s5667_s12] sm:$0x3] }
 0xaa9   : > { %v3815_v49 = vadd.f32 %v3810_v43, %v5563_v59  ;;  %v3817_v59 = vld [vmem:[%s5684_s17] sm:$0x3]  ;;  %v3838_v61 = vrot.slane %v3816_v60, %v5378_v9  ;;  %v3842_v62 = vrot.slane %v3816_v60, %v5512_v48 }
 0xaaa   : > { %v3851_v1 = vrot.slane %v3817_v59, %v5378_v9  ;;  %v3855_v2 = vrot.slane %v3817_v59, %v5512_v48 }
 0xaab   : > { %v3818_v50 = vadd.f32 %v3815_v49, %v3814_v47 }
 0xaad   : > { %3819 = vadd.xlane.f32.xlu0 %v3818_v50 }
 0xb3a   : > { %v3820_v51 = vpop.xlane.xlu0 %3819 }
 0xb3b   : > { %v3821_v52 = vmul.f32 0.00390625, %v3820_v51 }
 0xb3d   : > { %v3822_v53 = vsub.f32 %v3814_v47, %v3821_v52  ;;  %v3823_v54 = vsub.f32 %v3815_v49, %v3821_v52 }
 0xb3f   : > { %v3824_v55 = vmul.f32 %v3822_v53, %v3822_v53  ;;  %v3825_v56 = vmul.f32 %v3823_v54, %v3823_v54 }
 0xb41   : > { %v3826_v14 = vadd.f32 %v3825_v56, %v3824_v55 }
 0xb43   : > { %3827 = vadd.xlane.f32.xlu1 %v3826_v14 }
 0xbd0   : > { %v3828_v39 = vpop.xlane.xlu1 %3827 }
 0xbd1   : > { %v3829_v8 = vmul.f32 0.00390625, %v3828_v39 }
 0xbd3   : > { %v3830_v57 = vadd.f32 1e-12, %v3829_v8 }
 0xbd5   : > { %4851 = vrsqrt.f32 %v3830_v57 }
 0xbdf   : > { %v4852_v63 = vpop.eup %4851 }
 0xbe0   : > { %v3832_v5 = vmul.f32 %v4852_v63, %v3822_v53  ;;  %v3833_v11 = vmul.f32 %v4852_v63, %v3823_v54 }
 0xbe2   : > { %v3845_v12 = vmul.f32 %v3838_v61, %v3832_v5  ;;  %v3846_v10 = vmul.f32 %v3842_v62, %v3833_v11 }
 0xbe4   : > { %v3858_v18 = vadd.f32 %v3851_v1, %v3845_v12  ;;  %v3859_v13 = vadd.f32 %v3855_v2, %v3846_v10 }
 0xbe6   : > { %3860 = vst [vmem:[%s525_s25] sm:$0xff] %v3858_v18  ;;  %3861 = vst [vmem:[%s525_s25 + $0x8] sm:$0xff] %v3859_v13 }
 0xbe7 PF: > { %s5686_s26 = sld [smem:[#allocation9_spill]] }
 0xbed   : > { %s26_s29 = sadd.s32 1, %s5686_s26  }
 0xbee   : > { %p23_p5 = scmp.ge.s32.totalorder %s26_s29, 4  }
 0xbf0   :  { %25 = sbr.rel (!%p23_p5) target bundleno = 5 (0x5), region = 122 }
 0xbf7   :  { %3883 = vsyncpa [#allocation3], 1 }
 0xbf8   :  { %3885 = vsyncpa [#allocation3 + $0x1], 1 }
 0xbf9   :  { %3886 = vsyncpa [#allocation5], 1 }

</bundles_post_ra>
